<compile_context>
chip_gen: v5e
topology: v5e:2x2
jax: 0.10.0
libtpu: 0.0.40
codegen_flags: <defaults>
</compile_context>

<pallas_src>
import functools
import math

import jax
import jax.numpy as jnp
from jax.experimental import pallas as pl
from jax.experimental.pallas import tpu as pltpu

# ---------------- synthetic "BERT" config (small) ----------------
VOCAB = 100
TYPE_VOCAB = 2
MAX_POS = 32
HIDDEN = 32
NUM_HEADS = 4
HEAD_DIM = HIDDEN // NUM_HEADS
INTERMEDIATE = 64
NUM_LAYERS = 2
NUM_CLASSES = 3
NUM_TAGS = 5
NUM_HIDDEN = 1            # FineTunedBert default num_hidden=1
LN_EPS = 1e-12
OUT_LANES = 128           # lane-dense padded output width for heads / losses


def _erf(v):
    # Abramowitz & Stegun 7.1.26 polynomial erf, |abs err| <= 1.5e-7.
    # (guaranteed Mosaic lowering: only VPU ops + one EUP exp)
    a1, a2, a3, a4, a5 = (0.254829592, -0.284496736, 1.421413741,
                          -1.453152027, 1.061405429)
    pconst = 0.3275911
    sgn = jnp.where(v >= 0.0, 1.0, -1.0)
    av = jnp.abs(v)
    t = 1.0 / (1.0 + pconst * av)
    poly = ((((a5 * t + a4) * t + a3) * t + a2) * t + a1) * t
    return sgn * (1.0 - poly * jnp.exp(-av * av))


def _gelu_exact(v):
    # matches PyTorch nn.GELU default (erf form), not the tanh approximation
    return 0.5 * v * (1.0 + _erf(v * 0.7071067811865476))


# ---------------- the fused forward kernel ----------------
def _fused_bert_kernel(ids_ref, tt_ref, mask_ref, gl_ref, gt_ref,
                       wemb_ref, pemb_ref, temb_ref, eg_ref, eb_ref,
                       wqkv_ref, bqkv_ref, wo_ref, bo_ref, g1_ref, be1_ref,
                       w1_ref, b1_ref, w2_ref, b2_ref, g2_ref, be2_ref,
                       pw_ref, pb_ref, cw_ref, cb_ref, tw_ref, tb_ref,
                       logits_ref, tags_ref, loss_ref,
                       *, num_hidden):
    f32 = jnp.float32
    bf16 = jnp.bfloat16
    B, S = mask_ref.shape
    BS = B * S
    L = wqkv_ref.shape[0]
    H = wo_ref.shape[2]
    NH = NUM_HEADS
    HD = H // NH
    V = wemb_ref.shape[0]
    TV = temb_ref.shape[0]

    def ln(v, g, b):
        mu = jnp.mean(v, axis=-1, keepdims=True)
        var = jnp.mean((v - mu) ** 2, axis=-1, keepdims=True)
        return (v - mu) * jax.lax.rsqrt(var + LN_EPS) * g + b

    # ---- embeddings: one-hot matmul gathers (tables resident in VMEM) ----
    ids = ids_ref[...]                                           # (BS,1) int32
    tts = tt_ref[...]                                            # (BS,1) int32
    v_iota = jax.lax.broadcasted_iota(jnp.int32, (BS, V), 1)
    t_iota = jax.lax.broadcasted_iota(jnp.int32, (BS, TV), 1)
    onehot_w = (ids == v_iota).astype(f32).astype(bf16)
    onehot_t = (tts == t_iota).astype(f32).astype(bf16)
    we = jnp.dot(onehot_w, wemb_ref[...], preferred_element_type=f32)   # (BS,H)
    te = jnp.dot(onehot_t, temb_ref[...], preferred_element_type=f32)   # (BS,H)
    pe = pemb_ref[0:S, :]                                               # (S,H) f32
    emb = (we + te).reshape(B, S, H) + pe[None, :, :]                   # broadcast add
    x = ln(emb.reshape(BS, H), eg_ref[...], eb_ref[...])                # (BS,H)

    # additive key mask, hoisted out of layer / head loops
    mask_f = mask_ref[...].astype(f32)                                  # (B,S)
    bias_k = ((1.0 - mask_f) * -1e9)[:, None, :]                        # (B,1,S)
    scale = 1.0 / math.sqrt(HD)

    hiddens = [x] if num_hidden > 1 else None
    for li in range(L):                      # static unroll over layers
        # fused QKV projection: single (BS,H)@(H,3H) matmul per layer
        qkv = jnp.dot(x.astype(bf16), wqkv_ref[li],
                      preferred_element_type=f32) + bqkv_ref[li]        # (BS,3H)
        ctx_heads = []
        for h in range(NH):                  # static unroll over heads
            q3 = (qkv[:, h * HD:(h + 1) * HD] * scale).astype(bf16).reshape(B, S, HD)
            k3 = qkv[:, H + h * HD:H + (h + 1) * HD].astype(bf16).reshape(B, S, HD)
            v3 = qkv[:, 2 * H + h * HD:2 * H + (h + 1) * HD].astype(bf16).reshape(B, S, HD)
            s = jnp.einsum('bqd,bkd->bqk', q3, k3,
                           preferred_element_type=f32) + bias_k         # (B,S,S)
            s = s - jnp.max(s, axis=-1, keepdims=True)
            p = jnp.exp(s)
            p = p / jnp.sum(p, axis=-1, keepdims=True)                  # exact softmax
            ctx = jnp.einsum('bqk,bkd->bqd', p.astype(bf16), v3,
                             preferred_element_type=f32)                # (B,S,HD)
            ctx_heads.append(ctx.reshape(BS, HD))
        ctx_all = jnp.concatenate(ctx_heads, axis=-1)                   # (BS,H)
        attn = jnp.dot(ctx_all.astype(bf16), wo_ref[li],
                       preferred_element_type=f32) + bo_ref[li]
        h1 = ln(x + attn, g1_ref[li], be1_ref[li])
        ff = jnp.dot(h1.astype(bf16), w1_ref[li],
                     preferred_element_type=f32) + b1_ref[li]
        ff = _gelu_exact(ff)
        ff = jnp.dot(ff.astype(bf16), w2_ref[li],
                     preferred_element_type=f32) + b2_ref[li]
        x = ln(h1 + ff, g2_ref[li], be2_ref[li])
        if hiddens is not None:
            hiddens.append(x)

    last = x                                                            # (BS,H)

    def take_cls(h2):                        # CLS rows via reshape + sublane slice
        return h2.reshape(B, S, H)[:, 0, :]                             # (B,H)

    if num_hidden > 1:
        pooled = jnp.concatenate([take_cls(hh) for hh in hiddens[-num_hidden:]],
                                 axis=-1)                               # (B,H*nh)
    else:
        cls = take_cls(last)
        pooled = jnp.tanh(jnp.dot(cls.astype(bf16), pw_ref[...],
                                  preferred_element_type=f32) + pb_ref[...])

    # heads: weights pre-padded to 128 output lanes -> lane-dense stores
    labels_logits = jnp.dot(pooled.astype(bf16), cw_ref[...],
                            preferred_element_type=f32) + cb_ref[...]   # (B,128)
    tags_flat = jnp.dot(last.astype(bf16), tw_ref[...],
                        preferred_element_type=f32) + tb_ref[...]       # (BS,128)

    logits_ref[...] = labels_logits
    tags_ref[...] = tags_flat

    lanes = labels_logits.shape[-1]

    # BCEWithLogitsLoss, mean over the B x NUM_CLASSES real columns
    c_iota = jax.lax.broadcasted_iota(jnp.int32, (B, lanes), 1)
    z = labels_logits
    y = gl_ref[...]                                                     # padded gold
    bce_el = jnp.maximum(z, 0.0) - z * y + jnp.log(1.0 + jnp.exp(-jnp.abs(z)))
    bce = jnp.sum(jnp.where(c_iota < NUM_CLASSES, bce_el, 0.0)) / (B * NUM_CLASSES)

    # CrossEntropyLoss(ignore_index=-100): the reference first filters tokens
    # with attention_mask == 1 and then CE ignores label == -100, so
    # valid == (mask == 1) & (label != -100) matches PyTorch exactly.
    tags3 = tags_flat.reshape(B, S, lanes)
    l_iota = jax.lax.broadcasted_iota(jnp.int32, (B, S, lanes), 2)
    masked = jnp.where(l_iota < NUM_TAGS, tags3, -1e30)
    m = jnp.max(masked, axis=-1, keepdims=True)
    lse = jnp.log(jnp.sum(jnp.exp(masked - m), axis=-1)) + m[..., 0]    # (B,S)
    labels = gt_ref[...]                                                # (B,S) int32
    valid = jnp.logical_and(mask_ref[...] == 1, labels != -100)
    safe = jnp.where(valid, labels, 0)
    picked = jnp.sum(jnp.where(l_iota == safe[..., None], tags3, 0.0), axis=-1)
    per_tok = lse - picked
    cnt = jnp.sum(valid.astype(f32))
    # NOTE: with zero valid tokens this returns 0 where PyTorch would give NaN.
    ce = jnp.sum(jnp.where(valid, per_tok, 0.0)) / jnp.maximum(cnt, 1.0)

    out_iota = jax.lax.broadcasted_iota(jnp.int32, (1, lanes), 1)
    loss_ref[...] = jnp.where(out_iota == 0, bce.reshape(1, 1),
                              jnp.where(out_iota == 1, ce.reshape(1, 1), 0.0))


# ---------------- wrapper / glue ----------------
def pack_params(params):
    """One-time repack: stack layer weights along a leading layer axis, fuse
    Q|K|V into one (L,H,3H) weight, cast matmul weights to bf16, and zero-pad
    the classifier / tagger heads to 128 output lanes so the kernel's stores
    are lane-dense."""
    bf16 = jnp.bfloat16

    def stack(key):
        return jnp.stack([lp[key] for lp in params["layers"]], axis=0)

    def pad_lanes(w):
        return jnp.pad(w, ((0, 0), (0, OUT_LANES - w.shape[1])))

    return dict(
        word_emb=params["word_emb"].astype(bf16),
        pos_emb=params["pos_emb"],
        type_emb=params["type_emb"].astype(bf16),
        emb_g=params["emb_g"], emb_b=params["emb_b"],
        wqkv=jnp.concatenate([stack("wq"), stack("wk"), stack("wv")],
                             axis=-1).astype(bf16),                    # (L,H,3H)
        bqkv=jnp.concatenate([stack("bq"), stack("bk"), stack("bv")], axis=-1),
        wo=stack("wo").astype(bf16), bo=stack("bo"),
        g1=stack("g1"), be1=stack("be1"),
        w1=stack("w1").astype(bf16), b1=stack("b1"),
        w2=stack("w2").astype(bf16), b2=stack("b2"),
        g2=stack("g2"), be2=stack("be2"),
        pool_w=params["pool_w"].astype(bf16), pool_b=params["pool_b"],
        clf_w=pad_lanes(params["clf_w"]).astype(bf16),
        clf_b=pad_lanes(params["clf_b"]),
        tag_w=pad_lanes(params["tag_w"]).astype(bf16),
        tag_b=pad_lanes(params["tag_b"]),
    )


def finetuned_bert_forward(packed, input_ids, attention_mask, token_type_ids,
                           gold_labels=None, gold_tags=None, num_hidden=NUM_HIDDEN):
    B, S = input_ids.shape
    BS = B * S

    ids_flat = input_ids.reshape(BS, 1).astype(jnp.int32)
    tt_flat = token_type_ids.reshape(BS, 1).astype(jnp.int32)
    mask_i = attention_mask.astype(jnp.int32)

    have_labels = gold_labels is not None
    have_tags = gold_tags is not None
    gl = (gold_labels.astype(jnp.float32) if have_labels
          else jnp.zeros((B, NUM_CLASSES), jnp.float32))
    gl_pad = jnp.pad(gl, ((0, 0), (0, OUT_LANES - gl.shape[1])))
    gt = (gold_tags.astype(jnp.int32) if have_tags
          else jnp.full((B, S), -100, jnp.int32))

    kern = functools.partial(_fused_bert_kernel, num_hidden=num_hidden)
    out_shape = (
        jax.ShapeDtypeStruct((B, OUT_LANES), jnp.float32),    # padded logits
        jax.ShapeDtypeStruct((BS, OUT_LANES), jnp.float32),   # padded tags
        jax.ShapeDtypeStruct((1, OUT_LANES), jnp.float32),    # [bce, ce, 0...]
    )

    logits_pad, tags_pad, losses = pl.pallas_call(
        kern,
        out_shape=out_shape,
        compiler_params=pltpu.CompilerParams(vmem_limit_bytes=32 * 1024 * 1024),
    )(ids_flat, tt_flat, mask_i, gl_pad, gt,
      packed["word_emb"], packed["pos_emb"], packed["type_emb"],
      packed["emb_g"], packed["emb_b"],
      packed["wqkv"], packed["bqkv"], packed["wo"], packed["bo"],
      packed["g1"], packed["be1"], packed["w1"], packed["b1"],
      packed["w2"], packed["b2"], packed["g2"], packed["be2"],
      packed["pool_w"], packed["pool_b"],
      packed["clf_w"], packed["clf_b"],
      packed["tag_w"], packed["tag_b"])

    labels_logits = logits_pad[:, :NUM_CLASSES]
    tags_logits = tags_pad.reshape(B, S, OUT_LANES)[:, :, :NUM_TAGS]
    classification_loss = losses[0, 0] if have_labels else jnp.float32(0.0)
    tagging_loss = losses[0, 1] if have_tags else jnp.float32(0.0)
    return labels_logits, tags_logits, classification_loss, tagging_loss


# ---------------- deterministic parameter init ----------------
def init_params(key):
    keys = iter(jax.random.split(key, 64))

    def dense(shape, scale=0.02):
        return (scale * jax.random.normal(next(keys), shape)).astype(jnp.float32)

    def ones(shape):
        return jnp.ones(shape, jnp.float32)

    def zeros(shape):
        return jnp.zeros(shape, jnp.float32)

    params = dict(
        word_emb=dense((VOCAB, HIDDEN)),
        pos_emb=dense((MAX_POS, HIDDEN)),
        type_emb=dense((TYPE_VOCAB, HIDDEN)),
        emb_g=ones((1, HIDDEN)), emb_b=zeros((1, HIDDEN)),
        pool_w=dense((HIDDEN, HIDDEN)), pool_b=zeros((1, HIDDEN)),
        clf_w=dense((HIDDEN * NUM_HIDDEN, NUM_CLASSES)), clf_b=zeros((1, NUM_CLASSES)),
        tag_w=dense((HIDDEN, NUM_TAGS)), tag_b=zeros((1, NUM_TAGS)),
        layers=[],
    )
    for _ in range(NUM_LAYERS):
        params["layers"].append(dict(
            wq=dense((HIDDEN, HIDDEN)), bq=zeros((1, HIDDEN)),
            wk=dense((HIDDEN, HIDDEN)), bk=zeros((1, HIDDEN)),
            wv=dense((HIDDEN, HIDDEN)), bv=zeros((1, HIDDEN)),
            wo=dense((HIDDEN, HIDDEN)), bo=zeros((1, HIDDEN)),
            g1=ones((1, HIDDEN)), be1=zeros((1, HIDDEN)),
            w1=dense((HIDDEN, INTERMEDIATE)), b1=zeros((1, INTERMEDIATE)),
            w2=dense((INTERMEDIATE, HIDDEN)), b2=zeros((1, HIDDEN)),
            g2=ones((1, HIDDEN)), be2=zeros((1, HIDDEN)),
        ))
    return params


if __name__ == "__main__":
    key = jax.random.PRNGKey(0)
    pkey, dkey = jax.random.split(key)
    params = init_params(pkey)
    packed = pack_params(params)

    B, S = 2, 8
    k1, k2, k3 = jax.random.split(dkey, 3)
    input_ids = jax.random.randint(k1, (B, S), 0, VOCAB, dtype=jnp.int32)
    attention_mask = jnp.array([[1, 1, 1, 1, 1, 1, 0, 0],
                                [1, 1, 1, 1, 0, 0, 0, 0]], dtype=jnp.int32)
    token_type_ids = jnp.zeros((B, S), dtype=jnp.int32)
    gold_labels = jax.random.bernoulli(k2, 0.5, (B, NUM_CLASSES)).astype(jnp.float32)
    gold_tags = jax.random.randint(k3, (B, S), 0, NUM_TAGS, dtype=jnp.int32)
    gold_tags = jnp.where(attention_mask == 1, gold_tags, -100)

    outputs = finetuned_bert_forward(packed, input_ids, attention_mask,
                                     token_type_ids,
                                     gold_labels=gold_labels,
                                     gold_tags=gold_tags)
    outputs = jax.block_until_ready(outputs)
    labels_logits, tags_logits, clf_loss, tag_loss = outputs
    assert labels_logits.shape == (B, NUM_CLASSES)
    assert tags_logits.shape == (B, S, NUM_TAGS)
    assert clf_loss.shape == () and tag_loss.shape == ()
    print("KERNEL_OK")
</pallas_src>

<mosaic_0001>
module attributes {stable_mosaic.version = 11 : i64} {
  func.func @_fused_bert_kernel(%arg0: memref<16x1xi32, #tpu.memory_space<vmem>>, %arg1: memref<16x1xi32, #tpu.memory_space<vmem>>, %arg2: memref<2x8xi32, #tpu.memory_space<vmem>>, %arg3: memref<2x128xf32, #tpu.memory_space<vmem>>, %arg4: memref<2x8xi32, #tpu.memory_space<vmem>>, %arg5: memref<100x32xbf16, #tpu.memory_space<vmem>>, %arg6: memref<32x32xf32, #tpu.memory_space<vmem>>, %arg7: memref<2x32xbf16, #tpu.memory_space<vmem>>, %arg8: memref<1x32xf32, #tpu.memory_space<vmem>>, %arg9: memref<1x32xf32, #tpu.memory_space<vmem>>, %arg10: memref<2x32x96xbf16, #tpu.memory_space<vmem>>, %arg11: memref<2x1x96xf32, #tpu.memory_space<vmem>>, %arg12: memref<2x32x32xbf16, #tpu.memory_space<vmem>>, %arg13: memref<2x1x32xf32, #tpu.memory_space<vmem>>, %arg14: memref<2x1x32xf32, #tpu.memory_space<vmem>>, %arg15: memref<2x1x32xf32, #tpu.memory_space<vmem>>, %arg16: memref<2x32x64xbf16, #tpu.memory_space<vmem>>, %arg17: memref<2x1x64xf32, #tpu.memory_space<vmem>>, %arg18: memref<2x64x32xbf16, #tpu.memory_space<vmem>>, %arg19: memref<2x1x32xf32, #tpu.memory_space<vmem>>, %arg20: memref<2x1x32xf32, #tpu.memory_space<vmem>>, %arg21: memref<2x1x32xf32, #tpu.memory_space<vmem>>, %arg22: memref<32x32xbf16, #tpu.memory_space<vmem>>, %arg23: memref<1x32xf32, #tpu.memory_space<vmem>>, %arg24: memref<32x128xbf16, #tpu.memory_space<vmem>>, %arg25: memref<1x128xf32, #tpu.memory_space<vmem>>, %arg26: memref<32x128xbf16, #tpu.memory_space<vmem>>, %arg27: memref<1x128xf32, #tpu.memory_space<vmem>>, %arg28: memref<2x128xf32, #tpu.memory_space<vmem>>, %arg29: memref<16x128xf32, #tpu.memory_space<vmem>>, %arg30: memref<1x128xf32, #tpu.memory_space<vmem>>) attributes {dimension_semantics = [], scalar_prefetch = 0 : i64, scratch_operands = 0 : i64, tpu.core_type = #tpu.core_type<tc>} {
    %c0 = arith.constant 0 : index
    %c0_0 = arith.constant 0 : index
    %0 = vector.load %arg0[%c0, %c0_0] : memref<16x1xi32, #tpu.memory_space<vmem>>, vector<16x1xi32>
    %c0_1 = arith.constant 0 : index
    %c0_2 = arith.constant 0 : index
    %1 = vector.load %arg1[%c0_1, %c0_2] : memref<16x1xi32, #tpu.memory_space<vmem>>, vector<16x1xi32>
    %2 = tpu.iota {dimensions = array<i32: 1>} : vector<16x100xi32>
    %3 = tpu.iota {dimensions = array<i32: 1>} : vector<16x2xi32>
    %4 = vector.broadcast %0 : vector<16x1xi32> to vector<16x100xi32>
    %5 = arith.cmpi eq, %4, %2 : vector<16x100xi32>
    %6 = arith.extui %5 : vector<16x100xi1> to vector<16x100xi32>
    %7 = arith.sitofp %6 : vector<16x100xi32> to vector<16x100xf32>
    %8 = arith.truncf %7 : vector<16x100xf32> to vector<16x100xbf16>
    %9 = vector.broadcast %1 : vector<16x1xi32> to vector<16x2xi32>
    %10 = arith.cmpi eq, %9, %3 : vector<16x2xi32>
    %11 = arith.extui %10 : vector<16x2xi1> to vector<16x2xi32>
    %12 = arith.sitofp %11 : vector<16x2xi32> to vector<16x2xf32>
    %13 = arith.truncf %12 : vector<16x2xf32> to vector<16x2xbf16>
    %c0_3 = arith.constant 0 : index
    %c0_4 = arith.constant 0 : index
    %14 = vector.load %arg5[%c0_3, %c0_4] : memref<100x32xbf16, #tpu.memory_space<vmem>>, vector<100x32xbf16>
    %cst = arith.constant dense<0.000000e+00> : vector<16x32xf32>
    %15 = tpu.matmul %8, %14, %cst {dimension_numbers = #tpu.dot_dimension_numbers<[1], [0], [0], [1], [0, 0, 1, 1], [], []>} : vector<16x100xbf16>, vector<100x32xbf16>, vector<16x32xf32> -> vector<16x32xf32>
    %c0_5 = arith.constant 0 : index
    %c0_6 = arith.constant 0 : index
    %16 = vector.load %arg7[%c0_5, %c0_6] : memref<2x32xbf16, #tpu.memory_space<vmem>>, vector<2x32xbf16>
    %cst_7 = arith.constant dense<0.000000e+00> : vector<16x32xf32>
    %17 = tpu.matmul %13, %16, %cst_7 {dimension_numbers = #tpu.dot_dimension_numbers<[1], [0], [0], [1], [0, 0, 1, 1], [], []>} : vector<16x2xbf16>, vector<2x32xbf16>, vector<16x32xf32> -> vector<16x32xf32>
    %c0_8 = arith.constant 0 : index
    %c0_9 = arith.constant 0 : index
    %18 = vector.load %arg6[%c0_8, %c0_9] : memref<32x32xf32, #tpu.memory_space<vmem>>, vector<8x32xf32>
    %19 = arith.addf %15, %17 : vector<16x32xf32>
    %20 = vector.shape_cast %19 : vector<16x32xf32> to vector<2x8x32xf32>
    %21 = vector.shape_cast %18 : vector<8x32xf32> to vector<1x8x32xf32>
    %22 = vector.broadcast %21 : vector<1x8x32xf32> to vector<2x8x32xf32>
    %23 = arith.addf %20, %22 : vector<2x8x32xf32>
    %24 = vector.shape_cast %23 : vector<2x8x32xf32> to vector<16x32xf32>
    %c0_10 = arith.constant 0 : index
    %c0_11 = arith.constant 0 : index
    %25 = vector.load %arg8[%c0_10, %c0_11] : memref<1x32xf32, #tpu.memory_space<vmem>>, vector<1x32xf32>
    %c0_12 = arith.constant 0 : index
    %c0_13 = arith.constant 0 : index
    %26 = vector.load %arg9[%c0_12, %c0_13] : memref<1x32xf32, #tpu.memory_space<vmem>>, vector<1x32xf32>
    %cst_14 = arith.constant dense<0.000000e+00> : vector<16xf32>
    %27 = vector.multi_reduction <add>, %24, %cst_14 [1] : vector<16x32xf32> to vector<16xf32>
    %28 = vector.shape_cast %27 : vector<16xf32> to vector<16x1xf32>
    %cst_15 = arith.constant 3.200000e+01 : f32
    %29 = vector.broadcast %cst_15 : f32 to vector<16x1xf32>
    %30 = arith.divf %28, %29 : vector<16x1xf32>
    %31 = vector.broadcast %30 : vector<16x1xf32> to vector<16x32xf32>
    %32 = arith.subf %24, %31 : vector<16x32xf32>
    %33 = arith.mulf %32, %32 : vector<16x32xf32>
    %cst_16 = arith.constant dense<0.000000e+00> : vector<16xf32>
    %34 = vector.multi_reduction <add>, %33, %cst_16 [1] : vector<16x32xf32> to vector<16xf32>
    %35 = vector.shape_cast %34 : vector<16xf32> to vector<16x1xf32>
    %cst_17 = arith.constant 3.200000e+01 : f32
    %36 = vector.broadcast %cst_17 : f32 to vector<16x1xf32>
    %37 = arith.divf %35, %36 : vector<16x1xf32>
    %38 = vector.broadcast %30 : vector<16x1xf32> to vector<16x32xf32>
    %39 = arith.subf %24, %38 : vector<16x32xf32>
    %cst_18 = arith.constant 9.99999996E-13 : f32
    %40 = vector.broadcast %cst_18 : f32 to vector<16x1xf32>
    %41 = arith.addf %37, %40 : vector<16x1xf32>
    %42 = math.rsqrt %41 : vector<16x1xf32>
    %43 = vector.broadcast %42 : vector<16x1xf32> to vector<16x32xf32>
    %44 = arith.mulf %39, %43 : vector<16x32xf32>
    %45 = vector.broadcast %25 : vector<1x32xf32> to vector<16x32xf32>
    %46 = arith.mulf %44, %45 : vector<16x32xf32>
    %47 = vector.broadcast %26 : vector<1x32xf32> to vector<16x32xf32>
    %48 = arith.addf %46, %47 : vector<16x32xf32>
    %c0_19 = arith.constant 0 : index
    %c0_20 = arith.constant 0 : index
    %49 = vector.load %arg2[%c0_19, %c0_20] : memref<2x8xi32, #tpu.memory_space<vmem>>, vector<2x8xi32>
    %50 = arith.sitofp %49 : vector<2x8xi32> to vector<2x8xf32>
    %cst_21 = arith.constant 1.000000e+00 : f32
    %51 = vector.broadcast %cst_21 : f32 to vector<2x8xf32>
    %52 = arith.subf %51, %50 : vector<2x8xf32>
    %cst_22 = arith.constant -1.000000e+09 : f32
    %53 = vector.broadcast %cst_22 : f32 to vector<2x8xf32>
    %54 = arith.mulf %52, %53 : vector<2x8xf32>
    %55 = vector.shape_cast %54 : vector<2x8xf32> to vector<2x1x8xf32>
    %56 = arith.truncf %48 : vector<16x32xf32> to vector<16x32xbf16>
    %c0_23 = arith.constant 0 : index
    %c0_24 = arith.constant 0 : index
    %c0_25 = arith.constant 0 : index
    %57 = vector.load %arg10[%c0_23, %c0_24, %c0_25] : memref<2x32x96xbf16, #tpu.memory_space<vmem>>, vector<1x32x96xbf16>
    %58 = vector.shape_cast %57 : vector<1x32x96xbf16> to vector<32x96xbf16>
    %cst_26 = arith.constant dense<0.000000e+00> : vector<16x96xf32>
    %59 = tpu.matmul %56, %58, %cst_26 {dimension_numbers = #tpu.dot_dimension_numbers<[1], [0], [0], [1], [0, 0, 1, 1], [], []>} : vector<16x32xbf16>, vector<32x96xbf16>, vector<16x96xf32> -> vector<16x96xf32>
    %c0_27 = arith.constant 0 : index
    %c0_28 = arith.constant 0 : index
    %c0_29 = arith.constant 0 : index
    %60 = vector.load %arg11[%c0_27, %c0_28, %c0_29] : memref<2x1x96xf32, #tpu.memory_space<vmem>>, vector<1x1x96xf32>
    %61 = vector.shape_cast %60 : vector<1x1x96xf32> to vector<1x96xf32>
    %62 = vector.broadcast %61 : vector<1x96xf32> to vector<16x96xf32>
    %63 = arith.addf %59, %62 : vector<16x96xf32>
    %64 = vector.extract_strided_slice %63 {offsets = [0, 0], sizes = [16, 8], strides = [1, 1]} : vector<16x96xf32> to vector<16x8xf32>
    %cst_30 = arith.constant 0.353553385 : f32
    %65 = vector.broadcast %cst_30 : f32 to vector<16x8xf32>
    %66 = arith.mulf %64, %65 : vector<16x8xf32>
    %67 = arith.truncf %66 : vector<16x8xf32> to vector<16x8xbf16>
    %68 = vector.shape_cast %67 : vector<16x8xbf16> to vector<2x8x8xbf16>
    %69 = vector.extract_strided_slice %63 {offsets = [0, 32], sizes = [16, 8], strides = [1, 1]} : vector<16x96xf32> to vector<16x8xf32>
    %70 = arith.truncf %69 : vector<16x8xf32> to vector<16x8xbf16>
    %71 = vector.shape_cast %70 : vector<16x8xbf16> to vector<2x8x8xbf16>
    %72 = vector.extract_strided_slice %63 {offsets = [0, 64], sizes = [16, 8], strides = [1, 1]} : vector<16x96xf32> to vector<16x8xf32>
    %73 = arith.truncf %72 : vector<16x8xf32> to vector<16x8xbf16>
    %74 = vector.shape_cast %73 : vector<16x8xbf16> to vector<2x8x8xbf16>
    "tpu.trace_start"() <{level = 10 : i32, message = "bqd,bkd->bqk"}> : () -> ()
    %cst_31 = arith.constant dense<0.000000e+00> : vector<2x8x8xf32>
    %75 = tpu.matmul %68, %71, %cst_31 {dimension_numbers = #tpu.dot_dimension_numbers<[2], [2], [1], [1], [0, 0, 0, 1, 1, 1], [0], [0]>} : vector<2x8x8xbf16>, vector<2x8x8xbf16>, vector<2x8x8xf32> -> vector<2x8x8xf32>
    "tpu.trace_stop"() : () -> ()
    %76 = vector.broadcast %55 : vector<2x1x8xf32> to vector<2x8x8xf32>
    %77 = arith.addf %75, %76 : vector<2x8x8xf32>
    %cst_32 = arith.constant dense<0xFF800000> : vector<2x8xf32>
    %78 = vector.multi_reduction <maximumf>, %77, %cst_32 [2] : vector<2x8x8xf32> to vector<2x8xf32>
    %79 = vector.shape_cast %78 : vector<2x8xf32> to vector<2x8x1xf32>
    %80 = vector.broadcast %79 : vector<2x8x1xf32> to vector<2x8x8xf32>
    %81 = arith.subf %77, %80 : vector<2x8x8xf32>
    %82 = math.exp %81 : vector<2x8x8xf32>
    %cst_33 = arith.constant dense<0.000000e+00> : vector<2x8xf32>
    %83 = vector.multi_reduction <add>, %82, %cst_33 [2] : vector<2x8x8xf32> to vector<2x8xf32>
    %84 = vector.shape_cast %83 : vector<2x8xf32> to vector<2x8x1xf32>
    %85 = vector.broadcast %84 : vector<2x8x1xf32> to vector<2x8x8xf32>
    %86 = arith.divf %82, %85 : vector<2x8x8xf32>
    %87 = arith.truncf %86 : vector<2x8x8xf32> to vector<2x8x8xbf16>
    "tpu.trace_start"() <{level = 10 : i32, message = "bqk,bkd->bqd"}> : () -> ()
    %cst_34 = arith.constant dense<0.000000e+00> : vector<2x8x8xf32>
    %88 = tpu.matmul %87, %74, %cst_34 {dimension_numbers = #tpu.dot_dimension_numbers<[2], [1], [1], [2], [0, 0, 0, 1, 1, 2], [0], [0]>} : vector<2x8x8xbf16>, vector<2x8x8xbf16>, vector<2x8x8xf32> -> vector<2x8x8xf32>
    "tpu.trace_stop"() : () -> ()
    %89 = vector.shape_cast %88 : vector<2x8x8xf32> to vector<16x8xf32>
    %90 = vector.extract_strided_slice %63 {offsets = [0, 8], sizes = [16, 8], strides = [1, 1]} : vector<16x96xf32> to vector<16x8xf32>
    %cst_35 = arith.constant 0.353553385 : f32
    %91 = vector.broadcast %cst_35 : f32 to vector<16x8xf32>
    %92 = arith.mulf %90, %91 : vector<16x8xf32>
    %93 = arith.truncf %92 : vector<16x8xf32> to vector<16x8xbf16>
    %94 = vector.shape_cast %93 : vector<16x8xbf16> to vector<2x8x8xbf16>
    %95 = vector.extract_strided_slice %63 {offsets = [0, 40], sizes = [16, 8], strides = [1, 1]} : vector<16x96xf32> to vector<16x8xf32>
    %96 = arith.truncf %95 : vector<16x8xf32> to vector<16x8xbf16>
    %97 = vector.shape_cast %96 : vector<16x8xbf16> to vector<2x8x8xbf16>
    %98 = vector.extract_strided_slice %63 {offsets = [0, 72], sizes = [16, 8], strides = [1, 1]} : vector<16x96xf32> to vector<16x8xf32>
    %99 = arith.truncf %98 : vector<16x8xf32> to vector<16x8xbf16>
    %100 = vector.shape_cast %99 : vector<16x8xbf16> to vector<2x8x8xbf16>
    "tpu.trace_start"() <{level = 10 : i32, message = "bqd,bkd->bqk"}> : () -> ()
    %cst_36 = arith.constant dense<0.000000e+00> : vector<2x8x8xf32>
    %101 = tpu.matmul %94, %97, %cst_36 {dimension_numbers = #tpu.dot_dimension_numbers<[2], [2], [1], [1], [0, 0, 0, 1, 1, 1], [0], [0]>} : vector<2x8x8xbf16>, vector<2x8x8xbf16>, vector<2x8x8xf32> -> vector<2x8x8xf32>
    "tpu.trace_stop"() : () -> ()
    %102 = vector.broadcast %55 : vector<2x1x8xf32> to vector<2x8x8xf32>
    %103 = arith.addf %101, %102 : vector<2x8x8xf32>
    %cst_37 = arith.constant dense<0xFF800000> : vector<2x8xf32>
    %104 = vector.multi_reduction <maximumf>, %103, %cst_37 [2] : vector<2x8x8xf32> to vector<2x8xf32>
    %105 = vector.shape_cast %104 : vector<2x8xf32> to vector<2x8x1xf32>
    %106 = vector.broadcast %105 : vector<2x8x1xf32> to vector<2x8x8xf32>
    %107 = arith.subf %103, %106 : vector<2x8x8xf32>
    %108 = math.exp %107 : vector<2x8x8xf32>
    %cst_38 = arith.constant dense<0.000000e+00> : vector<2x8xf32>
    %109 = vector.multi_reduction <add>, %108, %cst_38 [2] : vector<2x8x8xf32> to vector<2x8xf32>
    %110 = vector.shape_cast %109 : vector<2x8xf32> to vector<2x8x1xf32>
    %111 = vector.broadcast %110 : vector<2x8x1xf32> to vector<2x8x8xf32>
    %112 = arith.divf %108, %111 : vector<2x8x8xf32>
    %113 = arith.truncf %112 : vector<2x8x8xf32> to vector<2x8x8xbf16>
    "tpu.trace_start"() <{level = 10 : i32, message = "bqk,bkd->bqd"}> : () -> ()
    %cst_39 = arith.constant dense<0.000000e+00> : vector<2x8x8xf32>
    %114 = tpu.matmul %113, %100, %cst_39 {dimension_numbers = #tpu.dot_dimension_numbers<[2], [1], [1], [2], [0, 0, 0, 1, 1, 2], [0], [0]>} : vector<2x8x8xbf16>, vector<2x8x8xbf16>, vector<2x8x8xf32> -> vector<2x8x8xf32>
    "tpu.trace_stop"() : () -> ()
    %115 = vector.shape_cast %114 : vector<2x8x8xf32> to vector<16x8xf32>
    %116 = vector.extract_strided_slice %63 {offsets = [0, 16], sizes = [16, 8], strides = [1, 1]} : vector<16x96xf32> to vector<16x8xf32>
    %cst_40 = arith.constant 0.353553385 : f32
    %117 = vector.broadcast %cst_40 : f32 to vector<16x8xf32>
    %118 = arith.mulf %116, %117 : vector<16x8xf32>
    %119 = arith.truncf %118 : vector<16x8xf32> to vector<16x8xbf16>
    %120 = vector.shape_cast %119 : vector<16x8xbf16> to vector<2x8x8xbf16>
    %121 = vector.extract_strided_slice %63 {offsets = [0, 48], sizes = [16, 8], strides = [1, 1]} : vector<16x96xf32> to vector<16x8xf32>
    %122 = arith.truncf %121 : vector<16x8xf32> to vector<16x8xbf16>
    %123 = vector.shape_cast %122 : vector<16x8xbf16> to vector<2x8x8xbf16>
    %124 = vector.extract_strided_slice %63 {offsets = [0, 80], sizes = [16, 8], strides = [1, 1]} : vector<16x96xf32> to vector<16x8xf32>
    %125 = arith.truncf %124 : vector<16x8xf32> to vector<16x8xbf16>
    %126 = vector.shape_cast %125 : vector<16x8xbf16> to vector<2x8x8xbf16>
    "tpu.trace_start"() <{level = 10 : i32, message = "bqd,bkd->bqk"}> : () -> ()
    %cst_41 = arith.constant dense<0.000000e+00> : vector<2x8x8xf32>
    %127 = tpu.matmul %120, %123, %cst_41 {dimension_numbers = #tpu.dot_dimension_numbers<[2], [2], [1], [1], [0, 0, 0, 1, 1, 1], [0], [0]>} : vector<2x8x8xbf16>, vector<2x8x8xbf16>, vector<2x8x8xf32> -> vector<2x8x8xf32>
    "tpu.trace_stop"() : () -> ()
    %128 = vector.broadcast %55 : vector<2x1x8xf32> to vector<2x8x8xf32>
    %129 = arith.addf %127, %128 : vector<2x8x8xf32>
    %cst_42 = arith.constant dense<0xFF800000> : vector<2x8xf32>
    %130 = vector.multi_reduction <maximumf>, %129, %cst_42 [2] : vector<2x8x8xf32> to vector<2x8xf32>
    %131 = vector.shape_cast %130 : vector<2x8xf32> to vector<2x8x1xf32>
    %132 = vector.broadcast %131 : vector<2x8x1xf32> to vector<2x8x8xf32>
    %133 = arith.subf %129, %132 : vector<2x8x8xf32>
    %134 = math.exp %133 : vector<2x8x8xf32>
    %cst_43 = arith.constant dense<0.000000e+00> : vector<2x8xf32>
    %135 = vector.multi_reduction <add>, %134, %cst_43 [2] : vector<2x8x8xf32> to vector<2x8xf32>
    %136 = vector.shape_cast %135 : vector<2x8xf32> to vector<2x8x1xf32>
    %137 = vector.broadcast %136 : vector<2x8x1xf32> to vector<2x8x8xf32>
    %138 = arith.divf %134, %137 : vector<2x8x8xf32>
    %139 = arith.truncf %138 : vector<2x8x8xf32> to vector<2x8x8xbf16>
    "tpu.trace_start"() <{level = 10 : i32, message = "bqk,bkd->bqd"}> : () -> ()
    %cst_44 = arith.constant dense<0.000000e+00> : vector<2x8x8xf32>
    %140 = tpu.matmul %139, %126, %cst_44 {dimension_numbers = #tpu.dot_dimension_numbers<[2], [1], [1], [2], [0, 0, 0, 1, 1, 2], [0], [0]>} : vector<2x8x8xbf16>, vector<2x8x8xbf16>, vector<2x8x8xf32> -> vector<2x8x8xf32>
    "tpu.trace_stop"() : () -> ()
    %141 = vector.shape_cast %140 : vector<2x8x8xf32> to vector<16x8xf32>
    %142 = vector.extract_strided_slice %63 {offsets = [0, 24], sizes = [16, 8], strides = [1, 1]} : vector<16x96xf32> to vector<16x8xf32>
    %cst_45 = arith.constant 0.353553385 : f32
    %143 = vector.broadcast %cst_45 : f32 to vector<16x8xf32>
    %144 = arith.mulf %142, %143 : vector<16x8xf32>
    %145 = arith.truncf %144 : vector<16x8xf32> to vector<16x8xbf16>
    %146 = vector.shape_cast %145 : vector<16x8xbf16> to vector<2x8x8xbf16>
    %147 = vector.extract_strided_slice %63 {offsets = [0, 56], sizes = [16, 8], strides = [1, 1]} : vector<16x96xf32> to vector<16x8xf32>
    %148 = arith.truncf %147 : vector<16x8xf32> to vector<16x8xbf16>
    %149 = vector.shape_cast %148 : vector<16x8xbf16> to vector<2x8x8xbf16>
    %150 = vector.extract_strided_slice %63 {offsets = [0, 88], sizes = [16, 8], strides = [1, 1]} : vector<16x96xf32> to vector<16x8xf32>
    %151 = arith.truncf %150 : vector<16x8xf32> to vector<16x8xbf16>
    %152 = vector.shape_cast %151 : vector<16x8xbf16> to vector<2x8x8xbf16>
    "tpu.trace_start"() <{level = 10 : i32, message = "bqd,bkd->bqk"}> : () -> ()
    %cst_46 = arith.constant dense<0.000000e+00> : vector<2x8x8xf32>
    %153 = tpu.matmul %146, %149, %cst_46 {dimension_numbers = #tpu.dot_dimension_numbers<[2], [2], [1], [1], [0, 0, 0, 1, 1, 1], [0], [0]>} : vector<2x8x8xbf16>, vector<2x8x8xbf16>, vector<2x8x8xf32> -> vector<2x8x8xf32>
    "tpu.trace_stop"() : () -> ()
    %154 = vector.broadcast %55 : vector<2x1x8xf32> to vector<2x8x8xf32>
    %155 = arith.addf %153, %154 : vector<2x8x8xf32>
    %cst_47 = arith.constant dense<0xFF800000> : vector<2x8xf32>
    %156 = vector.multi_reduction <maximumf>, %155, %cst_47 [2] : vector<2x8x8xf32> to vector<2x8xf32>
    %157 = vector.shape_cast %156 : vector<2x8xf32> to vector<2x8x1xf32>
    %158 = vector.broadcast %157 : vector<2x8x1xf32> to vector<2x8x8xf32>
    %159 = arith.subf %155, %158 : vector<2x8x8xf32>
    %160 = math.exp %159 : vector<2x8x8xf32>
    %cst_48 = arith.constant dense<0.000000e+00> : vector<2x8xf32>
    %161 = vector.multi_reduction <add>, %160, %cst_48 [2] : vector<2x8x8xf32> to vector<2x8xf32>
    %162 = vector.shape_cast %161 : vector<2x8xf32> to vector<2x8x1xf32>
    %163 = vector.broadcast %162 : vector<2x8x1xf32> to vector<2x8x8xf32>
    %164 = arith.divf %160, %163 : vector<2x8x8xf32>
    %165 = arith.truncf %164 : vector<2x8x8xf32> to vector<2x8x8xbf16>
    "tpu.trace_start"() <{level = 10 : i32, message = "bqk,bkd->bqd"}> : () -> ()
    %cst_49 = arith.constant dense<0.000000e+00> : vector<2x8x8xf32>
    %166 = tpu.matmul %165, %152, %cst_49 {dimension_numbers = #tpu.dot_dimension_numbers<[2], [1], [1], [2], [0, 0, 0, 1, 1, 2], [0], [0]>} : vector<2x8x8xbf16>, vector<2x8x8xbf16>, vector<2x8x8xf32> -> vector<2x8x8xf32>
    "tpu.trace_stop"() : () -> ()
    %167 = vector.shape_cast %166 : vector<2x8x8xf32> to vector<16x8xf32>
    %168 = tpu.concatenate %89, %115, %141, %167 in 1 : vector<16x8xf32>, vector<16x8xf32>, vector<16x8xf32>, vector<16x8xf32> -> vector<16x32xf32>
    %169 = arith.truncf %168 : vector<16x32xf32> to vector<16x32xbf16>
    %c0_50 = arith.constant 0 : index
    %c0_51 = arith.constant 0 : index
    %c0_52 = arith.constant 0 : index
    %170 = vector.load %arg12[%c0_50, %c0_51, %c0_52] : memref<2x32x32xbf16, #tpu.memory_space<vmem>>, vector<1x32x32xbf16>
    %171 = vector.shape_cast %170 : vector<1x32x32xbf16> to vector<32x32xbf16>
    %cst_53 = arith.constant dense<0.000000e+00> : vector<16x32xf32>
    %172 = tpu.matmul %169, %171, %cst_53 {dimension_numbers = #tpu.dot_dimension_numbers<[1], [0], [0], [1], [0, 0, 1, 1], [], []>} : vector<16x32xbf16>, vector<32x32xbf16>, vector<16x32xf32> -> vector<16x32xf32>
    %c0_54 = arith.constant 0 : index
    %c0_55 = arith.constant 0 : index
    %c0_56 = arith.constant 0 : index
    %173 = vector.load %arg13[%c0_54, %c0_55, %c0_56] : memref<2x1x32xf32, #tpu.memory_space<vmem>>, vector<1x1x32xf32>
    %174 = vector.shape_cast %173 : vector<1x1x32xf32> to vector<1x32xf32>
    %175 = vector.broadcast %174 : vector<1x32xf32> to vector<16x32xf32>
    %176 = arith.addf %172, %175 : vector<16x32xf32>
    %177 = arith.addf %48, %176 : vector<16x32xf32>
    %c0_57 = arith.constant 0 : index
    %c0_58 = arith.constant 0 : index
    %c0_59 = arith.constant 0 : index
    %178 = vector.load %arg14[%c0_57, %c0_58, %c0_59] : memref<2x1x32xf32, #tpu.memory_space<vmem>>, vector<1x1x32xf32>
    %179 = vector.shape_cast %178 : vector<1x1x32xf32> to vector<1x32xf32>
    %c0_60 = arith.constant 0 : index
    %c0_61 = arith.constant 0 : index
    %c0_62 = arith.constant 0 : index
    %180 = vector.load %arg15[%c0_60, %c0_61, %c0_62] : memref<2x1x32xf32, #tpu.memory_space<vmem>>, vector<1x1x32xf32>
    %181 = vector.shape_cast %180 : vector<1x1x32xf32> to vector<1x32xf32>
    %cst_63 = arith.constant dense<0.000000e+00> : vector<16xf32>
    %182 = vector.multi_reduction <add>, %177, %cst_63 [1] : vector<16x32xf32> to vector<16xf32>
    %183 = vector.shape_cast %182 : vector<16xf32> to vector<16x1xf32>
    %cst_64 = arith.constant 3.200000e+01 : f32
    %184 = vector.broadcast %cst_64 : f32 to vector<16x1xf32>
    %185 = arith.divf %183, %184 : vector<16x1xf32>
    %186 = vector.broadcast %185 : vector<16x1xf32> to vector<16x32xf32>
    %187 = arith.subf %177, %186 : vector<16x32xf32>
    %188 = arith.mulf %187, %187 : vector<16x32xf32>
    %cst_65 = arith.constant dense<0.000000e+00> : vector<16xf32>
    %189 = vector.multi_reduction <add>, %188, %cst_65 [1] : vector<16x32xf32> to vector<16xf32>
    %190 = vector.shape_cast %189 : vector<16xf32> to vector<16x1xf32>
    %cst_66 = arith.constant 3.200000e+01 : f32
    %191 = vector.broadcast %cst_66 : f32 to vector<16x1xf32>
    %192 = arith.divf %190, %191 : vector<16x1xf32>
    %193 = vector.broadcast %185 : vector<16x1xf32> to vector<16x32xf32>
    %194 = arith.subf %177, %193 : vector<16x32xf32>
    %cst_67 = arith.constant 9.99999996E-13 : f32
    %195 = vector.broadcast %cst_67 : f32 to vector<16x1xf32>
    %196 = arith.addf %192, %195 : vector<16x1xf32>
    %197 = math.rsqrt %196 : vector<16x1xf32>
    %198 = vector.broadcast %197 : vector<16x1xf32> to vector<16x32xf32>
    %199 = arith.mulf %194, %198 : vector<16x32xf32>
    %200 = vector.broadcast %179 : vector<1x32xf32> to vector<16x32xf32>
    %201 = arith.mulf %199, %200 : vector<16x32xf32>
    %202 = vector.broadcast %181 : vector<1x32xf32> to vector<16x32xf32>
    %203 = arith.addf %201, %202 : vector<16x32xf32>
    %204 = arith.truncf %203 : vector<16x32xf32> to vector<16x32xbf16>
    %c0_68 = arith.constant 0 : index
    %c0_69 = arith.constant 0 : index
    %c0_70 = arith.constant 0 : index
    %205 = vector.load %arg16[%c0_68, %c0_69, %c0_70] : memref<2x32x64xbf16, #tpu.memory_space<vmem>>, vector<1x32x64xbf16>
    %206 = vector.shape_cast %205 : vector<1x32x64xbf16> to vector<32x64xbf16>
    %cst_71 = arith.constant dense<0.000000e+00> : vector<16x64xf32>
    %207 = tpu.matmul %204, %206, %cst_71 {dimension_numbers = #tpu.dot_dimension_numbers<[1], [0], [0], [1], [0, 0, 1, 1], [], []>} : vector<16x32xbf16>, vector<32x64xbf16>, vector<16x64xf32> -> vector<16x64xf32>
    %c0_72 = arith.constant 0 : index
    %c0_73 = arith.constant 0 : index
    %c0_74 = arith.constant 0 : index
    %208 = vector.load %arg17[%c0_72, %c0_73, %c0_74] : memref<2x1x64xf32, #tpu.memory_space<vmem>>, vector<1x1x64xf32>
    %209 = vector.shape_cast %208 : vector<1x1x64xf32> to vector<1x64xf32>
    %210 = vector.broadcast %209 : vector<1x64xf32> to vector<16x64xf32>
    %211 = arith.addf %207, %210 : vector<16x64xf32>
    %cst_75 = arith.constant 5.000000e-01 : f32
    %212 = vector.broadcast %cst_75 : f32 to vector<16x64xf32>
    %213 = arith.mulf %212, %211 : vector<16x64xf32>
    %cst_76 = arith.constant 0.707106769 : f32
    %214 = vector.broadcast %cst_76 : f32 to vector<16x64xf32>
    %215 = arith.mulf %211, %214 : vector<16x64xf32>
    %cst_77 = arith.constant 0.000000e+00 : f32
    %216 = vector.broadcast %cst_77 : f32 to vector<16x64xf32>
    %217 = arith.cmpf oge, %215, %216 : vector<16x64xf32>
    %cst_78 = arith.constant 1.000000e+00 : f32
    %cst_79 = arith.constant -1.000000e+00 : f32
    %218 = vector.broadcast %cst_78 : f32 to vector<16x64xf32>
    %219 = vector.broadcast %cst_79 : f32 to vector<16x64xf32>
    %220 = arith.select %217, %218, %219 : vector<16x64xi1>, vector<16x64xf32>
    %221 = math.absf %215 : vector<16x64xf32>
    %cst_80 = arith.constant 0.327591091 : f32
    %222 = vector.broadcast %cst_80 : f32 to vector<16x64xf32>
    %223 = arith.mulf %222, %221 : vector<16x64xf32>
    %cst_81 = arith.constant 1.000000e+00 : f32
    %224 = vector.broadcast %cst_81 : f32 to vector<16x64xf32>
    %225 = arith.addf %224, %223 : vector<16x64xf32>
    %cst_82 = arith.constant 1.000000e+00 : f32
    %226 = vector.broadcast %cst_82 : f32 to vector<16x64xf32>
    %227 = arith.divf %226, %225 : vector<16x64xf32>
    %cst_83 = arith.constant 1.06140542 : f32
    %228 = vector.broadcast %cst_83 : f32 to vector<16x64xf32>
    %229 = arith.mulf %228, %227 : vector<16x64xf32>
    %cst_84 = arith.constant -1.45315206 : f32
    %230 = vector.broadcast %cst_84 : f32 to vector<16x64xf32>
    %231 = arith.addf %229, %230 : vector<16x64xf32>
    %232 = arith.mulf %231, %227 : vector<16x64xf32>
    %cst_85 = arith.constant 1.42141378 : f32
    %233 = vector.broadcast %cst_85 : f32 to vector<16x64xf32>
    %234 = arith.addf %232, %233 : vector<16x64xf32>
    %235 = arith.mulf %234, %227 : vector<16x64xf32>
    %cst_86 = arith.constant -0.284496725 : f32
    %236 = vector.broadcast %cst_86 : f32 to vector<16x64xf32>
    %237 = arith.addf %235, %236 : vector<16x64xf32>
    %238 = arith.mulf %237, %227 : vector<16x64xf32>
    %cst_87 = arith.constant 0.254829586 : f32
    %239 = vector.broadcast %cst_87 : f32 to vector<16x64xf32>
    %240 = arith.addf %238, %239 : vector<16x64xf32>
    %241 = arith.mulf %240, %227 : vector<16x64xf32>
    %cst_88 = arith.constant 0.000000e+00 : f32
    %242 = vector.broadcast %cst_88 : f32 to vector<16x64xf32>
    %243 = arith.subf %242, %221 : vector<16x64xf32>
    %244 = arith.mulf %243, %221 : vector<16x64xf32>
    %245 = math.exp %244 : vector<16x64xf32>
    %246 = arith.mulf %241, %245 : vector<16x64xf32>
    %cst_89 = arith.constant 1.000000e+00 : f32
    %247 = vector.broadcast %cst_89 : f32 to vector<16x64xf32>
    %248 = arith.subf %247, %246 : vector<16x64xf32>
    %249 = arith.mulf %220, %248 : vector<16x64xf32>
    %cst_90 = arith.constant 1.000000e+00 : f32
    %250 = vector.broadcast %cst_90 : f32 to vector<16x64xf32>
    %251 = arith.addf %250, %249 : vector<16x64xf32>
    %252 = arith.mulf %213, %251 : vector<16x64xf32>
    %253 = arith.truncf %252 : vector<16x64xf32> to vector<16x64xbf16>
    %c0_91 = arith.constant 0 : index
    %c0_92 = arith.constant 0 : index
    %c0_93 = arith.constant 0 : index
    %254 = vector.load %arg18[%c0_91, %c0_92, %c0_93] : memref<2x64x32xbf16, #tpu.memory_space<vmem>>, vector<1x64x32xbf16>
    %255 = vector.shape_cast %254 : vector<1x64x32xbf16> to vector<64x32xbf16>
    %cst_94 = arith.constant dense<0.000000e+00> : vector<16x32xf32>
    %256 = tpu.matmul %253, %255, %cst_94 {dimension_numbers = #tpu.dot_dimension_numbers<[1], [0], [0], [1], [0, 0, 1, 1], [], []>} : vector<16x64xbf16>, vector<64x32xbf16>, vector<16x32xf32> -> vector<16x32xf32>
    %c0_95 = arith.constant 0 : index
    %c0_96 = arith.constant 0 : index
    %c0_97 = arith.constant 0 : index
    %257 = vector.load %arg19[%c0_95, %c0_96, %c0_97] : memref<2x1x32xf32, #tpu.memory_space<vmem>>, vector<1x1x32xf32>
    %258 = vector.shape_cast %257 : vector<1x1x32xf32> to vector<1x32xf32>
    %259 = vector.broadcast %258 : vector<1x32xf32> to vector<16x32xf32>
    %260 = arith.addf %256, %259 : vector<16x32xf32>
    %261 = arith.addf %203, %260 : vector<16x32xf32>
    %c0_98 = arith.constant 0 : index
    %c0_99 = arith.constant 0 : index
    %c0_100 = arith.constant 0 : index
    %262 = vector.load %arg20[%c0_98, %c0_99, %c0_100] : memref<2x1x32xf32, #tpu.memory_space<vmem>>, vector<1x1x32xf32>
    %263 = vector.shape_cast %262 : vector<1x1x32xf32> to vector<1x32xf32>
    %c0_101 = arith.constant 0 : index
    %c0_102 = arith.constant 0 : index
    %c0_103 = arith.constant 0 : index
    %264 = vector.load %arg21[%c0_101, %c0_102, %c0_103] : memref<2x1x32xf32, #tpu.memory_space<vmem>>, vector<1x1x32xf32>
    %265 = vector.shape_cast %264 : vector<1x1x32xf32> to vector<1x32xf32>
    %cst_104 = arith.constant dense<0.000000e+00> : vector<16xf32>
    %266 = vector.multi_reduction <add>, %261, %cst_104 [1] : vector<16x32xf32> to vector<16xf32>
    %267 = vector.shape_cast %266 : vector<16xf32> to vector<16x1xf32>
    %cst_105 = arith.constant 3.200000e+01 : f32
    %268 = vector.broadcast %cst_105 : f32 to vector<16x1xf32>
    %269 = arith.divf %267, %268 : vector<16x1xf32>
    %270 = vector.broadcast %269 : vector<16x1xf32> to vector<16x32xf32>
    %271 = arith.subf %261, %270 : vector<16x32xf32>
    %272 = arith.mulf %271, %271 : vector<16x32xf32>
    %cst_106 = arith.constant dense<0.000000e+00> : vector<16xf32>
    %273 = vector.multi_reduction <add>, %272, %cst_106 [1] : vector<16x32xf32> to vector<16xf32>
    %274 = vector.shape_cast %273 : vector<16xf32> to vector<16x1xf32>
    %cst_107 = arith.constant 3.200000e+01 : f32
    %275 = vector.broadcast %cst_107 : f32 to vector<16x1xf32>
    %276 = arith.divf %274, %275 : vector<16x1xf32>
    %277 = vector.broadcast %269 : vector<16x1xf32> to vector<16x32xf32>
    %278 = arith.subf %261, %277 : vector<16x32xf32>
    %cst_108 = arith.constant 9.99999996E-13 : f32
    %279 = vector.broadcast %cst_108 : f32 to vector<16x1xf32>
    %280 = arith.addf %276, %279 : vector<16x1xf32>
    %281 = math.rsqrt %280 : vector<16x1xf32>
    %282 = vector.broadcast %281 : vector<16x1xf32> to vector<16x32xf32>
    %283 = arith.mulf %278, %282 : vector<16x32xf32>
    %284 = vector.broadcast %263 : vector<1x32xf32> to vector<16x32xf32>
    %285 = arith.mulf %283, %284 : vector<16x32xf32>
    %286 = vector.broadcast %265 : vector<1x32xf32> to vector<16x32xf32>
    %287 = arith.addf %285, %286 : vector<16x32xf32>
    %288 = arith.truncf %287 : vector<16x32xf32> to vector<16x32xbf16>
    %c1 = arith.constant 1 : index
    %c0_109 = arith.constant 0 : index
    %c0_110 = arith.constant 0 : index
    %289 = vector.load %arg10[%c1, %c0_109, %c0_110] : memref<2x32x96xbf16, #tpu.memory_space<vmem>>, vector<1x32x96xbf16>
    %290 = vector.shape_cast %289 : vector<1x32x96xbf16> to vector<32x96xbf16>
    %cst_111 = arith.constant dense<0.000000e+00> : vector<16x96xf32>
    %291 = tpu.matmul %288, %290, %cst_111 {dimension_numbers = #tpu.dot_dimension_numbers<[1], [0], [0], [1], [0, 0, 1, 1], [], []>} : vector<16x32xbf16>, vector<32x96xbf16>, vector<16x96xf32> -> vector<16x96xf32>
    %c1_112 = arith.constant 1 : index
    %c0_113 = arith.constant 0 : index
    %c0_114 = arith.constant 0 : index
    %292 = vector.load %arg11[%c1_112, %c0_113, %c0_114] : memref<2x1x96xf32, #tpu.memory_space<vmem>>, vector<1x1x96xf32>
    %293 = vector.shape_cast %292 : vector<1x1x96xf32> to vector<1x96xf32>
    %294 = vector.broadcast %293 : vector<1x96xf32> to vector<16x96xf32>
    %295 = arith.addf %291, %294 : vector<16x96xf32>
    %296 = vector.extract_strided_slice %295 {offsets = [0, 0], sizes = [16, 8], strides = [1, 1]} : vector<16x96xf32> to vector<16x8xf32>
    %cst_115 = arith.constant 0.353553385 : f32
    %297 = vector.broadcast %cst_115 : f32 to vector<16x8xf32>
    %298 = arith.mulf %296, %297 : vector<16x8xf32>
    %299 = arith.truncf %298 : vector<16x8xf32> to vector<16x8xbf16>
    %300 = vector.shape_cast %299 : vector<16x8xbf16> to vector<2x8x8xbf16>
    %301 = vector.extract_strided_slice %295 {offsets = [0, 32], sizes = [16, 8], strides = [1, 1]} : vector<16x96xf32> to vector<16x8xf32>
    %302 = arith.truncf %301 : vector<16x8xf32> to vector<16x8xbf16>
    %303 = vector.shape_cast %302 : vector<16x8xbf16> to vector<2x8x8xbf16>
    %304 = vector.extract_strided_slice %295 {offsets = [0, 64], sizes = [16, 8], strides = [1, 1]} : vector<16x96xf32> to vector<16x8xf32>
    %305 = arith.truncf %304 : vector<16x8xf32> to vector<16x8xbf16>
    %306 = vector.shape_cast %305 : vector<16x8xbf16> to vector<2x8x8xbf16>
    "tpu.trace_start"() <{level = 10 : i32, message = "bqd,bkd->bqk"}> : () -> ()
    %cst_116 = arith.constant dense<0.000000e+00> : vector<2x8x8xf32>
    %307 = tpu.matmul %300, %303, %cst_116 {dimension_numbers = #tpu.dot_dimension_numbers<[2], [2], [1], [1], [0, 0, 0, 1, 1, 1], [0], [0]>} : vector<2x8x8xbf16>, vector<2x8x8xbf16>, vector<2x8x8xf32> -> vector<2x8x8xf32>
    "tpu.trace_stop"() : () -> ()
    %308 = vector.broadcast %55 : vector<2x1x8xf32> to vector<2x8x8xf32>
    %309 = arith.addf %307, %308 : vector<2x8x8xf32>
    %cst_117 = arith.constant dense<0xFF800000> : vector<2x8xf32>
    %310 = vector.multi_reduction <maximumf>, %309, %cst_117 [2] : vector<2x8x8xf32> to vector<2x8xf32>
    %311 = vector.shape_cast %310 : vector<2x8xf32> to vector<2x8x1xf32>
    %312 = vector.broadcast %311 : vector<2x8x1xf32> to vector<2x8x8xf32>
    %313 = arith.subf %309, %312 : vector<2x8x8xf32>
    %314 = math.exp %313 : vector<2x8x8xf32>
    %cst_118 = arith.constant dense<0.000000e+00> : vector<2x8xf32>
    %315 = vector.multi_reduction <add>, %314, %cst_118 [2] : vector<2x8x8xf32> to vector<2x8xf32>
    %316 = vector.shape_cast %315 : vector<2x8xf32> to vector<2x8x1xf32>
    %317 = vector.broadcast %316 : vector<2x8x1xf32> to vector<2x8x8xf32>
    %318 = arith.divf %314, %317 : vector<2x8x8xf32>
    %319 = arith.truncf %318 : vector<2x8x8xf32> to vector<2x8x8xbf16>
    "tpu.trace_start"() <{level = 10 : i32, message = "bqk,bkd->bqd"}> : () -> ()
    %cst_119 = arith.constant dense<0.000000e+00> : vector<2x8x8xf32>
    %320 = tpu.matmul %319, %306, %cst_119 {dimension_numbers = #tpu.dot_dimension_numbers<[2], [1], [1], [2], [0, 0, 0, 1, 1, 2], [0], [0]>} : vector<2x8x8xbf16>, vector<2x8x8xbf16>, vector<2x8x8xf32> -> vector<2x8x8xf32>
    "tpu.trace_stop"() : () -> ()
    %321 = vector.shape_cast %320 : vector<2x8x8xf32> to vector<16x8xf32>
    %322 = vector.extract_strided_slice %295 {offsets = [0, 8], sizes = [16, 8], strides = [1, 1]} : vector<16x96xf32> to vector<16x8xf32>
    %cst_120 = arith.constant 0.353553385 : f32
    %323 = vector.broadcast %cst_120 : f32 to vector<16x8xf32>
    %324 = arith.mulf %322, %323 : vector<16x8xf32>
    %325 = arith.truncf %324 : vector<16x8xf32> to vector<16x8xbf16>
    %326 = vector.shape_cast %325 : vector<16x8xbf16> to vector<2x8x8xbf16>
    %327 = vector.extract_strided_slice %295 {offsets = [0, 40], sizes = [16, 8], strides = [1, 1]} : vector<16x96xf32> to vector<16x8xf32>
    %328 = arith.truncf %327 : vector<16x8xf32> to vector<16x8xbf16>
    %329 = vector.shape_cast %328 : vector<16x8xbf16> to vector<2x8x8xbf16>
    %330 = vector.extract_strided_slice %295 {offsets = [0, 72], sizes = [16, 8], strides = [1, 1]} : vector<16x96xf32> to vector<16x8xf32>
    %331 = arith.truncf %330 : vector<16x8xf32> to vector<16x8xbf16>
    %332 = vector.shape_cast %331 : vector<16x8xbf16> to vector<2x8x8xbf16>
    "tpu.trace_start"() <{level = 10 : i32, message = "bqd,bkd->bqk"}> : () -> ()
    %cst_121 = arith.constant dense<0.000000e+00> : vector<2x8x8xf32>
    %333 = tpu.matmul %326, %329, %cst_121 {dimension_numbers = #tpu.dot_dimension_numbers<[2], [2], [1], [1], [0, 0, 0, 1, 1, 1], [0], [0]>} : vector<2x8x8xbf16>, vector<2x8x8xbf16>, vector<2x8x8xf32> -> vector<2x8x8xf32>
    "tpu.trace_stop"() : () -> ()
    %334 = vector.broadcast %55 : vector<2x1x8xf32> to vector<2x8x8xf32>
    %335 = arith.addf %333, %334 : vector<2x8x8xf32>
    %cst_122 = arith.constant dense<0xFF800000> : vector<2x8xf32>
    %336 = vector.multi_reduction <maximumf>, %335, %cst_122 [2] : vector<2x8x8xf32> to vector<2x8xf32>
    %337 = vector.shape_cast %336 : vector<2x8xf32> to vector<2x8x1xf32>
    %338 = vector.broadcast %337 : vector<2x8x1xf32> to vector<2x8x8xf32>
    %339 = arith.subf %335, %338 : vector<2x8x8xf32>
    %340 = math.exp %339 : vector<2x8x8xf32>
    %cst_123 = arith.constant dense<0.000000e+00> : vector<2x8xf32>
    %341 = vector.multi_reduction <add>, %340, %cst_123 [2] : vector<2x8x8xf32> to vector<2x8xf32>
    %342 = vector.shape_cast %341 : vector<2x8xf32> to vector<2x8x1xf32>
    %343 = vector.broadcast %342 : vector<2x8x1xf32> to vector<2x8x8xf32>
    %344 = arith.divf %340, %343 : vector<2x8x8xf32>
    %345 = arith.truncf %344 : vector<2x8x8xf32> to vector<2x8x8xbf16>
    "tpu.trace_start"() <{level = 10 : i32, message = "bqk,bkd->bqd"}> : () -> ()
    %cst_124 = arith.constant dense<0.000000e+00> : vector<2x8x8xf32>
    %346 = tpu.matmul %345, %332, %cst_124 {dimension_numbers = #tpu.dot_dimension_numbers<[2], [1], [1], [2], [0, 0, 0, 1, 1, 2], [0], [0]>} : vector<2x8x8xbf16>, vector<2x8x8xbf16>, vector<2x8x8xf32> -> vector<2x8x8xf32>
    "tpu.trace_stop"() : () -> ()
    %347 = vector.shape_cast %346 : vector<2x8x8xf32> to vector<16x8xf32>
    %348 = vector.extract_strided_slice %295 {offsets = [0, 16], sizes = [16, 8], strides = [1, 1]} : vector<16x96xf32> to vector<16x8xf32>
    %cst_125 = arith.constant 0.353553385 : f32
    %349 = vector.broadcast %cst_125 : f32 to vector<16x8xf32>
    %350 = arith.mulf %348, %349 : vector<16x8xf32>
    %351 = arith.truncf %350 : vector<16x8xf32> to vector<16x8xbf16>
    %352 = vector.shape_cast %351 : vector<16x8xbf16> to vector<2x8x8xbf16>
    %353 = vector.extract_strided_slice %295 {offsets = [0, 48], sizes = [16, 8], strides = [1, 1]} : vector<16x96xf32> to vector<16x8xf32>
    %354 = arith.truncf %353 : vector<16x8xf32> to vector<16x8xbf16>
    %355 = vector.shape_cast %354 : vector<16x8xbf16> to vector<2x8x8xbf16>
    %356 = vector.extract_strided_slice %295 {offsets = [0, 80], sizes = [16, 8], strides = [1, 1]} : vector<16x96xf32> to vector<16x8xf32>
    %357 = arith.truncf %356 : vector<16x8xf32> to vector<16x8xbf16>
    %358 = vector.shape_cast %357 : vector<16x8xbf16> to vector<2x8x8xbf16>
    "tpu.trace_start"() <{level = 10 : i32, message = "bqd,bkd->bqk"}> : () -> ()
    %cst_126 = arith.constant dense<0.000000e+00> : vector<2x8x8xf32>
    %359 = tpu.matmul %352, %355, %cst_126 {dimension_numbers = #tpu.dot_dimension_numbers<[2], [2], [1], [1], [0, 0, 0, 1, 1, 1], [0], [0]>} : vector<2x8x8xbf16>, vector<2x8x8xbf16>, vector<2x8x8xf32> -> vector<2x8x8xf32>
    "tpu.trace_stop"() : () -> ()
    %360 = vector.broadcast %55 : vector<2x1x8xf32> to vector<2x8x8xf32>
    %361 = arith.addf %359, %360 : vector<2x8x8xf32>
    %cst_127 = arith.constant dense<0xFF800000> : vector<2x8xf32>
    %362 = vector.multi_reduction <maximumf>, %361, %cst_127 [2] : vector<2x8x8xf32> to vector<2x8xf32>
    %363 = vector.shape_cast %362 : vector<2x8xf32> to vector<2x8x1xf32>
    %364 = vector.broadcast %363 : vector<2x8x1xf32> to vector<2x8x8xf32>
    %365 = arith.subf %361, %364 : vector<2x8x8xf32>
    %366 = math.exp %365 : vector<2x8x8xf32>
    %cst_128 = arith.constant dense<0.000000e+00> : vector<2x8xf32>
    %367 = vector.multi_reduction <add>, %366, %cst_128 [2] : vector<2x8x8xf32> to vector<2x8xf32>
    %368 = vector.shape_cast %367 : vector<2x8xf32> to vector<2x8x1xf32>
    %369 = vector.broadcast %368 : vector<2x8x1xf32> to vector<2x8x8xf32>
    %370 = arith.divf %366, %369 : vector<2x8x8xf32>
    %371 = arith.truncf %370 : vector<2x8x8xf32> to vector<2x8x8xbf16>
    "tpu.trace_start"() <{level = 10 : i32, message = "bqk,bkd->bqd"}> : () -> ()
    %cst_129 = arith.constant dense<0.000000e+00> : vector<2x8x8xf32>
    %372 = tpu.matmul %371, %358, %cst_129 {dimension_numbers = #tpu.dot_dimension_numbers<[2], [1], [1], [2], [0, 0, 0, 1, 1, 2], [0], [0]>} : vector<2x8x8xbf16>, vector<2x8x8xbf16>, vector<2x8x8xf32> -> vector<2x8x8xf32>
    "tpu.trace_stop"() : () -> ()
    %373 = vector.shape_cast %372 : vector<2x8x8xf32> to vector<16x8xf32>
    %374 = vector.extract_strided_slice %295 {offsets = [0, 24], sizes = [16, 8], strides = [1, 1]} : vector<16x96xf32> to vector<16x8xf32>
    %cst_130 = arith.constant 0.353553385 : f32
    %375 = vector.broadcast %cst_130 : f32 to vector<16x8xf32>
    %376 = arith.mulf %374, %375 : vector<16x8xf32>
    %377 = arith.truncf %376 : vector<16x8xf32> to vector<16x8xbf16>
    %378 = vector.shape_cast %377 : vector<16x8xbf16> to vector<2x8x8xbf16>
    %379 = vector.extract_strided_slice %295 {offsets = [0, 56], sizes = [16, 8], strides = [1, 1]} : vector<16x96xf32> to vector<16x8xf32>
    %380 = arith.truncf %379 : vector<16x8xf32> to vector<16x8xbf16>
    %381 = vector.shape_cast %380 : vector<16x8xbf16> to vector<2x8x8xbf16>
    %382 = vector.extract_strided_slice %295 {offsets = [0, 88], sizes = [16, 8], strides = [1, 1]} : vector<16x96xf32> to vector<16x8xf32>
    %383 = arith.truncf %382 : vector<16x8xf32> to vector<16x8xbf16>
    %384 = vector.shape_cast %383 : vector<16x8xbf16> to vector<2x8x8xbf16>
    "tpu.trace_start"() <{level = 10 : i32, message = "bqd,bkd->bqk"}> : () -> ()
    %cst_131 = arith.constant dense<0.000000e+00> : vector<2x8x8xf32>
    %385 = tpu.matmul %378, %381, %cst_131 {dimension_numbers = #tpu.dot_dimension_numbers<[2], [2], [1], [1], [0, 0, 0, 1, 1, 1], [0], [0]>} : vector<2x8x8xbf16>, vector<2x8x8xbf16>, vector<2x8x8xf32> -> vector<2x8x8xf32>
    "tpu.trace_stop"() : () -> ()
    %386 = vector.broadcast %55 : vector<2x1x8xf32> to vector<2x8x8xf32>
    %387 = arith.addf %385, %386 : vector<2x8x8xf32>
    %cst_132 = arith.constant dense<0xFF800000> : vector<2x8xf32>
    %388 = vector.multi_reduction <maximumf>, %387, %cst_132 [2] : vector<2x8x8xf32> to vector<2x8xf32>
    %389 = vector.shape_cast %388 : vector<2x8xf32> to vector<2x8x1xf32>
    %390 = vector.broadcast %389 : vector<2x8x1xf32> to vector<2x8x8xf32>
    %391 = arith.subf %387, %390 : vector<2x8x8xf32>
    %392 = math.exp %391 : vector<2x8x8xf32>
    %cst_133 = arith.constant dense<0.000000e+00> : vector<2x8xf32>
    %393 = vector.multi_reduction <add>, %392, %cst_133 [2] : vector<2x8x8xf32> to vector<2x8xf32>
    %394 = vector.shape_cast %393 : vector<2x8xf32> to vector<2x8x1xf32>
    %395 = vector.broadcast %394 : vector<2x8x1xf32> to vector<2x8x8xf32>
    %396 = arith.divf %392, %395 : vector<2x8x8xf32>
    %397 = arith.truncf %396 : vector<2x8x8xf32> to vector<2x8x8xbf16>
    "tpu.trace_start"() <{level = 10 : i32, message = "bqk,bkd->bqd"}> : () -> ()
    %cst_134 = arith.constant dense<0.000000e+00> : vector<2x8x8xf32>
    %398 = tpu.matmul %397, %384, %cst_134 {dimension_numbers = #tpu.dot_dimension_numbers<[2], [1], [1], [2], [0, 0, 0, 1, 1, 2], [0], [0]>} : vector<2x8x8xbf16>, vector<2x8x8xbf16>, vector<2x8x8xf32> -> vector<2x8x8xf32>
    "tpu.trace_stop"() : () -> ()
    %399 = vector.shape_cast %398 : vector<2x8x8xf32> to vector<16x8xf32>
    %400 = tpu.concatenate %321, %347, %373, %399 in 1 : vector<16x8xf32>, vector<16x8xf32>, vector<16x8xf32>, vector<16x8xf32> -> vector<16x32xf32>
    %401 = arith.truncf %400 : vector<16x32xf32> to vector<16x32xbf16>
    %c1_135 = arith.constant 1 : index
    %c0_136 = arith.constant 0 : index
    %c0_137 = arith.constant 0 : index
    %402 = vector.load %arg12[%c1_135, %c0_136, %c0_137] : memref<2x32x32xbf16, #tpu.memory_space<vmem>>, vector<1x32x32xbf16>
    %403 = vector.shape_cast %402 : vector<1x32x32xbf16> to vector<32x32xbf16>
    %cst_138 = arith.constant dense<0.000000e+00> : vector<16x32xf32>
    %404 = tpu.matmul %401, %403, %cst_138 {dimension_numbers = #tpu.dot_dimension_numbers<[1], [0], [0], [1], [0, 0, 1, 1], [], []>} : vector<16x32xbf16>, vector<32x32xbf16>, vector<16x32xf32> -> vector<16x32xf32>
    %c1_139 = arith.constant 1 : index
    %c0_140 = arith.constant 0 : index
    %c0_141 = arith.constant 0 : index
    %405 = vector.load %arg13[%c1_139, %c0_140, %c0_141] : memref<2x1x32xf32, #tpu.memory_space<vmem>>, vector<1x1x32xf32>
    %406 = vector.shape_cast %405 : vector<1x1x32xf32> to vector<1x32xf32>
    %407 = vector.broadcast %406 : vector<1x32xf32> to vector<16x32xf32>
    %408 = arith.addf %404, %407 : vector<16x32xf32>
    %409 = arith.addf %287, %408 : vector<16x32xf32>
    %c1_142 = arith.constant 1 : index
    %c0_143 = arith.constant 0 : index
    %c0_144 = arith.constant 0 : index
    %410 = vector.load %arg14[%c1_142, %c0_143, %c0_144] : memref<2x1x32xf32, #tpu.memory_space<vmem>>, vector<1x1x32xf32>
    %411 = vector.shape_cast %410 : vector<1x1x32xf32> to vector<1x32xf32>
    %c1_145 = arith.constant 1 : index
    %c0_146 = arith.constant 0 : index
    %c0_147 = arith.constant 0 : index
    %412 = vector.load %arg15[%c1_145, %c0_146, %c0_147] : memref<2x1x32xf32, #tpu.memory_space<vmem>>, vector<1x1x32xf32>
    %413 = vector.shape_cast %412 : vector<1x1x32xf32> to vector<1x32xf32>
    %cst_148 = arith.constant dense<0.000000e+00> : vector<16xf32>
    %414 = vector.multi_reduction <add>, %409, %cst_148 [1] : vector<16x32xf32> to vector<16xf32>
    %415 = vector.shape_cast %414 : vector<16xf32> to vector<16x1xf32>
    %cst_149 = arith.constant 3.200000e+01 : f32
    %416 = vector.broadcast %cst_149 : f32 to vector<16x1xf32>
    %417 = arith.divf %415, %416 : vector<16x1xf32>
    %418 = vector.broadcast %417 : vector<16x1xf32> to vector<16x32xf32>
    %419 = arith.subf %409, %418 : vector<16x32xf32>
    %420 = arith.mulf %419, %419 : vector<16x32xf32>
    %cst_150 = arith.constant dense<0.000000e+00> : vector<16xf32>
    %421 = vector.multi_reduction <add>, %420, %cst_150 [1] : vector<16x32xf32> to vector<16xf32>
    %422 = vector.shape_cast %421 : vector<16xf32> to vector<16x1xf32>
    %cst_151 = arith.constant 3.200000e+01 : f32
    %423 = vector.broadcast %cst_151 : f32 to vector<16x1xf32>
    %424 = arith.divf %422, %423 : vector<16x1xf32>
    %425 = vector.broadcast %417 : vector<16x1xf32> to vector<16x32xf32>
    %426 = arith.subf %409, %425 : vector<16x32xf32>
    %cst_152 = arith.constant 9.99999996E-13 : f32
    %427 = vector.broadcast %cst_152 : f32 to vector<16x1xf32>
    %428 = arith.addf %424, %427 : vector<16x1xf32>
    %429 = math.rsqrt %428 : vector<16x1xf32>
    %430 = vector.broadcast %429 : vector<16x1xf32> to vector<16x32xf32>
    %431 = arith.mulf %426, %430 : vector<16x32xf32>
    %432 = vector.broadcast %411 : vector<1x32xf32> to vector<16x32xf32>
    %433 = arith.mulf %431, %432 : vector<16x32xf32>
    %434 = vector.broadcast %413 : vector<1x32xf32> to vector<16x32xf32>
    %435 = arith.addf %433, %434 : vector<16x32xf32>
    %436 = arith.truncf %435 : vector<16x32xf32> to vector<16x32xbf16>
    %c1_153 = arith.constant 1 : index
    %c0_154 = arith.constant 0 : index
    %c0_155 = arith.constant 0 : index
    %437 = vector.load %arg16[%c1_153, %c0_154, %c0_155] : memref<2x32x64xbf16, #tpu.memory_space<vmem>>, vector<1x32x64xbf16>
    %438 = vector.shape_cast %437 : vector<1x32x64xbf16> to vector<32x64xbf16>
    %cst_156 = arith.constant dense<0.000000e+00> : vector<16x64xf32>
    %439 = tpu.matmul %436, %438, %cst_156 {dimension_numbers = #tpu.dot_dimension_numbers<[1], [0], [0], [1], [0, 0, 1, 1], [], []>} : vector<16x32xbf16>, vector<32x64xbf16>, vector<16x64xf32> -> vector<16x64xf32>
    %c1_157 = arith.constant 1 : index
    %c0_158 = arith.constant 0 : index
    %c0_159 = arith.constant 0 : index
    %440 = vector.load %arg17[%c1_157, %c0_158, %c0_159] : memref<2x1x64xf32, #tpu.memory_space<vmem>>, vector<1x1x64xf32>
    %441 = vector.shape_cast %440 : vector<1x1x64xf32> to vector<1x64xf32>
    %442 = vector.broadcast %441 : vector<1x64xf32> to vector<16x64xf32>
    %443 = arith.addf %439, %442 : vector<16x64xf32>
    %cst_160 = arith.constant 5.000000e-01 : f32
    %444 = vector.broadcast %cst_160 : f32 to vector<16x64xf32>
    %445 = arith.mulf %444, %443 : vector<16x64xf32>
    %cst_161 = arith.constant 0.707106769 : f32
    %446 = vector.broadcast %cst_161 : f32 to vector<16x64xf32>
    %447 = arith.mulf %443, %446 : vector<16x64xf32>
    %cst_162 = arith.constant 0.000000e+00 : f32
    %448 = vector.broadcast %cst_162 : f32 to vector<16x64xf32>
    %449 = arith.cmpf oge, %447, %448 : vector<16x64xf32>
    %cst_163 = arith.constant 1.000000e+00 : f32
    %cst_164 = arith.constant -1.000000e+00 : f32
    %450 = vector.broadcast %cst_163 : f32 to vector<16x64xf32>
    %451 = vector.broadcast %cst_164 : f32 to vector<16x64xf32>
    %452 = arith.select %449, %450, %451 : vector<16x64xi1>, vector<16x64xf32>
    %453 = math.absf %447 : vector<16x64xf32>
    %cst_165 = arith.constant 0.327591091 : f32
    %454 = vector.broadcast %cst_165 : f32 to vector<16x64xf32>
    %455 = arith.mulf %454, %453 : vector<16x64xf32>
    %cst_166 = arith.constant 1.000000e+00 : f32
    %456 = vector.broadcast %cst_166 : f32 to vector<16x64xf32>
    %457 = arith.addf %456, %455 : vector<16x64xf32>
    %cst_167 = arith.constant 1.000000e+00 : f32
    %458 = vector.broadcast %cst_167 : f32 to vector<16x64xf32>
    %459 = arith.divf %458, %457 : vector<16x64xf32>
    %cst_168 = arith.constant 1.06140542 : f32
    %460 = vector.broadcast %cst_168 : f32 to vector<16x64xf32>
    %461 = arith.mulf %460, %459 : vector<16x64xf32>
    %cst_169 = arith.constant -1.45315206 : f32
    %462 = vector.broadcast %cst_169 : f32 to vector<16x64xf32>
    %463 = arith.addf %461, %462 : vector<16x64xf32>
    %464 = arith.mulf %463, %459 : vector<16x64xf32>
    %cst_170 = arith.constant 1.42141378 : f32
    %465 = vector.broadcast %cst_170 : f32 to vector<16x64xf32>
    %466 = arith.addf %464, %465 : vector<16x64xf32>
    %467 = arith.mulf %466, %459 : vector<16x64xf32>
    %cst_171 = arith.constant -0.284496725 : f32
    %468 = vector.broadcast %cst_171 : f32 to vector<16x64xf32>
    %469 = arith.addf %467, %468 : vector<16x64xf32>
    %470 = arith.mulf %469, %459 : vector<16x64xf32>
    %cst_172 = arith.constant 0.254829586 : f32
    %471 = vector.broadcast %cst_172 : f32 to vector<16x64xf32>
    %472 = arith.addf %470, %471 : vector<16x64xf32>
    %473 = arith.mulf %472, %459 : vector<16x64xf32>
    %cst_173 = arith.constant 0.000000e+00 : f32
    %474 = vector.broadcast %cst_173 : f32 to vector<16x64xf32>
    %475 = arith.subf %474, %453 : vector<16x64xf32>
    %476 = arith.mulf %475, %453 : vector<16x64xf32>
    %477 = math.exp %476 : vector<16x64xf32>
    %478 = arith.mulf %473, %477 : vector<16x64xf32>
    %cst_174 = arith.constant 1.000000e+00 : f32
    %479 = vector.broadcast %cst_174 : f32 to vector<16x64xf32>
    %480 = arith.subf %479, %478 : vector<16x64xf32>
    %481 = arith.mulf %452, %480 : vector<16x64xf32>
    %cst_175 = arith.constant 1.000000e+00 : f32
    %482 = vector.broadcast %cst_175 : f32 to vector<16x64xf32>
    %483 = arith.addf %482, %481 : vector<16x64xf32>
    %484 = arith.mulf %445, %483 : vector<16x64xf32>
    %485 = arith.truncf %484 : vector<16x64xf32> to vector<16x64xbf16>
    %c1_176 = arith.constant 1 : index
    %c0_177 = arith.constant 0 : index
    %c0_178 = arith.constant 0 : index
    %486 = vector.load %arg18[%c1_176, %c0_177, %c0_178] : memref<2x64x32xbf16, #tpu.memory_space<vmem>>, vector<1x64x32xbf16>
    %487 = vector.shape_cast %486 : vector<1x64x32xbf16> to vector<64x32xbf16>
    %cst_179 = arith.constant dense<0.000000e+00> : vector<16x32xf32>
    %488 = tpu.matmul %485, %487, %cst_179 {dimension_numbers = #tpu.dot_dimension_numbers<[1], [0], [0], [1], [0, 0, 1, 1], [], []>} : vector<16x64xbf16>, vector<64x32xbf16>, vector<16x32xf32> -> vector<16x32xf32>
    %c1_180 = arith.constant 1 : index
    %c0_181 = arith.constant 0 : index
    %c0_182 = arith.constant 0 : index
    %489 = vector.load %arg19[%c1_180, %c0_181, %c0_182] : memref<2x1x32xf32, #tpu.memory_space<vmem>>, vector<1x1x32xf32>
    %490 = vector.shape_cast %489 : vector<1x1x32xf32> to vector<1x32xf32>
    %491 = vector.broadcast %490 : vector<1x32xf32> to vector<16x32xf32>
    %492 = arith.addf %488, %491 : vector<16x32xf32>
    %493 = arith.addf %435, %492 : vector<16x32xf32>
    %c1_183 = arith.constant 1 : index
    %c0_184 = arith.constant 0 : index
    %c0_185 = arith.constant 0 : index
    %494 = vector.load %arg20[%c1_183, %c0_184, %c0_185] : memref<2x1x32xf32, #tpu.memory_space<vmem>>, vector<1x1x32xf32>
    %495 = vector.shape_cast %494 : vector<1x1x32xf32> to vector<1x32xf32>
    %c1_186 = arith.constant 1 : index
    %c0_187 = arith.constant 0 : index
    %c0_188 = arith.constant 0 : index
    %496 = vector.load %arg21[%c1_186, %c0_187, %c0_188] : memref<2x1x32xf32, #tpu.memory_space<vmem>>, vector<1x1x32xf32>
    %497 = vector.shape_cast %496 : vector<1x1x32xf32> to vector<1x32xf32>
    %cst_189 = arith.constant dense<0.000000e+00> : vector<16xf32>
    %498 = vector.multi_reduction <add>, %493, %cst_189 [1] : vector<16x32xf32> to vector<16xf32>
    %499 = vector.shape_cast %498 : vector<16xf32> to vector<16x1xf32>
    %cst_190 = arith.constant 3.200000e+01 : f32
    %500 = vector.broadcast %cst_190 : f32 to vector<16x1xf32>
    %501 = arith.divf %499, %500 : vector<16x1xf32>
    %502 = vector.broadcast %501 : vector<16x1xf32> to vector<16x32xf32>
    %503 = arith.subf %493, %502 : vector<16x32xf32>
    %504 = arith.mulf %503, %503 : vector<16x32xf32>
    %cst_191 = arith.constant dense<0.000000e+00> : vector<16xf32>
    %505 = vector.multi_reduction <add>, %504, %cst_191 [1] : vector<16x32xf32> to vector<16xf32>
    %506 = vector.shape_cast %505 : vector<16xf32> to vector<16x1xf32>
    %cst_192 = arith.constant 3.200000e+01 : f32
    %507 = vector.broadcast %cst_192 : f32 to vector<16x1xf32>
    %508 = arith.divf %506, %507 : vector<16x1xf32>
    %509 = vector.broadcast %501 : vector<16x1xf32> to vector<16x32xf32>
    %510 = arith.subf %493, %509 : vector<16x32xf32>
    %cst_193 = arith.constant 9.99999996E-13 : f32
    %511 = vector.broadcast %cst_193 : f32 to vector<16x1xf32>
    %512 = arith.addf %508, %511 : vector<16x1xf32>
    %513 = math.rsqrt %512 : vector<16x1xf32>
    %514 = vector.broadcast %513 : vector<16x1xf32> to vector<16x32xf32>
    %515 = arith.mulf %510, %514 : vector<16x32xf32>
    %516 = vector.broadcast %495 : vector<1x32xf32> to vector<16x32xf32>
    %517 = arith.mulf %515, %516 : vector<16x32xf32>
    %518 = vector.broadcast %497 : vector<1x32xf32> to vector<16x32xf32>
    %519 = arith.addf %517, %518 : vector<16x32xf32>
    %520 = vector.shape_cast %519 : vector<16x32xf32> to vector<2x8x32xf32>
    %521 = vector.extract_strided_slice %520 {offsets = [0, 0, 0], sizes = [2, 1, 32], strides = [1, 1, 1]} : vector<2x8x32xf32> to vector<2x1x32xf32>
    %522 = vector.shape_cast %521 : vector<2x1x32xf32> to vector<2x32xf32>
    %523 = arith.truncf %522 : vector<2x32xf32> to vector<2x32xbf16>
    %c0_194 = arith.constant 0 : index
    %c0_195 = arith.constant 0 : index
    %524 = vector.load %arg22[%c0_194, %c0_195] : memref<32x32xbf16, #tpu.memory_space<vmem>>, vector<32x32xbf16>
    %cst_196 = arith.constant dense<0.000000e+00> : vector<2x32xf32>
    %525 = tpu.matmul %523, %524, %cst_196 {dimension_numbers = #tpu.dot_dimension_numbers<[1], [0], [0], [1], [0, 0, 1, 1], [], []>} : vector<2x32xbf16>, vector<32x32xbf16>, vector<2x32xf32> -> vector<2x32xf32>
    %c0_197 = arith.constant 0 : index
    %c0_198 = arith.constant 0 : index
    %526 = vector.load %arg23[%c0_197, %c0_198] : memref<1x32xf32, #tpu.memory_space<vmem>>, vector<1x32xf32>
    %527 = vector.broadcast %526 : vector<1x32xf32> to vector<2x32xf32>
    %528 = arith.addf %525, %527 : vector<2x32xf32>
    %529 = math.tanh %528 : vector<2x32xf32>
    %530 = arith.truncf %529 : vector<2x32xf32> to vector<2x32xbf16>
    %c0_199 = arith.constant 0 : index
    %c0_200 = arith.constant 0 : index
    %531 = vector.load %arg24[%c0_199, %c0_200] : memref<32x128xbf16, #tpu.memory_space<vmem>>, vector<32x128xbf16>
    %cst_201 = arith.constant dense<0.000000e+00> : vector<2x128xf32>
    %532 = tpu.matmul %530, %531, %cst_201 {dimension_numbers = #tpu.dot_dimension_numbers<[1], [0], [0], [1], [0, 0, 1, 1], [], []>} : vector<2x32xbf16>, vector<32x128xbf16>, vector<2x128xf32> -> vector<2x128xf32>
    %c0_202 = arith.constant 0 : index
    %c0_203 = arith.constant 0 : index
    %533 = vector.load %arg25[%c0_202, %c0_203] : memref<1x128xf32, #tpu.memory_space<vmem>>, vector<1x128xf32>
    %534 = vector.broadcast %533 : vector<1x128xf32> to vector<2x128xf32>
    %535 = arith.addf %532, %534 : vector<2x128xf32>
    %536 = arith.truncf %519 : vector<16x32xf32> to vector<16x32xbf16>
    %c0_204 = arith.constant 0 : index
    %c0_205 = arith.constant 0 : index
    %537 = vector.load %arg26[%c0_204, %c0_205] : memref<32x128xbf16, #tpu.memory_space<vmem>>, vector<32x128xbf16>
    %cst_206 = arith.constant dense<0.000000e+00> : vector<16x128xf32>
    %538 = tpu.matmul %536, %537, %cst_206 {dimension_numbers = #tpu.dot_dimension_numbers<[1], [0], [0], [1], [0, 0, 1, 1], [], []>} : vector<16x32xbf16>, vector<32x128xbf16>, vector<16x128xf32> -> vector<16x128xf32>
    %c0_207 = arith.constant 0 : index
    %c0_208 = arith.constant 0 : index
    %539 = vector.load %arg27[%c0_207, %c0_208] : memref<1x128xf32, #tpu.memory_space<vmem>>, vector<1x128xf32>
    %540 = vector.broadcast %539 : vector<1x128xf32> to vector<16x128xf32>
    %541 = arith.addf %538, %540 : vector<16x128xf32>
    %c0_209 = arith.constant 0 : index
    %c0_210 = arith.constant 0 : index
    %542 = vector.load %arg28[%c0_209, %c0_210] : memref<2x128xf32, #tpu.memory_space<vmem>>, vector<2x128xf32>
    tpu.vector_store %arg28[%c0_209, %c0_210], %535 {strides = array<i32>} : memref<2x128xf32, #tpu.memory_space<vmem>>, vector<2x128xf32>,
    %c0_211 = arith.constant 0 : index
    %c0_212 = arith.constant 0 : index
    %543 = vector.load %arg29[%c0_211, %c0_212] : memref<16x128xf32, #tpu.memory_space<vmem>>, vector<16x128xf32>
    tpu.vector_store %arg29[%c0_211, %c0_212], %541 {strides = array<i32>} : memref<16x128xf32, #tpu.memory_space<vmem>>, vector<16x128xf32>,
    %544 = tpu.iota {dimensions = array<i32: 1>} : vector<2x128xi32>
    %c0_213 = arith.constant 0 : index
    %c0_214 = arith.constant 0 : index
    %545 = vector.load %arg3[%c0_213, %c0_214] : memref<2x128xf32, #tpu.memory_space<vmem>>, vector<2x128xf32>
    %cst_215 = arith.constant 0.000000e+00 : f32
    %546 = vector.broadcast %cst_215 : f32 to vector<2x128xf32>
    %547 = arith.maximumf %535, %546 : vector<2x128xf32>
    %548 = arith.mulf %535, %545 : vector<2x128xf32>
    %549 = arith.subf %547, %548 : vector<2x128xf32>
    %550 = math.absf %535 : vector<2x128xf32>
    %cst_216 = arith.constant 0.000000e+00 : f32
    %551 = vector.broadcast %cst_216 : f32 to vector<2x128xf32>
    %552 = arith.subf %551, %550 : vector<2x128xf32>
    %553 = math.exp %552 : vector<2x128xf32>
    %cst_217 = arith.constant 1.000000e+00 : f32
    %554 = vector.broadcast %cst_217 : f32 to vector<2x128xf32>
    %555 = arith.addf %554, %553 : vector<2x128xf32>
    %556 = math.log %555 : vector<2x128xf32>
    %557 = arith.addf %549, %556 : vector<2x128xf32>
    %c3_i32 = arith.constant 3 : i32
    %558 = vector.broadcast %c3_i32 : i32 to vector<2x128xi32>
    %559 = arith.cmpi slt, %544, %558 : vector<2x128xi32>
    %cst_218 = arith.constant 0.000000e+00 : f32
    %560 = vector.broadcast %cst_218 : f32 to vector<2x128xf32>
    %561 = arith.select %559, %557, %560 : vector<2x128xi1>, vector<2x128xf32>
    %562 = vector.shape_cast %561 : vector<2x128xf32> to vector<1x2x128xf32>
    %cst_219 = arith.constant dense<0.000000e+00> : vector<1xf32>
    %563 = vector.multi_reduction <add>, %562, %cst_219 [1, 2] : vector<1x2x128xf32> to vector<1xf32>
    %564 = vector.shape_cast %563 : vector<1xf32> to vector<1x1x1xf32>
    %565 = vector.extract %564[0, 0, 0] : f32 from vector<1x1x1xf32>
    %cst_220 = arith.constant 6.000000e+00 : f32
    %566 = arith.divf %565, %cst_220 : f32
    %567 = vector.shape_cast %541 : vector<16x128xf32> to vector<2x8x128xf32>
    %568 = tpu.iota {dimensions = array<i32: 2>} : vector<2x8x128xi32>
    %c5_i32 = arith.constant 5 : i32
    %569 = vector.broadcast %c5_i32 : i32 to vector<2x8x128xi32>
    %570 = arith.cmpi slt, %568, %569 : vector<2x8x128xi32>
    %cst_221 = arith.constant -1.000000e+30 : f32
    %571 = vector.broadcast %cst_221 : f32 to vector<2x8x128xf32>
    %572 = arith.select %570, %567, %571 : vector<2x8x128xi1>, vector<2x8x128xf32>
    %cst_222 = arith.constant dense<0xFF800000> : vector<2x8xf32>
    %573 = vector.multi_reduction <maximumf>, %572, %cst_222 [2] : vector<2x8x128xf32> to vector<2x8xf32>
    %574 = vector.shape_cast %573 : vector<2x8xf32> to vector<2x8x1xf32>
    %575 = vector.broadcast %574 : vector<2x8x1xf32> to vector<2x8x128xf32>
    %576 = arith.subf %572, %575 : vector<2x8x128xf32>
    %577 = math.exp %576 : vector<2x8x128xf32>
    %cst_223 = arith.constant dense<0.000000e+00> : vector<2x8xf32>
    %578 = vector.multi_reduction <add>, %577, %cst_223 [2] : vector<2x8x128xf32> to vector<2x8xf32>
    %579 = math.log %578 : vector<2x8xf32>
    %580 = vector.shape_cast %574 : vector<2x8x1xf32> to vector<2x8xf32>
    %581 = arith.addf %579, %580 : vector<2x8xf32>
    %c0_224 = arith.constant 0 : index
    %c0_225 = arith.constant 0 : index
    %582 = vector.load %arg4[%c0_224, %c0_225] : memref<2x8xi32, #tpu.memory_space<vmem>>, vector<2x8xi32>
    %c0_226 = arith.constant 0 : index
    %c0_227 = arith.constant 0 : index
    %583 = vector.load %arg2[%c0_226, %c0_227] : memref<2x8xi32, #tpu.memory_space<vmem>>, vector<2x8xi32>
    %c1_i32 = arith.constant 1 : i32
    %584 = vector.broadcast %c1_i32 : i32 to vector<2x8xi32>
    %585 = arith.cmpi eq, %583, %584 : vector<2x8xi32>
    %c-100_i32 = arith.constant -100 : i32
    %586 = vector.broadcast %c-100_i32 : i32 to vector<2x8xi32>
    %587 = arith.cmpi ne, %582, %586 : vector<2x8xi32>
    %588 = arith.andi %585, %587 : vector<2x8xi1>
    %c0_i32 = arith.constant 0 : i32
    %589 = vector.broadcast %c0_i32 : i32 to vector<2x8xi32>
    %590 = arith.select %588, %582, %589 : vector<2x8xi1>, vector<2x8xi32>
    %591 = vector.shape_cast %590 : vector<2x8xi32> to vector<2x8x1xi32>
    %592 = vector.broadcast %591 : vector<2x8x1xi32> to vector<2x8x128xi32>
    %593 = arith.cmpi eq, %568, %592 : vector<2x8x128xi32>
    %cst_228 = arith.constant 0.000000e+00 : f32
    %594 = vector.broadcast %cst_228 : f32 to vector<2x8x128xf32>
    %595 = arith.select %593, %567, %594 : vector<2x8x128xi1>, vector<2x8x128xf32>
    %cst_229 = arith.constant dense<0.000000e+00> : vector<2x8xf32>
    %596 = vector.multi_reduction <add>, %595, %cst_229 [2] : vector<2x8x128xf32> to vector<2x8xf32>
    %597 = arith.subf %581, %596 : vector<2x8xf32>
    %598 = arith.extui %588 : vector<2x8xi1> to vector<2x8xi32>
    %599 = arith.sitofp %598 : vector<2x8xi32> to vector<2x8xf32>
    %600 = vector.shape_cast %599 : vector<2x8xf32> to vector<1x2x8xf32>
    %cst_230 = arith.constant dense<0.000000e+00> : vector<1xf32>
    %601 = vector.multi_reduction <add>, %600, %cst_230 [1, 2] : vector<1x2x8xf32> to vector<1xf32>
    %602 = vector.shape_cast %601 : vector<1xf32> to vector<1x1x1xf32>
    %603 = vector.extract %602[0, 0, 0] : f32 from vector<1x1x1xf32>
    %cst_231 = arith.constant 0.000000e+00 : f32
    %604 = vector.broadcast %cst_231 : f32 to vector<2x8xf32>
    %605 = arith.select %588, %597, %604 : vector<2x8xi1>, vector<2x8xf32>
    %606 = vector.shape_cast %605 : vector<2x8xf32> to vector<1x2x8xf32>
    %cst_232 = arith.constant dense<0.000000e+00> : vector<1xf32>
    %607 = vector.multi_reduction <add>, %606, %cst_232 [1, 2] : vector<1x2x8xf32> to vector<1xf32>
    %608 = vector.shape_cast %607 : vector<1xf32> to vector<1x1x1xf32>
    %609 = vector.extract %608[0, 0, 0] : f32 from vector<1x1x1xf32>
    %cst_233 = arith.constant 1.000000e+00 : f32
    %610 = arith.maximumf %603, %cst_233 : f32
    %611 = arith.divf %609, %610 : f32
    %612 = tpu.iota {dimensions = array<i32: 1>} : vector<1x128xi32>
    %c0_i32_234 = arith.constant 0 : i32
    %613 = vector.broadcast %c0_i32_234 : i32 to vector<1x128xi32>
    %614 = arith.cmpi eq, %612, %613 : vector<1x128xi32>
    %615 = vector.broadcast %566 : f32 to vector<1x1xf32>
    %c1_i32_235 = arith.constant 1 : i32
    %616 = vector.broadcast %c1_i32_235 : i32 to vector<1x128xi32>
    %617 = arith.cmpi eq, %612, %616 : vector<1x128xi32>
    %618 = vector.broadcast %611 : f32 to vector<1x1xf32>
    %cst_236 = arith.constant 0.000000e+00 : f32
    %619 = vector.shape_cast %618 : vector<1x1xf32> to vector<1x1xf32>
    %620 = vector.broadcast %619 : vector<1x1xf32> to vector<1x128xf32>
    %621 = vector.broadcast %cst_236 : f32 to vector<1x128xf32>
    %622 = arith.select %617, %620, %621 : vector<1x128xi1>, vector<1x128xf32>
    %623 = vector.shape_cast %615 : vector<1x1xf32> to vector<1x1xf32>
    %624 = vector.broadcast %623 : vector<1x1xf32> to vector<1x128xf32>
    %625 = arith.select %614, %624, %622 : vector<1x128xi1>, vector<1x128xf32>
    %c0_237 = arith.constant 0 : index
    %c0_238 = arith.constant 0 : index
    %626 = vector.load %arg30[%c0_237, %c0_238] : memref<1x128xf32, #tpu.memory_space<vmem>>, vector<1x128xf32>
    tpu.vector_store %arg30[%c0_237, %c0_238], %625 {strides = array<i32>} : memref<1x128xf32, #tpu.memory_space<vmem>>, vector<1x128xf32>,
    return
  }
}

</mosaic_0001>

<bundles_post_ra>
// kernel: tpu_custom_call.1
= control target key start
LH: loop header
LB: loop body
LE: loop exit
PB: predicated region body
PF: predicated region fallthrough
CT: control target
= control target key end

     0   :  { %s3582_s6 = smov 1   ;;  %s3583_s10 = smov 2   ;;  %s4448_s0 = inlined_call_operand.smem [shape: u32[31], index: -1, kind: input, shape index: {}] }
   0x1   :  { %s3656_s5 = sld [smem:[%s4448_s0]]   ;;  %s3584_s14 = smov 3  }
   0x2   :  { %s3661_s9 = sld [smem:[%s4448_s0 + %s3582_s6]]   ;;  %s3585_s18 = smov 4  }
   0x3   :  { %s3666_s13 = sld [smem:[%s4448_s0 + %s3583_s10]]   ;;  %s3586_s22 = smov 5  }
   0x4   :  { %s3671_s17 = sld [smem:[%s4448_s0 + %s3584_s14]]   ;;  %s3587_s26 = smov 6  }
   0x5   :  { %s3676_s21 = sld [smem:[%s4448_s0 + %s3585_s18]]   ;;  %s3588_s30 = smov 7  }
   0x6   :  { %s3681_s25 = sld [smem:[%s4448_s0 + %s3586_s22]]   ;;  %s3589_s4 = smov 8  }
   0x7   :  { %s3686_s29 = sld [smem:[%s4448_s0 + %s3587_s26]]   ;;  %s3590_s10 = smov 9  }
   0x8   :  { %s3691_s3 = sld [smem:[%s4448_s0 + %s3588_s30]]   ;;  %s3591_s15 = smov 10  }
   0x9   :  { %4457 = sst [smem:[#allocation31_spill]] %s3666_s13  ;;  %s3592_s20 = smov 11  }
   0xa   :  { %4458 = sst [smem:[#allocation32_spill]] %s3671_s17  ;;  %s3593_s26 = smov 12  }
   0xb   :  { %s3696_s8 = sld [smem:[%s4448_s0 + %s3589_s4]]   ;;  %s3594_s1 = smov 13  }
   0xc   :  { %s3701_s14 = sld [smem:[%s4448_s0 + %s3590_s10]]   ;;  %s3595_s7 = smov 14  }
   0xd   :  { %4459 = sst [smem:[#allocation33_spill]] %s3686_s29  ;;  %s3597_s22 = smov 16  }
   0xe   :  { %s3706_s19 = sld [smem:[%s4448_s0 + %s3591_s15]]   ;;  %s3596_s15 = smov 15  }
   0xf   :  { %s3711_s24 = sld [smem:[%s4448_s0 + %s3592_s20]]   ;;  %s3598_s28 = smov 17  }
  0x10   :  { %s3716_s30 = sld [smem:[%s4448_s0 + %s3593_s26]]  }
  0x11   :  { %4460 = sst [smem:[#allocation34_spill]] %s3696_s8 }
  0x12   :  { %s3721_s6 = sld [smem:[%s4448_s0 + %s3594_s1]]  }
  0x13   :  { %s3726_s12 = sld [smem:[%s4448_s0 + %s3595_s7]]   ;;  %s3599_s7 = smov 18  }
  0x14   :  { %4461 = sst [smem:[#allocation35_spill]] %s3706_s19 }
  0x15   :  { %s3731_s20 = sld [smem:[%s4448_s0 + %s3596_s15]]   ;;  %s3600_s15 = smov 19  }
  0x16   :  { %4462 = sst [smem:[#allocation36_spill]] %s3716_s30 }
  0x17   :  { %s3736_s27 = sld [smem:[%s4448_s0 + %s3597_s22]]   ;;  %s3601_s22 = smov 20  }
  0x18   :  { %s3741_s4 = sld [smem:[%s4448_s0 + %s3598_s28]]   ;;  %s3602_s28 = smov 21  }
  0x19   :  { %s3746_s17 = sld [smem:[%s4448_s0 + %s3599_s7]]   ;;  %s3603_s7 = smov 22  }
  0x1a   :  { %s3751_s30 = sld [smem:[%s4448_s0 + %s3600_s15]]   ;;  %s3604_s15 = smov 23  }
  0x1b   :  { %s3761_s13 = sld [smem:[%s4448_s0 + %s3602_s28]]   ;;  %s3606_s28 = smov 25  }
  0x1c   :  { %s3771_s8 = sld [smem:[%s4448_s0 + %s3604_s15]]   ;;  %s3608_s15 = smov 27  }
  0x1d   :  { %4463 = sst [smem:[#allocation37_spill]] %s3736_s27 }
  0x1e   :  { %s3756_s27 = sld [smem:[%s4448_s0 + %s3601_s22]]   ;;  %s3605_s22 = smov 24  }
  0x1f   :  { %4464 = sst [smem:[#allocation38_spill]] %s3746_s17 }
  0x20   :  { %s3766_s17 = sld [smem:[%s4448_s0 + %s3603_s7]]   ;;  %s3607_s7 = smov 26  }
  0x21   :  { %4465 = sst [smem:[#allocation39_spill]] %s3761_s13 }
  0x22   :  { %4467 = sst [smem:[#allocation41_spill]] %s3771_s8 }
  0x23   :  { %s3776_s19 = sld [smem:[%s4448_s0 + %s3605_s22]]   ;;  %s3609_s22 = smov 28  }
  0x24   :  { %s3781_s13 = sld [smem:[%s4448_s0 + %s3606_s28]]   ;;  %s3610_s28 = smov 29  }
  0x25   :  { %s3791_s8 = sld [smem:[%s4448_s0 + %s3608_s15]]  }
  0x26   :  { %4466 = sst [smem:[#allocation40_spill]] %s3766_s17 }
  0x27   :  { %s3786_s17 = sld [smem:[%s4448_s0 + %s3607_s7]]   ;;  %s3611_s7 = smov 30  }
  0x28   :  { %s3806_s29 = sld [smem:[%s4448_s0 + %s3611_s7]]  }
  0x29   :  { %4468 = sst [smem:[#allocation42_spill]] %s3776_s19 }
  0x2a   :  { %4469 = sst [smem:[#allocation43_spill]] %s3781_s13 }
  0x2b   :  { %s3796_s19 = sld [smem:[%s4448_s0 + %s3609_s22]]  }
  0x2c   :  { %s3801_s13 = sld [smem:[%s4448_s0 + %s3610_s28]]  }
  0x2d   :  { %67 = vsyncpa [#allocation3], 0 }
  0x2e   :  { %68 = vsyncpa [#allocation6], 0 }
  0x2f   :  { %69 = vsyncpa [#allocation9], 0 }
  0x30   :  { %70 = vsyncpa [#allocation12], 0 }
  0x31   :  { %71 = vsyncpa [#allocation15], 0 }
  0x32   :  { %72 = vsyncpa [#allocation18], 0 }
  0x33   :  { %73 = vsyncpa [#allocation4], 0  ;;  %s107_s15 = sshll.u32 %s3701_s14, 4  ;;  %s108_s15 = int_to_ptr.hbm [resolvable:$true] %s107_s15 }
  0x34   :  { %74 = vsyncpa [#allocation21], 0  ;;  %s3612_s16 = smov [#allocation5]   ;;  %s3254_s22 = sshra.s32 %s108_s15, 4  ;;  %s3255_s22 = int_to_ptr.hbm [resolvable:$true] %s3254_s22 }
  0x35   :  { %s109_s18 = sshll.u32 %s3612_s16, 4  ;;  %s3256_s0 = scalar_lea.hbm %s3255_s22, 1  ;;  %s110_s18 = int_to_ptr.vmem [resolvable:$true] %s109_s18 }
  0x36   :  { %p3257_p0 = scmp.ne.s32.totalorder %s3255_s22, %s3256_s0  ;;  %s3258_s23 = scalar_lea.hbm %s3701_s14, 1 }
  0x37   :  { %p3259_p1 = scmp.lt.s32.totalorder %s3255_s22, %s3701_s14  ;;  %p3260_p2 = scmp.lt.s32.totalorder %s3258_s23, %s3256_s0 }
  0x39   :  { %p3261_p3 = por %p3260_p2, %p3259_p1 }
  0x3b   :  { %p3262_p4 = pnand %p3261_p3, %p3257_p0 }
  0x3d   :  { %3265 = shalt.err (!%p3262_p4)
}
  0x3e   :  { %112 = dma.hbm_to_vmem [thread:$0]  %s108_s15, 16, %s110_s18, [#allocation6]  }
  0x3f   :  { %s134_s26 = sshll.u32 %s3721_s6, 4  ;;  %s3613_s28 = smov [#allocation8]   ;;  %s135_s26 = int_to_ptr.hbm [resolvable:$true] %s134_s26 }
  0x40   :  { %s136_s1 = sshll.u32 %s3613_s28, 4  ;;  %s160_s2 = sshll.u32 %s3731_s20, 4  ;;  %s137_s1 = int_to_ptr.vmem [resolvable:$true] %s136_s1  ;;  %s3813_s2 = int_to_ptr.hbm [resolvable:$true] %s160_s2 }
  0x41   :  { %s3278_s7 = sshra.s32 %s135_s26, 4  ;;  %s3282_s10 = scalar_lea.hbm %s3721_s6, 2  ;;  %s3279_s7 = int_to_ptr.hbm [resolvable:$true] %s3278_s7 }
  0x42   :  { %s3280_s14 = scalar_lea.hbm %s3279_s7, 2  ;;  %p3283_p6 = scmp.lt.s32.totalorder %s3279_s7, %s3721_s6 }
  0x43   :  { %p3281_p5 = scmp.ne.s32.totalorder %s3279_s7, %s3280_s14  ;;  %p3284_p7 = scmp.lt.s32.totalorder %s3282_s10, %s3280_s14 }
  0x45   :  { %p3285_p8 = por %p3284_p7, %p3283_p6 }
  0x47   :  { %p3286_p9 = pnand %p3285_p8, %p3281_p5 }
  0x49   :  { %3289 = shalt.err (!%p3286_p9)
}
  0x4a   :  { %s3614_s11 = smov 16   ;;  %s3615_s15 = smov 1  }
  0x4b   :  { %142 = dma.hbm_to_vmem [thread:$0]  %s135_s26, 32, %s137_s1, [#allocation9], %s3614_s11, %s3614_s11, %s3615_s15  }
  0x4c   :  { %s190_s16 = sshll.u32 %s3751_s30, 4  ;;  %s3616_s18 = smov [#allocation11]   ;;  %s3821_s16 = int_to_ptr.hbm [resolvable:$true] %s190_s16 }
  0x4d   :  { %s162_s22 = sshll.u32 %s3616_s18, 4  ;;  %s3302_s6 = sshra.s32 %s3813_s2, 4  ;;  %s163_s22 = int_to_ptr.vmem [resolvable:$true] %s162_s22  ;;  %s3303_s6 = int_to_ptr.hbm [resolvable:$true] %s3302_s6 }
  0x4e   :  { %s3304_s0 = scalar_lea.hbm %s3303_s6, 2  ;;  %s3306_s23 = scalar_lea.hbm %s3731_s20, 2 }
  0x4f   :  { %p3305_p10 = scmp.ne.s32.totalorder %s3303_s6, %s3304_s0  ;;  %p3307_p11 = scmp.lt.s32.totalorder %s3303_s6, %s3731_s20 }
  0x50   :  { %p3308_p12 = scmp.lt.s32.totalorder %s3306_s23, %s3304_s0 }
  0x52   :  { %p3309_p13 = por %p3308_p12, %p3307_p11 }
  0x54   :  { %p3310_p0 = pnand %p3309_p13, %p3305_p10 }
  0x56   :  { %3313 = shalt.err (!%p3310_p0)
}
  0x57   :  { %168 = dma.hbm_to_vmem [thread:$0]  %s3813_s2, 32, %s163_s22, [#allocation12], %s3614_s11, %s3614_s11, %s3615_s15  }
  0x58   :  { %s3617_s26 = smov [#allocation14]   ;;  %s88_s1 = sshll.u32 %s3676_s21, 4  ;;  %s89_s1 = int_to_ptr.hbm [resolvable:$true] %s88_s1 }
  0x59   :  { %s192_s28 = sshll.u32 %s3617_s26, 4  ;;  %s3326_s7 = sshra.s32 %s3821_s16, 4  ;;  %s193_s28 = int_to_ptr.vmem [resolvable:$true] %s192_s28  ;;  %s3327_s7 = int_to_ptr.hbm [resolvable:$true] %s3326_s7 }
  0x5a   :  { %s3328_s20 = scalar_lea.hbm %s3327_s7, 2  ;;  %s3330_s14 = scalar_lea.hbm %s3751_s30, 2 }
  0x5b   :  { %p3329_p1 = scmp.ne.s32.totalorder %s3327_s7, %s3328_s20  ;;  %p3331_p2 = scmp.lt.s32.totalorder %s3327_s7, %s3751_s30 }
  0x5c   :  { %p3332_p3 = scmp.lt.s32.totalorder %s3330_s14, %s3328_s20 }
  0x5e   :  { %p3333_p4 = por %p3332_p3, %p3331_p2 }
  0x60   :  { %p3334_p5 = pnand %p3333_p4, %p3329_p1 }
  0x62   :  { %3337 = shalt.err (!%p3334_p5)
}
  0x63   :  { %198 = dma.hbm_to_vmem [thread:$0]  %s3821_s16, 32, %s193_s28, [#allocation15], %s3614_s11, %s3614_s11, %s3615_s15  }
  0x64   :  { %s119_s2 = sshll.u32 %s3711_s24, 4  ;;  %s3618_s10 = smov [#allocation2]   ;;  %s3839_s2 = int_to_ptr.hbm [resolvable:$true] %s119_s2 }
  0x65   :  { %s90_s18 = sshll.u32 %s3618_s10, 4  ;;  %s3350_s22 = sshra.s32 %s89_s1, 4  ;;  %s91_s18 = int_to_ptr.vmem [resolvable:$true] %s90_s18  ;;  %s3351_s22 = int_to_ptr.hbm [resolvable:$true] %s3350_s22 }
  0x66   :  { %s3352_s30 = scalar_lea.hbm %s3351_s22, 2  ;;  %s3354_s6 = scalar_lea.hbm %s3676_s21, 2 }
  0x67   :  { %p3353_p6 = scmp.ne.s32.totalorder %s3351_s22, %s3352_s30  ;;  %p3355_p7 = scmp.lt.s32.totalorder %s3351_s22, %s3676_s21 }
  0x68   :  { %p3356_p8 = scmp.lt.s32.totalorder %s3354_s6, %s3352_s30 }
  0x6a   :  { %p3357_p9 = por %p3356_p8, %p3355_p7 }
  0x6c   :  { %p3358_p10 = pnand %p3357_p9, %p3353_p6 }
  0x6e   :  { %3361 = shalt.err (!%p3358_p10)
}
  0x6f   :  { %93 = dma.hbm_to_vmem [thread:$0]  %s89_s1, 32, %s91_s18, [#allocation3]  }
  0x70   :  { %s3619_s16 = smov [#allocation7]   ;;  %s147_s23 = sshll.u32 %s3726_s12, 4  ;;  %s3844_s23 = int_to_ptr.hbm [resolvable:$true] %s147_s23 }
  0x71   :  { %s121_s0 = sshll.u32 %s3619_s16, 4  ;;  %s3374_s26 = sshra.s32 %s3839_s2, 4  ;;  %s122_s0 = int_to_ptr.vmem [resolvable:$true] %s121_s0  ;;  %s3375_s26 = int_to_ptr.hbm [resolvable:$true] %s3374_s26 }
  0x72   :  { %s3376_s28 = scalar_lea.hbm %s3375_s26, 2  ;;  %s3378_s21 = scalar_lea.hbm %s3711_s24, 2 }
  0x73   :  { %p3377_p11 = scmp.ne.s32.totalorder %s3375_s26, %s3376_s28  ;;  %p3379_p12 = scmp.lt.s32.totalorder %s3375_s26, %s3711_s24 }
  0x74   :  { %p3380_p13 = scmp.lt.s32.totalorder %s3378_s21, %s3376_s28 }
  0x76   :  { %p3381_p0 = por %p3380_p13, %p3379_p12 }
  0x78   :  { %p3382_p1 = pnand %p3381_p0, %p3377_p11 }
  0x7a   :  { %3385 = shalt.err (!%p3382_p1)
}
  0x7b   :  { %127 = dma.hbm_to_vmem [thread:$0]  %s3839_s2, 32, %s122_s0, [#allocation6], %s3614_s11, %s3614_s11, %s3615_s15  }
  0x7c   :  { %s175_s1 = sshll.u32 %s3741_s4, 4  ;;  %s3620_s7 = smov [#allocation10]   ;;  %s3854_s1 = int_to_ptr.hbm [resolvable:$true] %s175_s1 }
  0x7d   :  { %s149_s20 = sshll.u32 %s3620_s7, 4  ;;  %s3398_s24 = sshra.s32 %s3844_s23, 4  ;;  %s150_s20 = int_to_ptr.vmem [resolvable:$true] %s149_s20  ;;  %s3399_s24 = int_to_ptr.hbm [resolvable:$true] %s3398_s24 }
  0x7e   :  { %s3400_s14 = scalar_lea.hbm %s3399_s24, 2  ;;  %s3402_s10 = scalar_lea.hbm %s3726_s12, 2 }
  0x7f   :  { %p3401_p2 = scmp.ne.s32.totalorder %s3399_s24, %s3400_s14  ;;  %p3403_p3 = scmp.lt.s32.totalorder %s3399_s24, %s3726_s12 }
  0x80   :  { %p3404_p4 = scmp.lt.s32.totalorder %s3402_s10, %s3400_s14 }
  0x82   :  { %p3405_p5 = por %p3404_p4, %p3403_p3 }
  0x84   :  { %p3406_p6 = pnand %p3405_p5, %p3401_p2 }
  0x86   :  { %3409 = shalt.err (!%p3406_p6)
}
  0x87   :  { %155 = dma.hbm_to_vmem [thread:$0]  %s3844_s23, 32, %s150_s20, [#allocation9], %s3614_s11, %s3614_s11, %s3615_s15  }
  0x88   :  { %s3621_s2 = smov [#allocation13]   ;;  %s203_s22 = sshll.u32 %s3756_s27, 4  ;;  %s3864_s22 = int_to_ptr.hbm [resolvable:$true] %s203_s22 }
  0x89   :  { %s177_s18 = sshll.u32 %s3621_s2, 4  ;;  %s3422_s12 = sshra.s32 %s3854_s1, 4  ;;  %s178_s18 = int_to_ptr.vmem [resolvable:$true] %s177_s18  ;;  %s3423_s12 = int_to_ptr.hbm [resolvable:$true] %s3422_s12 }
  0x8a   :  { %s3424_s30 = scalar_lea.hbm %s3423_s12, 2  ;;  %s3426_s6 = scalar_lea.hbm %s3741_s4, 2 }
  0x8b   :  { %p3425_p7 = scmp.ne.s32.totalorder %s3423_s12, %s3424_s30  ;;  %p3427_p8 = scmp.lt.s32.totalorder %s3423_s12, %s3741_s4 }
  0x8c   :  { %p3428_p9 = scmp.lt.s32.totalorder %s3426_s6, %s3424_s30 }
  0x8e   :  { %p3429_p10 = por %p3428_p9, %p3427_p8 }
  0x90   :  { %p3430_p11 = pnand %p3429_p10, %p3425_p7 }
  0x92   :  { %3433 = shalt.err (!%p3430_p11)
}
  0x93   :  { %183 = dma.hbm_to_vmem [thread:$0]  %s3854_s1, 32, %s178_s18, [#allocation12], %s3614_s11, %s3614_s11, %s3615_s15  }
  0x94   :  { %s226_s16 = sshll.u32 %s3786_s17, 4  ;;  %s3622_s0 = smov [#allocation16]   ;;  %s3874_s16 = int_to_ptr.hbm [resolvable:$true] %s226_s16 }
  0x95   :  { %s205_s23 = sshll.u32 %s3622_s0, 4  ;;  %s3446_s4 = sshra.s32 %s3864_s22, 4  ;;  %s206_s23 = int_to_ptr.vmem [resolvable:$true] %s205_s23  ;;  %s3447_s4 = int_to_ptr.hbm [resolvable:$true] %s3446_s4 }
  0x96   :  { %s3448_s26 = scalar_lea.hbm %s3447_s4, 2  ;;  %s3450_s28 = scalar_lea.hbm %s3756_s27, 2 }
  0x97   :  { %p3449_p12 = scmp.ne.s32.totalorder %s3447_s4, %s3448_s26  ;;  %p3451_p13 = scmp.lt.s32.totalorder %s3447_s4, %s3756_s27 }
  0x98   :  { %p3452_p0 = scmp.lt.s32.totalorder %s3450_s28, %s3448_s26 }
  0x9a   :  { %p3453_p1 = por %p3452_p0, %p3451_p13 }
  0x9c   :  { %p3454_p2 = pnand %p3453_p1, %p3449_p12 }
  0x9e   :  { %3457 = shalt.err (!%p3454_p2)
}
  0x9f   :  { %211 = dma.hbm_to_vmem [thread:$0]  %s3864_s22, 32, %s206_s23, [#allocation15], %s3614_s11, %s3614_s11, %s3615_s15  }
  0xa0   :  { %s3623_s21 = smov [#allocation17]   ;;  %s3470_s7 = sshra.s32 %s3874_s16, 4  ;;  %s3471_s7 = int_to_ptr.hbm [resolvable:$true] %s3470_s7 }
  0xa1   :  { %s228_s1 = sshll.u32 %s3623_s21, 4  ;;  %s3472_s20 = scalar_lea.hbm %s3471_s7, 16  ;;  %s229_s1 = int_to_ptr.vmem [resolvable:$true] %s228_s1 }
  0xa2   :  { %p3473_p3 = scmp.ne.s32.totalorder %s3471_s7, %s3472_s20  ;;  %s3474_s27 = scalar_lea.hbm %s3786_s17, 16 }
  0xa3   :  { %p3475_p4 = scmp.lt.s32.totalorder %s3471_s7, %s3786_s17  ;;  %p3476_p5 = scmp.lt.s32.totalorder %s3474_s27, %s3472_s20 }
  0xa5   :  { %p3477_p6 = por %p3476_p5, %p3475_p4 }
  0xa7   :  { %p3478_p7 = pnand %p3477_p6, %p3473_p3 }
  0xa9   :  { %3481 = shalt.err (!%p3478_p7)
}
  0xaa   :  { %s3624_s24 = smov 64   ;;  %s3625_s14 = smov 4  }
  0xab   :  { %234 = dma.hbm_to_vmem [thread:$0]  %s3874_s16, 256, %s229_s1, [#allocation18], %s3624_s24, %s3624_s24, %s3625_s14  }
  0xac   :  { %3566 = dma.done.wait [#allocation3], 32  }
  0xad   :  { %3567 = vsyncadd [#allocation3], 4294967264 }
  0xae   :  { %3568 = dma.done.wait [#allocation6], 48  }
  0xaf   :  { %3569 = vsyncadd [#allocation6], 4294967248 }
  0xb0   :  { %3570 = dma.done.wait [#allocation9], 64  }
  0xb1   :  { %3571 = vsyncadd [#allocation9], 4294967232 }
  0xb2   :  { %3572 = dma.done.wait [#allocation12], 64  }
  0xb3   :  { %3573 = vsyncadd [#allocation12], 4294967232 }
  0xb4   :  { %3574 = dma.done.wait [#allocation15], 64  }
  0xb5   :  { %3575 = vsyncadd [#allocation15], 4294967232 }
  0xb6   :  { %3576 = dma.done.wait [#allocation18], 256  }
  0xb7   :  { %3577 = vsyncadd [#allocation18], 4294967040  ;;  %v3626_v0 = vmov 0   ;;  %v280_v1 = vld [vmem:[%s3661_s9] sm:$0xff]  ;;  %v322_v3 = vld [vmem:[%s3681_s25 + $0x30] sm:$0x3]  ;;  %v282_v17 = vlaneseq }
  0xb8   :  { %3080 = vset.pattern.permute.xlu1 %v3626_v0  ;;  %3079 = vset.pattern.permute.xlu0 %v3626_v0  ;;  %v278_v2 = vld [vmem:[%s3656_s5] sm:$0xff]  ;;  %v372_v4 = vunpack.c.l.b16 %v322_v3  ;;  %vm390_vm0 = vcmask 1041408   ;;  %v281_v5 = vld [vmem:[%s3661_s9 + $0x8] sm:$0xff]  ;;  %v2974_v11 = vld [vmem:[%s3681_s25 + $0x18] sm:$0xff]  ;;  %vm328_vm1 = vcmask 1040384   ;;  %vm324_vm6 = vcmask 15360  }
  0xb9   :  { %298 = vperm.xlu1 %3080, %v280_v1   ;;  %285 = vperm.xlu0 %3079, %v278_v2   ;;  %v279_v6 = vld [vmem:[%s3656_s5 + $0x8] sm:$0xff]  ;;  %v2975_v10 = vld [vmem:[%s3681_s25 + $0x20] sm:$0xff]  ;;  %v2973_v12 = vld [vmem:[%s3681_s25 + $0x10] sm:$0xff]  ;;  %v3903_v20 = vand.u32 127, %v282_v17  ;;  %s4470_s5 = sld [smem:[#allocation33_spill]]  ;;  %vm386_vm7 = vcmask 818176  }
  0xba   :  { %v379_v7 = vpack.c.b16 %v372_v4, %v372_v4  ;;  %v2976_v9 = vld [vmem:[%s3681_s25 + $0x28] sm:$0xff]  ;;  %v323_v14 = vld [vmem:[%s3691_s3] sm:$0x1]  ;;  %v3627_v23 = vmov 0.0   ;;  %vm412_vm8 = vcmask 261120   ;;  %v3628_v41 = vmov 32.0  }
  0xbb   :  { %v2972_v13 = vld [vmem:[%s3681_s25 + $0x8] sm:$0xff]  ;;  %v2971_v15 = vld [vmem:[%s3681_s25] sm:$0xff]  ;;  %v330_v16 = vsel %vm328_vm1, %v323_v14, 0  ;;  %3134 = vrcp.f32 %v3628_v41  ;;  %s4471_s9 = sld [smem:[#allocation35_spill]]  ;;  %s3629_s25 = smov 96   ;;  %vm533_vm1 = vcmask 64512  }
  0xbc   :  { %v392_v8 = vsel %vm390_vm0, %v379_v7, 0  ;;  %339 = vmatpush.bf16.msra.mxu0 %v330_v16  ;;  %s4472_s17 = sld [smem:[#allocation34_spill]]  ;;  %s3630_s3 = smov 88  }
  0xbd   :  { %395 = vmatpush.bf16.msra.mxu1 %v392_v8  ;;  %s3631_s15 = smov 120   ;;  %s3632_s10 = smov 80  }
  0xbe   :  { %s3633_s2 = smov 72   ;;  %s3634_s18 = smov 104  }
  0xbf   :  { %v346_v32 = vld [vmem:[%s4470_s5] sm:$0xff]  ;;  %s4473_s22 = sld [smem:[#allocation31_spill]]  ;;  %s3635_s12 = smov 112  }
  0xc0   :  { %s3636_s30 = smov 56   ;;  %s3637_s6 = smov 48  }
  0xc1   :  { %301 = vperm.xlu1 %3080, %v281_v5   ;;  %288 = vperm.xlu0 %3079, %v279_v6   ;;  %v3135_v42 = vpop.eup %3134  ;;  %v2978_v58 = vld [vmem:[%s4471_s9 + $0x8] sm:$0xff]  ;;  %v2977_v60 = vld [vmem:[%s4471_s9] sm:$0xff]  ;;  %s3638_s16 = smov 40   ;;  %s4474_s0 = sld [smem:[#allocation36_spill]] }
  0xc2   :  { %396 = vmatpush.bf16.msra.mxu1 %v2976_v9  ;;  %v420_v43 = vmul.f32 32.0, %v3135_v42  ;;  %vm424_vm9 = vweird.f32 %v3135_v42  ;;  %510 = vmatpush.bf16.msra.mxu2 %v2978_v58  ;;  %s3639_s23 = smov 8   ;;  %s3640_s4 = smov 24  }
  0xc3   :  { %s4475_s26 = sld [smem:[#allocation37_spill]]  ;;  %s3643_s5 = smov [#allocation20]  }
  0xc4   :  { %v421_v44 = vsub.f32 1.0, %v420_v43  ;;  %s4476_s28 = sld [smem:[#allocation38_spill]] }
  0xc5   :  { %s4477_s21 = sld [smem:[#allocation39_spill]] }
  0xc6   :  { %397 = vmatpush.bf16.msra.mxu1 %v2975_v10  ;;  %v422_v45 = vmul.f32 %v3135_v42, %v421_v44  ;;  %511 = vmatpush.bf16.msra.mxu2 %v2977_v60  ;;  %s4481_s1 = sld [smem:[#allocation42_spill]] }
  0xc7   :  { %s4482_s7 = sld [smem:[#allocation41_spill]] }
  0xc8   :  { %v423_v46 = vadd.f32 %v3135_v42, %v422_v45  ;;  %s4483_s20 = sld [smem:[#allocation43_spill]] }
  0xca   :  { %398 = vmatpush.bf16.msra.mxu1 %v2974_v11  ;;  %v3916_v47 = vsel %vm424_vm9, %v3135_v42, %v423_v46 }
  0xce   :  { %399 = vmatpush.bf16.msra.mxu1 %v2973_v12 }
  0xd2   :  { %400 = vmatpush.bf16.msra.mxu1 %v2972_v13 }
  0xd6   :  { %401 = vmatpush.bf16.msra.mxu1 %v2971_v15  ;;  %v3113_v15 = vld [vmem:[%s4472_s17] ss:$0 sm:$0xff]  ;;  %s2704_s17 = sshll.u32 %s3801_s13, 4  ;;  %s2705_s17 = int_to_ptr.hbm [resolvable:$true] %s2704_s17 }
 0x12b   :  { %v299_v18 = vpop.permute.xlu1 %298  ;;  %v286_v19 = vpop.permute.xlu0 %285 }
 0x12c   :  { %vm303_vm2 = vcmp.eq.s32.totalorder %v299_v18, %v3903_v20  ;;  %vm290_vm3 = vcmp.eq.s32.totalorder %v286_v19, %v3903_v20 }
 0x12d   :  { %v2774_v24 = vsel %vm303_vm2, 1.0, %v3627_v23  ;;  %v2772_v25 = vsel %vm290_vm3, 1.0, %v3627_v23  ;;  %vm632_vm2 = vcmask 1043456  }
 0x133   :  { %v302_v21 = vpop.permute.xlu1 %301  ;;  %v289_v22 = vpop.permute.xlu0 %288 }
 0x134   :  { %vm304_vm4 = vcmp.eq.s32.totalorder %v302_v21, %v3903_v20  ;;  %vm291_vm5 = vcmp.eq.s32.totalorder %v289_v22, %v3903_v20  ;;  %v3114_v22 = vld [vmem:[#allocation5] ss:$0 sm:$0xff] }
 0x135   :  { %v2775_v26 = vsel %vm304_vm4, 1.0, %v3627_v23  ;;  %v2773_v27 = vsel %vm291_vm5, 1.0, %v3627_v23 }
 0x136   :  { %v309_v28 = vpack.c.bf16 %v2775_v26, %v2774_v24  ;;  %v296_v29 = vpack.c.bf16 %v2773_v27, %v2772_v25 }
 0x138   :  { %2776 = vmatmul.msk.bf16.vlgmr.msra.gmra.mxu0 %vm324_vm6, %v309_v28  ;;  %2801 = vmatmul.msk.bf16.vlgmr.msra.gmra.mxu1 %vm386_vm7, %v296_v29  ;;  %v3115_v28 = vld [vmem:[#allocation7] ss:$0 sm:$0xff] }
 0x1b5   :  { %v341_v30 = vpop.f32.mrf.mxu0  ;;  %v403_v31 = vpop.f32.mrf.mxu1 }
 0x1b6   :  { %v404_v33 = vadd.f32 %v403_v31, %v341_v30 }
 0x1b8   :  { %v408_v34 = vadd.f32 %v404_v33, %v346_v32 }
 0x1ba   :  { %v413_v35 = vsel %vm412_vm8, %v408_v34, 0.0 }
 0x1bb   :  { %414 = vadd.xlane.f32.xlu2 %v413_v35 }
 0x1bd   :  { %v343_v36 = vpop.f32.mrf.mxu0  ;;  %v405_v37 = vpop.f32.mrf.mxu1 }
 0x1be   :  { %v406_v38 = vadd.f32 %v405_v37, %v343_v36 }
 0x1c0   :  { %v409_v39 = vadd.f32 %v406_v38, %v346_v32 }
 0x1c2   :  { %v416_v40 = vsel %vm412_vm8, %v409_v39, 0.0 }
 0x1c3   :  { %417 = vadd.xlane.f32.xlu2 %v416_v40 }
 0x22e   :  { %v415_v48 = vpop.xlane.xlu2 %414 }
 0x22f   :  { %v426_v49 = vmul.f32 %v3916_v47, %v415_v48 }
 0x231   :  { %v428_v50 = vsub.f32 %v408_v34, %v426_v49 }
 0x233   :  { %v430_v51 = vmul.f32 %v428_v50, %v428_v50 }
 0x235   :  { %v432_v52 = vsel %vm412_vm8, %v430_v51, 0.0 }
 0x236   :  { %433 = vadd.xlane.f32.xlu0 %v432_v52  ;;  %v418_v53 = vpop.xlane.xlu2 %417 }
 0x237   :  { %v427_v54 = vmul.f32 %v3916_v47, %v418_v53 }
 0x239   :  { %v429_v55 = vsub.f32 %v409_v39, %v427_v54  ;;  %v474_v54 = vld [vmem:[%s4473_s22] sm:$0x3] }
 0x23b   :  { %v431_v56 = vmul.f32 %v429_v55, %v429_v55 }
 0x23d   :  { %v435_v57 = vsel %vm412_vm8, %v431_v56, 0.0 }
 0x23e   :  { %436 = vadd.xlane.f32.xlu1 %v435_v57 }
 0x2a9   :  { %v434_v59 = vpop.xlane.xlu0 %433 }
 0x2aa   :  { %v438_v61 = vmul.f32 %v434_v59, %v3916_v47 }
 0x2ac   :  { %v440_v62 = vadd.f32 1e-12, %v438_v61 }
 0x2ae   :  { %3136 = vrsqrt.f32 %v440_v62  ;;  %vm448_vm11 = vweird.f32 %v440_v62 }
 0x2b1   :  { %v437_v63 = vpop.xlane.xlu1 %436 }
 0x2b2   :  { %v439_v0 = vmul.f32 %v437_v63, %v3916_v47 }
 0x2b4   :  { %v3137_v1 = vpop.eup %3136  ;;  %v441_v2 = vadd.f32 1e-12, %v439_v0 }
 0x2b5   :  { %v443_v3 = vmul.f32 %v3137_v1, %v440_v62  ;;  %vm449_vm10 = vweird.f32 %v3137_v1 }
 0x2b6   :  { %3138 = vrsqrt.f32 %v441_v2  ;;  %vm450_vm12 = vmor %vm448_vm11, %vm449_vm10  ;;  %vm458_vm14 = vweird.f32 %v441_v2 }
 0x2b7   :  { %v444_v4 = vmul.f32 %v3137_v1, %v443_v3 }
 0x2b9   :  { %v445_v5 = vmul.f32 0.5, %v444_v4 }
 0x2bb   :  { %v446_v6 = vsub.f32 1.5, %v445_v5 }
 0x2bc   :  { %v3139_v7 = vpop.eup %3138 }
 0x2bd   :  { %v447_v8 = vmul.f32 %v3137_v1, %v446_v6  ;;  %v453_v9 = vmul.f32 %v3139_v7, %v441_v2  ;;  %vm459_vm13 = vweird.f32 %v3139_v7 }
 0x2be   :  { %vm460_vm15 = vmor %vm458_vm14, %vm459_vm13 }
 0x2bf   :  { %v454_v10 = vmul.f32 %v3139_v7, %v453_v9  ;;  %v451_v11 = vsel %vm450_vm12, %v3137_v1, %v447_v8 }
 0x2c0   :  { %v462_v14 = vmul.f32 %v451_v11, %v428_v50 }
 0x2c1   :  { %v455_v12 = vmul.f32 0.5, %v454_v10 }
 0x2c2   :  { %v467_v21 = vmul.f32 %v3113_v15, %v462_v14 }
 0x2c3   :  { %v456_v13 = vsub.f32 1.5, %v455_v12 }
 0x2c4   :  { %v3927_v25 = vadd.f32 %v3114_v22, %v467_v21 }
 0x2c5   :  { %v457_v16 = vmul.f32 %v3139_v7, %v456_v13 }
 0x2c7   :  { %v461_v18 = vsel %vm460_vm15, %v3139_v7, %v457_v16 }
 0x2c8   :  { %v463_v19 = vmul.f32 %v461_v18, %v429_v55  ;;  %v475_v55 = vcvt.s32.f32 %v474_v54 }
 0x2ca   :  { %v468_v24 = vmul.f32 %v3113_v15, %v463_v19  ;;  %v476_v56 = vsub.f32 1.0, %v475_v55 }
 0x2cc   :  { %v3929_v26 = vadd.f32 %v3114_v22, %v468_v24  ;;  %v477_v57 = vmul.f32 -1e+09, %v476_v56 }
 0x2ce   :  { %v480_v27 = vpack.c.bf16 %v3929_v26, %v3927_v25  ;;  %v3959_v58 = vperm.slane %v477_v57, 0  ;;  %v479_v10 = vrot.slane %v477_v57, 1 }
 0x2d0   :  { %2810 = vmatmul.msk.bf16.vlgmr.msra.gmra.mxu2 %vm412_vm8, %v480_v27  ;;  %v3975_v11 = vperm.slane %v479_v10, 0 }
 0x353   :  { %v513_v29 = vpop.f32.mrf.mxu2 }
 0x354   :  { %v514_v30 = vadd.f32 %v3115_v28, %v513_v29 }
 0x356   :  { %v522_v31 = vpack.c.bf16 %v514_v30, %v514_v30  ;;  %v518_v45 = vmul.f32 0.35355338, %v514_v30 }
 0x358   :  { %v529_v32 = vunpack.c.l.b16 %v522_v31  ;;  %v520_v46 = vpack.c.bf16 %v518_v45, %v518_v45 }
 0x35a   :  { %v3934_v33 = vpack.c.b16 %v529_v32, %v529_v32  ;;  %v671_v1 = vunpack.c.l.b16 %v520_v46 }
 0x35b   :  { %v515_v34 = vpop.f32.mrf.mxu2 }
 0x35c   :  { %v516_v35 = vadd.f32 %v3115_v28, %v515_v34  ;;  %627 = vrot.lane.b32.xlu0 %v3934_v33, %s3624_s24  ;;  %531 = vrot.lane.b32.xlu2 %v3934_v33, %s3629_s25  ;;  %v672_v2 = vpack.c.b16 %v671_v1, %v671_v1 }
 0x35e   :  { %v523_v36 = vpack.c.bf16 %v516_v35, %v516_v35  ;;  %v519_v39 = vmul.f32 0.35355338, %v516_v35 }
 0x360   :  { %v554_v37 = vunpack.c.l.b16 %v523_v36  ;;  %v521_v40 = vpack.c.bf16 %v519_v39, %v519_v39 }
 0x362   :  { %v3940_v38 = vpack.c.b16 %v554_v37, %v554_v37  ;;  %v697_v41 = vunpack.c.l.b16 %v521_v40 }
 0x364   :  { %556 = vrot.lane.b32.xlu1 %v3940_v38, %s3629_s25  ;;  %v698_v42 = vpack.c.b16 %v697_v41, %v697_v41 }
 0x36c   :  { %701 = vrot.lane.b32.xlu1 %v3940_v38, %s3630_s3 }
 0x374   :  { %699 = vrot.lane.b32.xlu1 %v698_v42, %s3631_s15 }
 0x37c   :  { %839 = vrot.lane.b32.xlu1 %v3940_v38, %s3632_s10 }
 0x384   :  { %954 = vrot.lane.b32.xlu1 %v3934_v33, %s3633_s2 }
 0x38c   :  { %975 = vrot.lane.b32.xlu1 %v698_v42, %s3634_s18 }
 0x3b6   :  { %v532_v43 = vpop.permute.xlu2 %531 }
 0x3b7   :  { %v538_v44 = vsel %vm533_vm1, %v532_v43, 0 }
 0x3b8   :  { %547 = vmatpush.bf16.xpose.msra.mxu3 %v538_v44 }
 0x3bf   :  { %2811 = vmatmul.msk.bf16.vlgmr.msra.gmra.mxu3 %vm533_vm1, %v520_v46 }
 0x3ce   :  { %v628_v48 = vpop.permute.xlu0 %627 }
 0x3cf   :  { %v634_v49 = vsel %vm632_vm2, %v628_v48, 0 }
 0x3d0   :  { %643 = vmatpush.bf16.msrb.mxu2 %v634_v49 }
 0x3d6   :  { %v557_v50 = vpop.permute.xlu1 %556 }
 0x3d7   :  { %v562_v51 = vsel %vm533_vm1, %v557_v50, 0 }
 0x3d8   :  { %571 = vmatpush.bf16.xpose.msrb.mxu0 %v562_v51 }
 0x3de   :  { %v702_v52 = vpop.permute.xlu1 %701 }
 0x3df   :  { %v707_v53 = vsel %vm533_vm1, %v702_v52, 0  ;;  %2812 = vmatmul.msk.bf16.vlgmr.msrb.gmra.mxu0 %vm533_vm1, %v521_v40 }
 0x3e0   :  { %716 = vmatpush.bf16.xpose.msra.mxu2 %v707_v53 }
 0x3e6   :  { %v700_v15 = vpop.permute.xlu1 %699 }
 0x3ee   :  { %v840_v29 = vpop.permute.xlu1 %839 }
 0x3ef   :  { %v845_v36 = vsel %vm533_vm1, %v840_v29, 0 }
 0x3f6   :  { %v955_v37 = vpop.permute.xlu1 %954 }
 0x3f7   :  { %v960_v41 = vsel %vm533_vm1, %v955_v37, 0 }
 0x3fe   :  { %v976_v48 = vpop.permute.xlu1 %975 }
 0x442   :  { %v549_v59 = vpop.f32.mrf.mxu3 }
 0x443   :  { %v550_v60 = vadd.f32 %v549_v59, %v3959_v58 }
 0x445   :  { %v577_v61 = vsel %vm533_vm1, %v550_v60, -inf }
 0x446   :  { %578 = vmax.xlane.f32.xlu2 %v577_v61 }
 0x44a   :  { %v551_v62 = vpop.f32.mrf.mxu3 }
 0x45c   :  { %v573_v63 = vpop.f32.mrf.mxu0 }
 0x45d   :  { %v574_v12 = vadd.f32 %v573_v63, %v3975_v11 }
 0x45e   :  { %675 = vrot.lane.b32.xlu2 %v3934_v33, %s3630_s3 }
 0x45f   :  { %v580_v13 = vsel %vm533_vm1, %v574_v12, -inf }
 0x464   :  { %v575_v0 = vpop.f32.mrf.mxu0 }
 0x466   :  { %837 = vrot.lane.b32.xlu2 %v698_v42, %s3635_s12 }
 0x46e   :  { %952 = vrot.lane.b32.xlu2 %v672_v2, %s3634_s18 }
 0x4b9   :  { %v579_v3 = vpop.xlane.xlu2 %578 }
 0x4ba   :  { %v583_v4 = vsub.f32 %v550_v60, %v579_v3 }
 0x4bc   :  { %v585_v5 = vmul.f32 1.442695, %v583_v4 }
 0x4be   :  { %3140 = vpow2.f32 %v585_v5 }
 0x4c1   :  { %v676_v6 = vpop.permute.xlu2 %675 }
 0x4c2   :  { %v681_v7 = vsel %vm533_vm1, %v676_v6, 0 }
 0x4c3   :  { %690 = vmatpush.bf16.xpose.msra.mxu0 %v681_v7 }
 0x4c4   :  { %v3141_v8 = vpop.eup %3140 }
 0x4c5   :  { %v589_v9 = vsel %vm533_vm1, %v3141_v8, 0.0 }
 0x4c6   :  { %590 = vadd.xlane.f32.xlu0 %v589_v9 }
 0x4c9   :  { %v838_v43 = vpop.permute.xlu2 %837 }
 0x4d1   :  { %v953_v46 = vpop.permute.xlu2 %952 }
 0x4da   :  { %673 = vrot.lane.b32.xlu0 %v672_v2, %s3631_s15 }
 0x4e2   :  { %816 = vrot.lane.b32.xlu0 %v3934_v33, %s3632_s10 }
 0x4ea   :  { %814 = vrot.lane.b32.xlu0 %v672_v2, %s3635_s12 }
 0x4f2   :  { %977 = vrot.lane.b32.xlu0 %v3940_v38, %s3633_s2 }
 0x51c   :  { %581 = vmax.xlane.f32.xlu0 %v580_v13 }
 0x539   :  { %v591_v14 = vpop.xlane.xlu0 %590 }
 0x53a   :  { %3142 = vrcp.f32 %v591_v14  ;;  %v606_v21 = vand.u32 2147483648, %v591_v14  ;;  %v604_v24 = vand.u32 2147483647, %v591_v14  ;;  %vm600_vm4 = vweird.f32 %v591_v14 }
 0x53c   :  { %v607_v28 = vor.u32 1.1754944e-38, %v606_v21  ;;  %vm605_vm6 = vcmp.eq.f32.partialorder %v604_v24, 8.507059e+37 }
 0x540   :  { %v3143_v16 = vpop.eup %3142 }
 0x541   :  { %v596_v18 = vmul.f32 %v3143_v16, %v591_v14  ;;  %vm601_vm3 = vweird.f32 %v3143_v16 }
 0x542   :  { %vm602_vm5 = vmor %vm600_vm4, %vm601_vm3 }
 0x543   :  { %v597_v19 = vsub.f32 1.0, %v596_v18 }
 0x545   :  { %v598_v22 = vmul.f32 %v3143_v16, %v597_v19 }
 0x547   :  { %v599_v27 = vadd.f32 %v3143_v16, %v598_v22 }
 0x549   :  { %v603_v30 = vsel %vm602_vm5, %v3143_v16, %v599_v27 }
 0x54a   :  { %v608_v31 = vsel %vm605_vm6, %v607_v28, %v603_v30 }
 0x54b   :  { %v609_v32 = vmul.f32 %v3141_v8, %v608_v31 }
 0x54c   :  { %v674_v34 = vpop.permute.xlu0 %673 }
 0x54d   :  { %2815 = vmatmul.msk.bf16.vlgmr.msra.gmra.mxu0 %vm533_vm1, %v674_v34  ;;  %v625_v35 = vpack.c.bf16 %v609_v32, %v609_v32 }
 0x54f   :  { %2813 = vmatmul.msk.bf16.vlgmr.msrb.gmra.mxu2 %vm533_vm1, %v625_v35 }
 0x550   :  { %854 = vmatpush.bf16.xpose.msrb.mxu2 %v845_v36 }
 0x554   :  { %v817_v39 = vpop.permute.xlu0 %816 }
 0x555   :  { %v822_v40 = vsel %vm533_vm1, %v817_v39, 0 }
 0x556   :  { %831 = vmatpush.bf16.xpose.msrb.mxu0 %v822_v40 }
 0x55c   :  { %v815_v42 = vpop.permute.xlu0 %814 }
 0x55d   :  { %2819 = vmatmul.msk.bf16.vlgmr.msrb.gmra.mxu0 %vm533_vm1, %v815_v42 }
 0x55e   :  { %969 = vmatpush.bf16.xpose.msra.mxu0 %v960_v41 }
 0x55f   :  { %2816 = vmatmul.msk.bf16.vlgmr.msra.gmra.mxu2 %vm533_vm1, %v700_v15 }
 0x564   :  { %v978_v44 = vpop.permute.xlu0 %977 }
 0x565   :  { %v983_v45 = vsel %vm533_vm1, %v978_v44, 0 }
 0x566   :  { %992 = vmatpush.bf16.xpose.msra.mxu2 %v983_v45 }
 0x56d   :  { %2823 = vmatmul.msk.bf16.vlgmr.msra.gmra.mxu0 %vm533_vm1, %v953_v46 }
 0x56f   :  { %2820 = vmatmul.msk.bf16.vlgmr.msrb.gmra.mxu2 %vm533_vm1, %v838_v43 }
 0x57f   :  { %2824 = vmatmul.msk.bf16.vlgmr.msra.gmra.mxu2 %vm533_vm1, %v976_v48 }
 0x58f   :  { %v582_v52 = vpop.xlane.xlu0 %581 }
 0x590   :  { %v584_v55 = vsub.f32 %v574_v12, %v582_v52 }
 0x592   :  { %v587_v56 = vmul.f32 1.442695, %v584_v55 }
 0x594   :  { %3144 = vpow2.f32 %v587_v56 }
 0x59a   :  { %v3996_v62 = vpop.eup %3144 }
 0x59b   :  { %v592_v3 = vsel %vm533_vm1, %v3996_v62, 0.0 }
 0x5ca   :  { %v692_v49 = vpop.f32.mrf.mxu0 }
 0x5cb   :  { %v693_v50 = vadd.f32 %v692_v49, %v3959_v58 }
 0x5cd   :  { %v722_v51 = vsel %vm533_vm1, %v693_v50, -inf }
 0x5ce   :  { %723 = vmax.xlane.f32.xlu2 %v722_v51 }
 0x5d2   :  { %v3992_v53 = vpop.f32.mrf.mxu2  ;;  %v694_v54 = vpop.f32.mrf.mxu0 }
 0x5da   :  { %v647_v57 = vpop.f32.mrf.mxu2  ;;  %v833_v59 = vpop.f32.mrf.mxu0 }
 0x5db   :  { %v834_v60 = vadd.f32 %v833_v59, %v3959_v58 }
 0x5dd   :  { %v860_v61 = vsel %vm533_vm1, %v834_v60, -inf }
 0x5de   :  { %861 = vmax.xlane.f32.xlu0 %v860_v61 }
 0x5e2   :  { %v718_v63 = vpop.f32.mrf.mxu2  ;;  %v835_v0 = vpop.f32.mrf.mxu0 }
 0x5e3   :  { %v719_v1 = vadd.f32 %v718_v63, %v3975_v11 }
 0x5e5   :  { %v725_v2 = vsel %vm533_vm1, %v719_v1, -inf }
 0x5e6   :  { %726 = vmax.xlane.f32.xlu1 %v725_v2  ;;  %593 = vadd.xlane.f32.xlu0 %v592_v3 }
 0x5ea   :  { %v720_v4 = vpop.f32.mrf.mxu2  ;;  %v971_v5 = vpop.f32.mrf.mxu0 }
 0x5eb   :  { %v972_v6 = vadd.f32 %v971_v5, %v3959_v58 }
 0x5ed   :  { %v998_v7 = vsel %vm533_vm1, %v972_v6, -inf }
 0x5ee   :  { %999 = vmax.xlane.f32.xlu1 %v998_v7 }
 0x5f2   :  { %v856_v8 = vpop.f32.mrf.mxu2  ;;  %v973_v9 = vpop.f32.mrf.mxu0 }
 0x5f3   :  { %v857_v10 = vadd.f32 %v856_v8, %v3975_v11 }
 0x5f5   :  { %v863_v12 = vsel %vm533_vm1, %v857_v10, -inf }
 0x5f6   :  { %864 = vmax.xlane.f32.xlu2 %v863_v12 }
 0x5fa   :  { %649 = vrot.lane.b32.xlu0 %v3940_v38, %s3624_s24  ;;  %v858_v13 = vpop.f32.mrf.mxu2 }
 0x602   :  { %793 = vrot.lane.b32.xlu0 %v3940_v38, %s3636_s30  ;;  %v994_v14 = vpop.f32.mrf.mxu2 }
 0x603   :  { %v4011_v15 = vadd.f32 %v994_v14, %v3975_v11 }
 0x605   :  { %v1001_v16 = vsel %vm533_vm1, %v4011_v15, -inf }
 0x606   :  { %1002 = vmax.xlane.f32.xlu2 %v1001_v16 }
 0x60a   :  { %910 = vrot.lane.b32.xlu0 %v3934_v33, %s3637_s6  ;;  %v996_v18 = vpop.f32.mrf.mxu2 }
 0x612   :  { %1048 = vrot.lane.b32.xlu0 %v3934_v33, %s3638_s16 }
 0x61e   :  { %772 = vrot.lane.b32.xlu2 %v3934_v33, %s3636_s30 }
 0x641   :  { %v724_v19 = vpop.xlane.xlu2 %723 }
 0x642   :  { %v728_v21 = vsub.f32 %v693_v50, %v724_v19 }
 0x644   :  { %v730_v22 = vmul.f32 1.442695, %v728_v21 }
 0x646   :  { %3146 = vpow2.f32 %v730_v22 }
 0x64c   :  { %v4021_v24 = vpop.eup %3146 }
 0x64d   :  { %v734_v27 = vsel %vm533_vm1, %v4021_v24, 0.0 }
 0x64e   :  { %735 = vadd.xlane.f32.xlu1 %v734_v27 }
 0x651   :  { %v862_v28 = vpop.xlane.xlu0 %861 }
 0x652   :  { %v866_v29 = vsub.f32 %v834_v60, %v862_v28 }
 0x654   :  { %v868_v30 = vmul.f32 1.442695, %v866_v29 }
 0x656   :  { %3148 = vpow2.f32 %v868_v30 }
 0x659   :  { %v727_v31 = vpop.xlane.xlu1 %726  ;;  %v594_v32 = vpop.xlane.xlu0 %593 }
 0x65a   :  { %v729_v34 = vsub.f32 %v719_v1, %v727_v31  ;;  %3150 = vrcp.f32 %v594_v32  ;;  %v621_v44 = vand.u32 2147483648, %v594_v32  ;;  %v619_v48 = vand.u32 2147483647, %v594_v32 }
 0x65b   :  { %vm615_vm9 = vweird.f32 %v594_v32 }
 0x65c   :  { %v4025_v35 = vpop.eup %3148  ;;  %v732_v33 = vmul.f32 1.442695, %v729_v34  ;;  %v622_v51 = vor.u32 1.1754944e-38, %v621_v44  ;;  %vm620_vm11 = vcmp.eq.f32.partialorder %v619_v48, 8.507059e+37 }
 0x65d   :  { %v872_v36 = vsel %vm533_vm1, %v4025_v35, 0.0 }
 0x65e   :  { %3152 = vpow2.f32 %v732_v33  ;;  %873 = vadd.xlane.f32.xlu1 %v872_v36 }
 0x660   :  { %v3151_v37 = vpop.eup %3150 }
 0x661   :  { %v611_v39 = vmul.f32 %v3151_v37, %v594_v32  ;;  %v1000_v40 = vpop.xlane.xlu1 %999  ;;  %vm616_vm7 = vweird.f32 %v3151_v37 }
 0x662   :  { %v1004_v41 = vsub.f32 %v972_v6, %v1000_v40  ;;  %vm617_vm10 = vmor %vm615_vm9, %vm616_vm7 }
 0x663   :  { %v612_v42 = vsub.f32 1.0, %v611_v39 }
 0x664   :  { %v4029_v43 = vpop.eup %3152  ;;  %v1006_v45 = vmul.f32 1.442695, %v1004_v41 }
 0x665   :  { %v613_v46 = vmul.f32 %v3151_v37, %v612_v42  ;;  %v737_v49 = vsel %vm533_vm1, %v4029_v43, 0.0 }
 0x666   :  { %3154 = vpow2.f32 %v1006_v45  ;;  %738 = vadd.xlane.f32.xlu2 %v737_v49 }
 0x667   :  { %v614_v50 = vadd.f32 %v3151_v37, %v613_v46 }
 0x669   :  { %v865_v52 = vpop.xlane.xlu2 %864  ;;  %v618_v54 = vsel %vm617_vm10, %v3151_v37, %v614_v50 }
 0x66a   :  { %v867_v55 = vsub.f32 %v857_v10, %v865_v52  ;;  %v623_v56 = vsel %vm620_vm11, %v622_v51, %v618_v54 }
 0x66b   :  { %v624_v57 = vmul.f32 %v3996_v62, %v623_v56 }
 0x66c   :  { %v4034_v59 = vpop.eup %3154  ;;  %v870_v60 = vmul.f32 1.442695, %v867_v55  ;;  %v650_v61 = vpop.permute.xlu0 %649 }
 0x66d   :  { %v655_v63 = vsel %vm632_vm2, %v650_v61, 0  ;;  %v1010_v0 = vsel %vm533_vm1, %v4034_v59, 0.0  ;;  %v626_v1 = vpack.c.bf16 %v624_v57, %v624_v57 }
 0x66e   :  { %3156 = vpow2.f32 %v870_v60  ;;  %664 = vmatpush.bf16.msrb.mxu3 %v655_v63  ;;  %1011 = vadd.xlane.f32.xlu1 %v1010_v0 }
 0x671   :  { %2814 = vmatmul.msk.bf16.vlgmr.msrb.gmra.mxu3 %vm533_vm1, %v626_v1 }
 0x674   :  { %v4040_v2 = vpop.eup %3156  ;;  %v794_v3 = vpop.permute.xlu0 %793 }
 0x675   :  { %v799_v62 = vsel %vm632_vm2, %v794_v3, 0  ;;  %v875_v4 = vsel %vm533_vm1, %v4040_v2, 0.0 }
 0x676   :  { %808 = vmatpush.bf16.msrb.mxu1 %v799_v62  ;;  %876 = vadd.xlane.f32.xlu1 %v875_v4 }
 0x679   :  { %v1003_v5 = vpop.xlane.xlu2 %1002 }
 0x67a   :  { %v1005_v6 = vsub.f32 %v4011_v15, %v1003_v5 }
 0x67c   :  { %v1008_v7 = vmul.f32 1.442695, %v1005_v6  ;;  %v911_v8 = vpop.permute.xlu0 %910 }
 0x67d   :  { %v916_v12 = vsel %vm632_vm2, %v911_v8, 0 }
 0x67e   :  { %3158 = vpow2.f32 %v1008_v7  ;;  %931 = vrot.lane.b32.xlu2 %v3940_v38, %s3637_s6 }
 0x681   :  { %v773_v9 = vpop.permute.xlu2 %772 }
 0x682   :  { %v778_v10 = vsel %vm632_vm2, %v773_v9, 0 }
 0x683   :  { %787 = vmatpush.bf16.msra.mxu3 %v778_v10 }
 0x684   :  { %v4050_v13 = vpop.eup %3158  ;;  %v1049_v34 = vpop.permute.xlu0 %1048 }
 0x685   :  { %v1013_v14 = vsel %vm533_vm1, %v4050_v13, 0.0  ;;  %v1054_v36 = vsel %vm632_vm2, %v1049_v34, 0 }
 0x686   :  { %1014 = vadd.xlane.f32.xlu1 %v1013_v14 }
 0x687   :  { %925 = vmatpush.bf16.msrb.mxu3 %v916_v12 }
 0x69f   :  { %1069 = vrot.lane.b32.xlu1 %v3940_v38, %s3638_s16 }
 0x6c1   :  { %v736_v15 = vpop.xlane.xlu1 %735 }
 0x6c2   :  { %3160 = vrcp.f32 %v736_v15  ;;  %v751_v21 = vand.u32 2147483648, %v736_v15  ;;  %v749_v27 = vand.u32 2147483647, %v736_v15  ;;  %vm745_vm13 = vweird.f32 %v736_v15 }
 0x6c4   :  { %v752_v29 = vor.u32 1.1754944e-38, %v751_v21  ;;  %vm750_vm15 = vcmp.eq.f32.partialorder %v749_v27, 8.507059e+37 }
 0x6c8   :  { %v3161_v16 = vpop.eup %3160 }
 0x6c9   :  { %v741_v18 = vmul.f32 %v3161_v16, %v736_v15  ;;  %vm746_vm12 = vweird.f32 %v3161_v16 }
 0x6ca   :  { %vm747_vm14 = vmor %vm745_vm13, %vm746_vm12 }
 0x6cb   :  { %v742_v19 = vsub.f32 1.0, %v741_v18 }
 0x6cd   :  { %v743_v22 = vmul.f32 %v3161_v16, %v742_v19 }
 0x6cf   :  { %v744_v28 = vadd.f32 %v3161_v16, %v743_v22 }
 0x6d1   :  { %v748_v30 = vsel %vm747_vm14, %v3161_v16, %v744_v28  ;;  %v874_v31 = vpop.xlane.xlu1 %873 }
 0x6d2   :  { %v753_v32 = vsel %vm750_vm15, %v752_v29, %v748_v30  ;;  %3162 = vrcp.f32 %v874_v31  ;;  %v889_v42 = vand.u32 2147483648, %v874_v31  ;;  %v887_v45 = vand.u32 2147483647, %v874_v31 }
 0x6d3   :  { %v754_v38 = vmul.f32 %v4021_v24, %v753_v32  ;;  %vm883_vm4 = vweird.f32 %v874_v31 }
 0x6d4   :  { %v890_v24 = vor.u32 1.1754944e-38, %v889_v42  ;;  %vm888_vm6 = vcmp.eq.f32.partialorder %v887_v45, 8.507059e+37 }
 0x6d5   :  { %v770_v33 = vpack.c.bf16 %v754_v38, %v754_v38 }
 0x6d7   :  { %2817 = vmatmul.msk.bf16.vlgmr.msra.gmra.mxu3 %vm533_vm1, %v770_v33 }
 0x6d8   :  { %v3163_v37 = vpop.eup %3162  ;;  %1063 = vmatpush.bf16.msra.mxu3 %v1054_v36 }
 0x6d9   :  { %v879_v39 = vmul.f32 %v3163_v37, %v874_v31  ;;  %v739_v40 = vpop.xlane.xlu2 %738  ;;  %vm884_vm3 = vweird.f32 %v3163_v37 }
 0x6da   :  { %3164 = vrcp.f32 %v739_v40  ;;  %vm885_vm5 = vmor %vm883_vm4, %vm884_vm3  ;;  %v766_v61 = vand.u32 2147483648, %v739_v40  ;;  %v764_v0 = vand.u32 2147483647, %v739_v40  ;;  %vm760_vm9 = vweird.f32 %v739_v40 }
 0x6db   :  { %v880_v41 = vsub.f32 1.0, %v879_v39 }
 0x6dc   :  { %v767_v62 = vor.u32 1.1754944e-38, %v766_v61  ;;  %vm765_vm11 = vcmp.eq.f32.partialorder %v764_v0, 8.507059e+37 }
 0x6dd   :  { %v881_v44 = vmul.f32 %v3163_v37, %v880_v41 }
 0x6df   :  { %v882_v46 = vadd.f32 %v3163_v37, %v881_v44 }
 0x6e0   :  { %v3165_v48 = vpop.eup %3164 }
 0x6e1   :  { %v886_v49 = vsel %vm885_vm5, %v3163_v37, %v882_v46  ;;  %v756_v50 = vmul.f32 %v3165_v48, %v739_v40  ;;  %v1012_v51 = vpop.xlane.xlu1 %1011  ;;  %v932_v52 = vpop.permute.xlu2 %931  ;;  %vm761_vm7 = vweird.f32 %v3165_v48 }
 0x6e2   :  { %v891_v54 = vsel %vm888_vm6, %v890_v24, %v886_v49  ;;  %3166 = vrcp.f32 %v1012_v51  ;;  %v937_v57 = vsel %vm632_vm2, %v932_v52, 0  ;;  %vm762_vm10 = vmor %vm760_vm9, %vm761_vm7  ;;  %v1027_v8 = vand.u32 2147483648, %v1012_v51 }
 0x6e3   :  { %v892_v55 = vmul.f32 %v4025_v35, %v891_v54  ;;  %v757_v56 = vsub.f32 1.0, %v756_v50  ;;  %946 = vmatpush.bf16.msra.mxu1 %v937_v57  ;;  %v1025_v12 = vand.u32 2147483647, %v1012_v51  ;;  %vm1021_vm13 = vweird.f32 %v1012_v51 }
 0x6e4   :  { %v1028_v18 = vor.u32 1.1754944e-38, %v1027_v8  ;;  %v2980_v8 = vld [vmem:[%s4474_s0 + $0x8] sm:$0xff] }
 0x6e5   :  { %v758_v60 = vmul.f32 %v3165_v48, %v757_v56  ;;  %v908_v63 = vpack.c.bf16 %v892_v55, %v892_v55  ;;  %vm1026_vm15 = vcmp.eq.f32.partialorder %v1025_v12, 8.507059e+37  ;;  %1152 = vmatpush.bf16.msrb.mxu0 %v2980_v8 }
 0x6e7   :  { %v759_v1 = vadd.f32 %v3165_v48, %v758_v60  ;;  %2821 = vmatmul.msk.bf16.vlgmr.msrb.gmra.mxu3 %vm533_vm1, %v908_v63 }
 0x6e8   :  { %v3167_v3 = vpop.eup %3166 }
 0x6e9   :  { %v1017_v4 = vmul.f32 %v3167_v3, %v1012_v51  ;;  %v877_v5 = vpop.xlane.xlu1 %876  ;;  %v763_v6 = vsel %vm762_vm10, %v3165_v48, %v759_v1  ;;  %vm1022_vm12 = vweird.f32 %v3167_v3 }
 0x6ea   :  { %3168 = vrcp.f32 %v877_v5  ;;  %v768_v7 = vsel %vm765_vm11, %v767_v62, %v763_v6  ;;  %vm1023_vm14 = vmor %vm1021_vm13, %vm1022_vm12  ;;  %v904_v29 = vand.u32 2147483648, %v877_v5  ;;  %v902_v31 = vand.u32 2147483647, %v877_v5 }
 0x6eb   :  { %v1018_v35 = vsub.f32 1.0, %v1017_v4  ;;  %v769_v9 = vmul.f32 %v4029_v43, %v768_v7  ;;  %vm898_vm4 = vweird.f32 %v877_v5  ;;  %vm1116_vm12 = vcmask 130048  }
 0x6ec   :  { %v905_v34 = vor.u32 1.1754944e-38, %v904_v29  ;;  %vm903_vm6 = vcmp.eq.f32.partialorder %v902_v31, 8.507059e+37  ;;  %vm1119_vm13 = vcmask 195584  }
 0x6ed   :  { %v1019_v10 = vmul.f32 %v3167_v3, %v1018_v35  ;;  %v771_v14 = vpack.c.bf16 %v769_v9, %v769_v9  ;;  %v2979_v9 = vld [vmem:[%s4474_s0] sm:$0xff] }
 0x6ee   :  { %1153 = vmatpush.bf16.msrb.mxu0 %v2979_v9 }
 0x6ef   :  { %v1020_v15 = vadd.f32 %v3167_v3, %v1019_v10  ;;  %2818 = vmatmul.msk.bf16.vlgmr.msrb.gmra.mxu1 %vm533_vm1, %v771_v14 }
 0x6f0   :  { %v3169_v16 = vpop.eup %3168 }
 0x6f1   :  { %v1024_v19 = vsel %vm1023_vm14, %v3167_v3, %v1020_v15  ;;  %v894_v21 = vmul.f32 %v3169_v16, %v877_v5  ;;  %vm899_vm3 = vweird.f32 %v3169_v16 }
 0x6f2   :  { %v1029_v22 = vsel %vm1026_vm15, %v1028_v18, %v1024_v19  ;;  %vm900_vm5 = vmor %vm898_vm4, %vm899_vm3 }
 0x6f3   :  { %v1030_v27 = vmul.f32 %v4034_v59, %v1029_v22  ;;  %v895_v28 = vsub.f32 1.0, %v894_v21 }
 0x6f4   :  { %v4065_v43 = vpop.f32.mrf.mxu3 }
 0x6f5   :  { %v896_v30 = vmul.f32 %v3169_v16, %v895_v28  ;;  %v1046_v32 = vpack.c.bf16 %v1030_v27, %v1030_v27 }
 0x6f7   :  { %v897_v38 = vadd.f32 %v3169_v16, %v896_v30  ;;  %2825 = vmatmul.msk.bf16.vlgmr.msra.gmra.mxu3 %vm533_vm1, %v1046_v32 }
 0x6f9   :  { %v901_v33 = vsel %vm900_vm5, %v3169_v16, %v897_v38  ;;  %v1015_v36 = vpop.xlane.xlu1 %1014 }
 0x6fa   :  { %v906_v37 = vsel %vm903_vm6, %v905_v34, %v901_v33  ;;  %3170 = vrcp.f32 %v1015_v36  ;;  %v1042_v48 = vand.u32 2147483648, %v1015_v36  ;;  %vm1036_vm9 = vweird.f32 %v1015_v36  ;;  %v3116_v34 = vld [vmem:[#allocation8] ss:$0 sm:$0xff] }
 0x6fb   :  { %v907_v59 = vmul.f32 %v4040_v2, %v906_v37  ;;  %v1040_v24 = vand.u32 2147483647, %v1015_v36 }
 0x6fc   :  { %v668_v39 = vpop.f32.mrf.mxu3  ;;  %v1043_v50 = vor.u32 1.1754944e-38, %v1042_v48 }
 0x6fd   :  { %v909_v40 = vpack.c.bf16 %v907_v59, %v907_v59  ;;  %vm1041_vm11 = vcmp.eq.f32.partialorder %v1040_v24, 8.507059e+37 }
 0x6ff   :  { %2822 = vmatmul.msk.bf16.vlgmr.msra.gmra.mxu1 %vm533_vm1, %v909_v40 }
 0x700   :  { %v3171_v41 = vpop.eup %3170 }
 0x701   :  { %v1032_v42 = vmul.f32 %v3171_v41, %v1015_v36  ;;  %vm1037_vm7 = vweird.f32 %v3171_v41 }
 0x702   :  { %vm1038_vm10 = vmor %vm1036_vm9, %vm1037_vm7 }
 0x703   :  { %v1033_v44 = vsub.f32 1.0, %v1032_v42 }
 0x705   :  { %v1034_v45 = vmul.f32 %v3171_v41, %v1033_v44 }
 0x707   :  { %v1035_v46 = vadd.f32 %v3171_v41, %v1034_v45 }
 0x709   :  { %v1039_v49 = vsel %vm1038_vm10, %v3171_v41, %v1035_v46 }
 0x70a   :  { %v1044_v51 = vsel %vm1041_vm11, %v1043_v50, %v1039_v49 }
 0x70b   :  { %v1045_v2 = vmul.f32 %v4050_v13, %v1044_v51 }
 0x70d   :  { %v1047_v55 = vpack.c.bf16 %v1045_v2, %v1045_v2 }
 0x711   :  { %v1070_v52 = vpop.permute.xlu1 %1069 }
 0x712   :  { %v1075_v54 = vsel %vm632_vm2, %v1070_v52, 0  ;;  %v2981_v52 = vld [vmem:[%s4475_s26] sm:$0xff] }
 0x713   :  { %1084 = vmatpush.bf16.msrb.mxu1 %v1075_v54 }
 0x716   :  { %2826 = vmatmul.msk.bf16.vlgmr.msrb.gmra.mxu1 %vm533_vm1, %v1047_v55 }
 0x75a   :  { %v789_v56 = vpop.f32.mrf.mxu3 }
 0x762   :  { %v791_v57 = vpop.f32.mrf.mxu3 }
 0x76a   :  { %v927_v60 = vpop.f32.mrf.mxu3 }
 0x76c   :  { %v810_v61 = vpop.f32.mrf.mxu1 }
 0x76d   :  { %v3081_v63 = vpack.i.bf16 %v810_v61, %v789_v56 }
 0x76f   :  { %3082 = vrot.lane.b32.xlu2 %v3081_v63, %s3639_s23 }
 0x772   :  { %v929_v0 = vpop.f32.mrf.mxu3 }
 0x774   :  { %v812_v1 = vpop.f32.mrf.mxu1 }
 0x77a   :  { %v1065_v13 = vpop.f32.mrf.mxu3 }
 0x77c   :  { %v948_v3 = vpop.f32.mrf.mxu1 }
 0x77d   :  { %v3086_v62 = vpack.i.bf16 %v948_v3, %v927_v60 }
 0x77f   :  { %3087 = vrot.lane.b32.xlu0 %v3086_v62, %s3614_s11 }
 0x782   :  { %v1067_v4 = vpop.f32.mrf.mxu3 }
 0x784   :  { %v950_v5 = vpop.f32.mrf.mxu1 }
 0x793   :  { %v1086_v6 = vpop.f32.mrf.mxu1 }
 0x794   :  { %v3091_v35 = vpack.i.bf16 %v1086_v6, %v1065_v13 }
 0x796   :  { %3092 = vrot.lane.b32.xlu2 %v3091_v35, %s3640_s4 }
 0x79b   :  { %v1088_v7 = vpop.f32.mrf.mxu1 }
 0x79c   :  { %v3117_v7 = vld [vmem:[#allocation10] ss:$0 sm:$0xff] }
 0x7c9   :  { %v3083_v10 = vpop.permute.xlu2 %3082 }
 0x7ca   :  { %v3085_v12 = vunpack.i.h.bf16 %v3083_v10  ;;  %v3084_v14 = vunpack.i.l.bf16 %v3083_v10 }
 0x7cc   :  { %v1115_v21 = vsel %vm533_vm1, %v4065_v43, %v3085_v12  ;;  %v1114_v22 = vsel %vm533_vm1, %v3992_v53, %v3084_v14  ;;  %v3118_v12 = vld [vmem:[#allocation11] ss:$0 sm:$0xff] }
 0x7f0   :  { %v3093_v15 = vpop.permute.xlu2 %3092 }
 0x7f1   :  { %v3088_v16 = vpop.permute.xlu0 %3087  ;;  %v3095_v27 = vunpack.i.h.bf16 %v3093_v15  ;;  %v3094_v28 = vunpack.i.l.bf16 %v3093_v15 }
 0x7f2   :  { %v3090_v18 = vunpack.i.h.bf16 %v3088_v16  ;;  %v3089_v19 = vunpack.i.l.bf16 %v3088_v16 }
 0x7f4   :  { %v1117_v29 = vsel %vm1116_vm12, %v1114_v22, %v3089_v19  ;;  %v1118_v30 = vsel %vm1116_vm12, %v1115_v21, %v3090_v18  ;;  %v3119_v22 = vld [vmem:[#allocation13] ss:$0 sm:$0xff] }
 0x7f5   :  { %v1120_v31 = vsel %vm1119_vm13, %v1117_v29, %v3094_v28  ;;  %v1121_v32 = vsel %vm1119_vm13, %v1118_v30, %v3095_v27 }
 0x7f6   :  { %v1122_v38 = vpack.c.bf16 %v1121_v32, %v1120_v31 }
 0x7f8   :  { %2835 = vmatmul.msk.bf16.vlgmr.msrb.gmra.mxu0 %vm412_vm8, %v1122_v38 }
 0x875   :  { %v1155_v33 = vpop.f32.mrf.mxu0 }
 0x876   :  { %v1156_v36 = vadd.f32 %v3116_v34, %v1155_v33 }
 0x878   :  { %v1160_v43 = vadd.f32 %v1156_v36, %v3927_v25 }
 0x87a   :  { %v1164_v53 = vsel %vm412_vm8, %v1160_v43, 0.0 }
 0x87b   :  { %1165 = vadd.xlane.f32.xlu0 %v1164_v53 }
 0x87d   :  { %v1157_v37 = vpop.f32.mrf.mxu0 }
 0x87e   :  { %v1158_v59 = vadd.f32 %v3116_v34, %v1157_v37 }
 0x880   :  { %v1161_v39 = vadd.f32 %v1158_v59, %v3929_v26  ;;  %v2982_v26 = vld [vmem:[%s4475_s26 + $0x8] sm:$0xff] }
 0x881   :  { %1248 = vmatpush.bf16.msrb.mxu2 %v2982_v26  ;;  %v2984_v26 = vld [vmem:[%s4476_s28 + $0x8] sm:$0xff] }
 0x882   :  { %v1167_v40 = vsel %vm412_vm8, %v1161_v39, 0.0 }
 0x883   :  { %1168 = vadd.xlane.f32.xlu2 %v1167_v40 }
 0x885   :  { %1249 = vmatpush.bf16.msrb.mxu2 %v2981_v52 }
 0x8ee   :  { %v1166_v41 = vpop.xlane.xlu0 %1165 }
 0x8ef   :  { %v1170_v42 = vmul.f32 %v1166_v41, %v3916_v47 }
 0x8f1   :  { %v1172_v44 = vsub.f32 %v1160_v43, %v1170_v42 }
 0x8f3   :  { %v1174_v45 = vmul.f32 %v1172_v44, %v1172_v44 }
 0x8f5   :  { %v1176_v46 = vsel %vm412_vm8, %v1174_v45, 0.0  ;;  %v2985_v45 = vld [vmem:[%s4476_s28 + $0x10] sm:$0xff] }
 0x8f6   :  { %v1169_v25 = vpop.xlane.xlu2 %1168  ;;  %1177 = vadd.xlane.f32.xlu1 %v1176_v46 }
 0x8f7   :  { %v1171_v48 = vmul.f32 %v1169_v25, %v3916_v47 }
 0x8f9   :  { %v1173_v24 = vsub.f32 %v1161_v39, %v1171_v48  ;;  %v2986_v39 = vld [vmem:[%s4476_s28 + $0x18] sm:$0xff] }
 0x8fa   :  { %1381 = vmatpush.bf16.msrb.mxu3 %v2986_v39 }
 0x8fb   :  { %v1175_v49 = vmul.f32 %v1173_v24, %v1173_v24 }
 0x8fd   :  { %v1179_v50 = vsel %vm412_vm8, %v1175_v49, 0.0 }
 0x8fe   :  { %1180 = vadd.xlane.f32.xlu0 %v1179_v50  ;;  %1382 = vmatpush.bf16.msrb.mxu3 %v2985_v45 }
 0x902   :  { %1383 = vmatpush.bf16.msrb.mxu3 %v2984_v26 }
 0x969   :  { %v1178_v51 = vpop.xlane.xlu1 %1177 }
 0x96a   :  { %v1182_v2 = vmul.f32 %v1178_v51, %v3916_v47 }
 0x96c   :  { %v1184_v54 = vadd.f32 1e-12, %v1182_v2 }
 0x96e   :  { %3172 = vrsqrt.f32 %v1184_v54  ;;  %vm1192_vm15 = vweird.f32 %v1184_v54 }
 0x971   :  { %v1181_v55 = vpop.xlane.xlu0 %1180 }
 0x972   :  { %v1183_v56 = vmul.f32 %v1181_v55, %v3916_v47 }
 0x974   :  { %v3173_v57 = vpop.eup %3172  ;;  %v1185_v60 = vadd.f32 1e-12, %v1183_v56 }
 0x975   :  { %v1187_v61 = vmul.f32 %v3173_v57, %v1184_v54  ;;  %vm1193_vm14 = vweird.f32 %v3173_v57 }
 0x976   :  { %3174 = vrsqrt.f32 %v1185_v60  ;;  %vm1194_vm3 = vmor %vm1192_vm15, %vm1193_vm14  ;;  %vm1202_vm5 = vweird.f32 %v1185_v60 }
 0x977   :  { %v1188_v63 = vmul.f32 %v3173_v57, %v1187_v61 }
 0x979   :  { %v1189_v0 = vmul.f32 0.5, %v1188_v63 }
 0x97b   :  { %v1190_v1 = vsub.f32 1.5, %v1189_v0 }
 0x97c   :  { %v3175_v13 = vpop.eup %3174 }
 0x97d   :  { %v1191_v3 = vmul.f32 %v3173_v57, %v1190_v1  ;;  %v1197_v62 = vmul.f32 %v3175_v13, %v1185_v60  ;;  %vm1203_vm4 = vweird.f32 %v3175_v13  ;;  %v2983_v60 = vld [vmem:[%s4476_s28] sm:$0xff] }
 0x97e   :  { %vm1204_vm6 = vmor %vm1202_vm5, %vm1203_vm4  ;;  %1384 = vmatpush.bf16.msrb.mxu3 %v2983_v60 }
 0x97f   :  { %v1198_v4 = vmul.f32 %v3175_v13, %v1197_v62  ;;  %v1195_v5 = vsel %vm1194_vm3, %v3173_v57, %v1191_v3 }
 0x980   :  { %v1206_v8 = vmul.f32 %v1195_v5, %v1172_v44 }
 0x981   :  { %v1199_v6 = vmul.f32 0.5, %v1198_v4 }
 0x982   :  { %v1211_v14 = vmul.f32 %v3117_v7, %v1206_v8 }
 0x983   :  { %v1200_v35 = vsub.f32 1.5, %v1199_v6 }
 0x984   :  { %v4099_v18 = vadd.f32 %v3118_v12, %v1211_v14 }
 0x985   :  { %v1201_v9 = vmul.f32 %v3175_v13, %v1200_v35 }
 0x987   :  { %v1205_v10 = vsel %vm1204_vm6, %v3175_v13, %v1201_v9 }
 0x988   :  { %v1207_v15 = vmul.f32 %v1205_v10, %v1173_v24 }
 0x98a   :  { %v1212_v16 = vmul.f32 %v3117_v7, %v1207_v15 }
 0x98c   :  { %v4101_v19 = vadd.f32 %v3118_v12, %v1212_v16 }
 0x98e   :  { %v1218_v21 = vpack.c.bf16 %v4101_v19, %v4099_v18 }
 0x990   :  { %2844 = vmatmul.msk.bf16.vlgmr.msrb.gmra.mxu2 %vm412_vm8, %v1218_v21 }
 0xa13   :  { %v1251_v27 = vpop.f32.mrf.mxu2 }
 0xa14   :  { %v4106_v28 = vadd.f32 %v3119_v22, %v1251_v27 }
 0xa16   :  { %v4109_v29 = vmul.f32 0.70710677, %v4106_v28 }
 0xa18   :  { %v1264_v30 = vand.u32 2147483647, %v4109_v29  ;;  %vm1260_vm5 = vcmp.ge.f32.partialorder %v4109_v29, 0.0 }
 0xa1a   :  { %v1266_v31 = vmul.f32 0.3275911, %v1264_v30  ;;  %v1318_v2 = vsub.f32 0.0, %v1264_v30 }
 0xa1b   :  { %v1253_v32 = vpop.f32.mrf.mxu2 }
 0xa1c   :  { %v1268_v38 = vadd.f32 1.0, %v1266_v31  ;;  %v4112_v34 = vadd.f32 %v3119_v22, %v1253_v32  ;;  %v1320_v63 = vmul.f32 %v1318_v2, %v1264_v30 }
 0xa1e   :  { %3176 = vrcp.f32 %v1268_v38  ;;  %v4115_v33 = vmul.f32 0.70710677, %v4112_v34  ;;  %v1281_v41 = vand.u32 2147483648, %v1268_v38  ;;  %v1279_v44 = vand.u32 2147483647, %v1268_v38 }
 0xa1f   :  { %vm1275_vm9 = vweird.f32 %v1268_v38  ;;  %v1322_v4 = vmul.f32 1.442695, %v1320_v63  ;;  %v1257_v29 = vmul.f32 0.5, %v4112_v34 }
 0xa20   :  { %v1265_v36 = vand.u32 2147483647, %v4115_v33  ;;  %v1282_v25 = vor.u32 1.1754944e-38, %v1281_v41  ;;  %vm1280_vm11 = vcmp.eq.f32.partialorder %v1279_v44, 8.507059e+37  ;;  %vm1261_vm6 = vcmp.ge.f32.partialorder %v4115_v33, 0.0 }
 0xa22   :  { %v1267_v43 = vmul.f32 0.3275911, %v1265_v36  ;;  %v1319_v6 = vsub.f32 0.0, %v1265_v36 }
 0xa24   :  { %v3177_v53 = vpop.eup %3176  ;;  %v1269_v59 = vadd.f32 1.0, %v1267_v43  ;;  %v1321_v10 = vmul.f32 %v1319_v6, %v1265_v36 }
 0xa25   :  { %v1271_v37 = vmul.f32 %v3177_v53, %v1268_v38  ;;  %vm1276_vm7 = vweird.f32 %v3177_v53 }
 0xa26   :  { %3178 = vrcp.f32 %v1269_v59  ;;  %vm1277_vm10 = vmor %vm1275_vm9, %vm1276_vm7  ;;  %v1296_v55 = vand.u32 2147483648, %v1269_v59  ;;  %v1294_v57 = vand.u32 2147483647, %v1269_v59  ;;  %vm1290_vm15 = vweird.f32 %v1269_v59 }
 0xa27   :  { %v1272_v40 = vsub.f32 1.0, %v1271_v37  ;;  %3180 = vpow2.f32 %v1322_v4  ;;  %v1324_v21 = vmul.f32 1.442695, %v1321_v10  ;;  %vm1373_vm7 = vcmask 523264  }
 0xa28   :  { %v1297_v13 = vor.u32 1.1754944e-38, %v1296_v55  ;;  %vm1295_vm4 = vcmp.eq.f32.partialorder %v1294_v57, 8.507059e+37 }
 0xa29   :  { %v1273_v42 = vmul.f32 %v3177_v53, %v1272_v40  ;;  %3182 = vpow2.f32 %v1324_v21 }
 0xa2b   :  { %v1274_v46 = vadd.f32 %v3177_v53, %v1273_v42 }
 0xa2c   :  { %v3179_v48 = vpop.eup %3178 }
 0xa2d   :  { %v1278_v24 = vsel %vm1277_vm10, %v3177_v53, %v1274_v46  ;;  %v1286_v50 = vmul.f32 %v3179_v48, %v1269_v59  ;;  %vm1291_vm14 = vweird.f32 %v3179_v48  ;;  %v3181_v27 = vpop.eup %3180  ;;  %v3641_v59 = vmov -1.0  }
 0xa2e   :  { %v1283_v49 = vsel %vm1280_vm11, %v1282_v25, %v1278_v24  ;;  %vm1292_vm3 = vmor %vm1290_vm15, %vm1291_vm14  ;;  %v1262_v36 = vsel %vm1260_vm5, 1.0, %v3641_v59  ;;  %v1263_v42 = vsel %vm1261_vm6, 1.0, %v3641_v59  ;;  %v1256_v46 = vmul.f32 0.5, %v4106_v28 }
 0xa2f   :  { %v1300_v51 = vmul.f32 1.0614054, %v1283_v49  ;;  %v1287_v52 = vsub.f32 1.0, %v1286_v50  ;;  %v3183_v37 = vpop.eup %3182  ;;  %v3120_v50 = vld [vmem:[#allocation14] ss:$0 sm:$0xff] }
 0xa31   :  { %v1302_v54 = vadd.f32 -1.4531521, %v1300_v51  ;;  %v1288_v56 = vmul.f32 %v3179_v48, %v1287_v52 }
 0xa33   :  { %v1304_v61 = vmul.f32 %v1302_v54, %v1283_v49  ;;  %v1289_v0 = vadd.f32 %v3179_v48, %v1288_v56 }
 0xa35   :  { %v1306_v1 = vadd.f32 1.4214138, %v1304_v61  ;;  %v1293_v3 = vsel %vm1292_vm3, %v3179_v48, %v1289_v0 }
 0xa36   :  { %v1298_v5 = vsel %vm1295_vm4, %v1297_v13, %v1293_v3 }
 0xa37   :  { %v1308_v62 = vmul.f32 %v1306_v1, %v1283_v49  ;;  %v1301_v35 = vmul.f32 1.0614054, %v1298_v5 }
 0xa39   :  { %v1310_v7 = vadd.f32 -0.28449672, %v1308_v62  ;;  %v1303_v8 = vadd.f32 -1.4531521, %v1301_v35 }
 0xa3b   :  { %v1312_v9 = vmul.f32 %v1310_v7, %v1283_v49  ;;  %v1305_v12 = vmul.f32 %v1303_v8, %v1298_v5 }
 0xa3d   :  { %v1314_v14 = vadd.f32 0.2548296, %v1312_v9  ;;  %v1307_v15 = vadd.f32 1.4214138, %v1305_v12 }
 0xa3f   :  { %v1316_v16 = vmul.f32 %v1314_v14, %v1283_v49  ;;  %v1309_v22 = vmul.f32 %v1307_v15, %v1298_v5 }
 0xa41   :  { %v1326_v30 = vmul.f32 %v3181_v27, %v1316_v16  ;;  %v1311_v31 = vadd.f32 -0.28449672, %v1309_v22 }
 0xa43   :  { %v1313_v32 = vmul.f32 %v1311_v31, %v1298_v5  ;;  %v1328_v38 = vsub.f32 1.0, %v1326_v30 }
 0xa45   :  { %v1315_v43 = vadd.f32 0.2548296, %v1313_v32  ;;  %v1330_v39 = vmul.f32 %v1328_v38, %v1262_v36  ;;  %v3121_v32 = vld [vmem:[#allocation16] ss:$0 sm:$0xff] }
 0xa47   :  { %v1317_v53 = vmul.f32 %v1315_v43, %v1298_v5  ;;  %v1332_v44 = vadd.f32 1.0, %v1330_v39  ;;  %v2987_v5 = vld [vmem:[%s4471_s9 + $0x10] sm:$0xff] }
 0xa49   :  { %v1327_v40 = vmul.f32 %v3183_v37, %v1317_v53  ;;  %v1334_v48 = vmul.f32 %v1332_v44, %v1256_v46  ;;  %v3122_v37 = vld [vmem:[%s4477_s21] ss:$0 sm:$0xff] }
 0xa4b   :  { %v1329_v41 = vsub.f32 1.0, %v1327_v40 }
 0xa4d   :  { %v1331_v45 = vmul.f32 %v1329_v41, %v1263_v42 }
 0xa4f   :  { %v1333_v25 = vadd.f32 1.0, %v1331_v45  ;;  %v3123_v45 = vld [vmem:[#allocation7 + $0x1] ss:$0 sm:$0xff] }
 0xa51   :  { %v1335_v24 = vmul.f32 %v1333_v25, %v1257_v29 }
 0xa53   :  { %v1336_v49 = vpack.c.bf16 %v1335_v24, %v1334_v48 }
 0xa55   :  { %2861 = vmatmul.msk.bf16.vlgmr.msrb.gmra.mxu3 %vm1373_vm7, %v1336_v49 }
 0xad8   :  { %v1386_v26 = vpop.f32.mrf.mxu3 }
 0xad9   :  { %v1387_v33 = vadd.f32 %v3120_v50, %v1386_v26 }
 0xadb   :  { %v1391_v51 = vadd.f32 %v1387_v33, %v4099_v18 }
 0xadd   :  { %v1395_v2 = vsel %vm412_vm8, %v1391_v51, 0.0 }
 0xade   :  { %1396 = vadd.xlane.f32.xlu2 %v1395_v2 }
 0xae0   :  { %v1388_v52 = vpop.f32.mrf.mxu3 }
 0xae1   :  { %v1389_v54 = vadd.f32 %v3120_v50, %v1388_v52 }
 0xae3   :  { %v1392_v28 = vadd.f32 %v1389_v54, %v4101_v19  ;;  %v2988_v19 = vld [vmem:[%s4471_s9 + $0x18] sm:$0xff]  ;;  %s2702_s9 = sshll.u32 %s3643_s5, 4  ;;  %s2703_s9 = int_to_ptr.vmem [resolvable:$true] %s2702_s9 }
 0xae4   :  { %1481 = vmatpush.bf16.msra.mxu1 %v2988_v19 }
 0xae5   :  { %v1398_v34 = vsel %vm412_vm8, %v1392_v28, 0.0 }
 0xae6   :  { %1399 = vadd.xlane.f32.xlu0 %v1398_v34 }
 0xae8   :  { %1482 = vmatpush.bf16.msra.mxu1 %v2987_v5 }
 0xb51   :  { %v1397_v55 = vpop.xlane.xlu2 %1396 }
 0xb52   :  { %v1401_v56 = vmul.f32 %v1397_v55, %v3916_v47 }
 0xb54   :  { %v1403_v57 = vsub.f32 %v1391_v51, %v1401_v56 }
 0xb56   :  { %v1405_v60 = vmul.f32 %v1403_v57, %v1403_v57 }
 0xb58   :  { %v1407_v61 = vsel %vm412_vm8, %v1405_v60, 0.0 }
 0xb59   :  { %v1400_v18 = vpop.xlane.xlu0 %1399  ;;  %1408 = vadd.xlane.f32.xlu1 %v1407_v61 }
 0xb5a   :  { %v1402_v63 = vmul.f32 %v1400_v18, %v3916_v47 }
 0xb5c   :  { %v1404_v0 = vsub.f32 %v1392_v28, %v1402_v63 }
 0xb5e   :  { %v1406_v1 = vmul.f32 %v1404_v0, %v1404_v0 }
 0xb60   :  { %v1410_v13 = vsel %vm412_vm8, %v1406_v1, 0.0 }
 0xb61   :  { %1411 = vadd.xlane.f32.xlu2 %v1410_v13 }
 0xbcc   :  { %v1409_v3 = vpop.xlane.xlu1 %1408 }
 0xbcd   :  { %v1413_v62 = vmul.f32 %v1409_v3, %v3916_v47 }
 0xbcf   :  { %v1415_v4 = vadd.f32 1e-12, %v1413_v62 }
 0xbd1   :  { %3184 = vrsqrt.f32 %v1415_v4  ;;  %vm1423_vm10 = vweird.f32 %v1415_v4 }
 0xbd4   :  { %v1412_v6 = vpop.xlane.xlu2 %1411 }
 0xbd5   :  { %v1414_v35 = vmul.f32 %v1412_v6, %v3916_v47 }
 0xbd7   :  { %v3185_v7 = vpop.eup %3184  ;;  %v1416_v8 = vadd.f32 1e-12, %v1414_v35 }
 0xbd8   :  { %v1418_v9 = vmul.f32 %v3185_v7, %v1415_v4  ;;  %vm1424_vm9 = vweird.f32 %v3185_v7 }
 0xbd9   :  { %3186 = vrsqrt.f32 %v1416_v8  ;;  %vm1425_vm11 = vmor %vm1423_vm10, %vm1424_vm9  ;;  %vm1433_vm15 = vweird.f32 %v1416_v8 }
 0xbda   :  { %v1419_v10 = vmul.f32 %v3185_v7, %v1418_v9 }
 0xbdc   :  { %v1420_v12 = vmul.f32 0.5, %v1419_v10 }
 0xbde   :  { %v1421_v14 = vsub.f32 1.5, %v1420_v12 }
 0xbdf   :  { %v3187_v15 = vpop.eup %3186 }
 0xbe0   :  { %v1422_v16 = vmul.f32 %v3185_v7, %v1421_v14  ;;  %v1428_v21 = vmul.f32 %v3187_v15, %v1416_v8  ;;  %vm1434_vm14 = vweird.f32 %v3187_v15 }
 0xbe1   :  { %vm1435_vm3 = vmor %vm1433_vm15, %vm1434_vm14 }
 0xbe2   :  { %v1429_v22 = vmul.f32 %v3187_v15, %v1428_v21  ;;  %v1426_v27 = vsel %vm1425_vm11, %v3185_v7, %v1422_v16 }
 0xbe3   :  { %v1437_v38 = vmul.f32 %v1426_v27, %v1403_v57 }
 0xbe4   :  { %v1430_v30 = vmul.f32 0.5, %v1429_v22 }
 0xbe5   :  { %v1442_v36 = vmul.f32 %v3121_v32, %v1437_v38 }
 0xbe6   :  { %v1431_v31 = vsub.f32 1.5, %v1430_v30 }
 0xbe7   :  { %v4142_v41 = vadd.f32 %v3122_v37, %v1442_v36 }
 0xbe8   :  { %v1432_v43 = vmul.f32 %v3187_v15, %v1431_v31 }
 0xbea   :  { %v1436_v53 = vsel %vm1435_vm3, %v3187_v15, %v1432_v43 }
 0xbeb   :  { %v1438_v39 = vmul.f32 %v1436_v53, %v1404_v0 }
 0xbed   :  { %v1443_v40 = vmul.f32 %v3121_v32, %v1438_v39 }
 0xbef   :  { %v4144_v42 = vadd.f32 %v3122_v37, %v1443_v40 }
 0xbf1   :  { %v1449_v44 = vpack.c.bf16 %v4144_v42, %v4142_v41 }
 0xbf3   :  { %2874 = vmatmul.msk.bf16.vlgmr.msra.gmra.mxu1 %vm412_vm8, %v1449_v44 }
 0xc70   :  { %v1484_v46 = vpop.f32.mrf.mxu1 }
 0xc71   :  { %v1485_v29 = vadd.f32 %v3123_v45, %v1484_v46 }
 0xc73   :  { %v1493_v25 = vpack.c.bf16 %v1485_v29, %v1485_v29  ;;  %v1489_v26 = vmul.f32 0.35355338, %v1485_v29 }
 0xc75   :  { %v1496_v48 = vunpack.c.l.b16 %v1493_v25  ;;  %v1491_v52 = vpack.c.bf16 %v1489_v26, %v1489_v26 }
 0xc77   :  { %v4149_v24 = vpack.c.b16 %v1496_v48, %v1496_v48  ;;  %v1636_v55 = vunpack.c.l.b16 %v1491_v52 }
 0xc78   :  { %v1486_v49 = vpop.f32.mrf.mxu1 }
 0xc79   :  { %v1487_v50 = vadd.f32 %v3123_v45, %v1486_v49  ;;  %1640 = vrot.lane.b32.xlu2 %v4149_v24, %s3630_s3  ;;  %1498 = vrot.lane.b32.xlu0 %v4149_v24, %s3629_s25  ;;  %v1637_v57 = vpack.c.b16 %v1636_v55, %v1636_v55 }
 0xc7b   :  { %v1490_v33 = vmul.f32 0.35355338, %v1487_v50  ;;  %v1494_v51 = vpack.c.bf16 %v1487_v50, %v1487_v50 }
 0xc7d   :  { %v1520_v2 = vunpack.c.l.b16 %v1494_v51  ;;  %v1492_v54 = vpack.c.bf16 %v1490_v33, %v1490_v33 }
 0xc7f   :  { %v4155_v28 = vpack.c.b16 %v1520_v2, %v1520_v2  ;;  %v1662_v34 = vunpack.c.l.b16 %v1492_v54 }
 0xc81   :  { %1522 = vrot.lane.b32.xlu1 %v4155_v28, %s3629_s25  ;;  %1781 = vrot.lane.b32.xlu2 %v4149_v24, %s3632_s10  ;;  %v1663_v56 = vpack.c.b16 %v1662_v34, %v1662_v34  ;;  %s3506_s25 = sshra.s32 %s2705_s17, 4  ;;  %s3507_s25 = int_to_ptr.hbm [resolvable:$true] %s3506_s25 }
 0xc82   :  { %1666 = vrot.lane.b32.xlu0 %v4155_v28, %s3630_s3  ;;  %s3508_s3 = scalar_lea.hbm %s3507_s25, 16  ;;  %p3511_p9 = scmp.lt.s32.totalorder %s3507_s25, %s3801_s13 }
 0xc83   :  { %p3509_p8 = scmp.ne.s32.totalorder %s3507_s25, %s3508_s3 }
 0xc89   :  { %1802 = vrot.lane.b32.xlu2 %v1663_v56, %s3635_s12  ;;  %1638 = vrot.lane.b32.xlu1 %v1637_v57, %s3631_s15 }
 0xc8a   :  { %1664 = vrot.lane.b32.xlu0 %v1663_v56, %s3631_s15  ;;  %s3510_s15 = scalar_lea.hbm %s3801_s13, 16 }
 0xc8b   :  { %p3512_p10 = scmp.lt.s32.totalorder %s3510_s15, %s3508_s3 }
 0xc8d   :  { %p3513_p11 = por %p3512_p10, %p3511_p9 }
 0xc8f   :  { %p3514_p12 = pnand %p3513_p11, %p3509_p8 }
 0xc91   :  { %1917 = vrot.lane.b32.xlu2 %v1637_v57, %s3634_s18  ;;  %1804 = vrot.lane.b32.xlu1 %v4155_v28, %s3632_s10 }
 0xc92   :  { %1779 = vrot.lane.b32.xlu0 %v1637_v57, %s3635_s12 }
 0xc99   :  { %1919 = vrot.lane.b32.xlu1 %v4149_v24, %s3633_s2 }
 0xc9a   :  { %1942 = vrot.lane.b32.xlu0 %v4155_v28, %s3633_s2 }
 0xca1   :  { %1940 = vrot.lane.b32.xlu1 %v1663_v56, %s3634_s18 }
 0xcd3   :  { %v1641_v60 = vpop.permute.xlu2 %1640 }
 0xcd4   :  { %v1646_v63 = vsel %vm533_vm1, %v1641_v60, 0 }
 0xcdb   :  { %v1782_v0 = vpop.permute.xlu2 %1781 }
 0xcdc   :  { %v1787_v13 = vsel %vm533_vm1, %v1782_v0, 0 }
 0xce3   :  { %v1803_v14 = vpop.permute.xlu2 %1802 }
 0xceb   :  { %v1499_v61 = vpop.permute.xlu0 %1498  ;;  %v1918_v15 = vpop.permute.xlu2 %1917 }
 0xcec   :  { %v1504_v18 = vsel %vm533_vm1, %v1499_v61, 0 }
 0xced   :  { %1513 = vmatpush.bf16.xpose.msra.mxu0 %v1504_v18 }
 0xcf3   :  { %v1523_v1 = vpop.permute.xlu1 %1522 }
 0xcf4   :  { %v1528_v19 = vsel %vm533_vm1, %v1523_v1, 0  ;;  %v1667_v3 = vpop.permute.xlu0 %1666  ;;  %2875 = vmatmul.msk.bf16.vlgmr.msra.gmra.mxu0 %vm533_vm1, %v1491_v52 }
 0xcf5   :  { %1655 = vmatpush.bf16.xpose.msrb.mxu0 %v1646_v63  ;;  %v1672_v62 = vsel %vm533_vm1, %v1667_v3, 0  ;;  %1537 = vmatpush.bf16.xpose.msra.mxu2 %v1528_v19 }
 0xcfb   :  { %v1639_v4 = vpop.permute.xlu1 %1638 }
 0xcfc   :  { %v1665_v5 = vpop.permute.xlu0 %1664  ;;  %2876 = vmatmul.msk.bf16.vlgmr.msra.gmra.mxu2 %vm533_vm1, %v1492_v54 }
 0xcfd   :  { %1796 = vmatpush.bf16.xpose.msra.mxu0 %v1787_v13  ;;  %1681 = vmatpush.bf16.xpose.msrb.mxu2 %v1672_v62 }
 0xd03   :  { %v1805_v6 = vpop.permute.xlu1 %1804 }
 0xd04   :  { %v1780_v35 = vpop.permute.xlu0 %1779  ;;  %v1810_v7 = vsel %vm533_vm1, %v1805_v6, 0  ;;  %2879 = vmatmul.msk.bf16.vlgmr.msrb.gmra.mxu0 %vm533_vm1, %v1639_v4 }
 0xd05   :  { %1819 = vmatpush.bf16.xpose.msra.mxu2 %v1810_v7 }
 0xd0b   :  { %v1920_v8 = vpop.permute.xlu1 %1919 }
 0xd0c   :  { %v1943_v9 = vpop.permute.xlu0 %1942  ;;  %v1925_v10 = vsel %vm533_vm1, %v1920_v8, 0  ;;  %2880 = vmatmul.msk.bf16.vlgmr.msrb.gmra.mxu2 %vm533_vm1, %v1665_v5 }
 0xd0d   :  { %v1948_v12 = vsel %vm533_vm1, %v1943_v9, 0  ;;  %1934 = vmatpush.bf16.xpose.msrb.mxu0 %v1925_v10 }
 0xd0e   :  { %1957 = vmatpush.bf16.xpose.msrb.mxu2 %v1948_v12 }
 0xd13   :  { %v1941_v16 = vpop.permute.xlu1 %1940 }
 0xd14   :  { %2883 = vmatmul.msk.bf16.vlgmr.msra.gmra.mxu0 %vm533_vm1, %v1780_v35 }
 0xd1c   :  { %2884 = vmatmul.msk.bf16.vlgmr.msra.gmra.mxu2 %vm533_vm1, %v1803_v14 }
 0xd24   :  { %2887 = vmatmul.msk.bf16.vlgmr.msrb.gmra.mxu0 %vm533_vm1, %v1918_v15 }
 0xd2c   :  { %2888 = vmatmul.msk.bf16.vlgmr.msrb.gmra.mxu2 %vm533_vm1, %v1941_v16 }
 0xd71   :  { %v1515_v21 = vpop.f32.mrf.mxu0 }
 0xd72   :  { %v1516_v22 = vadd.f32 %v1515_v21, %v3959_v58 }
 0xd74   :  { %v1543_v27 = vsel %vm533_vm1, %v1516_v22, -inf }
 0xd75   :  { %1544 = vmax.xlane.f32.xlu0 %v1543_v27 }
 0xd79   :  { %v1517_v30 = vpop.f32.mrf.mxu0 }
 0xd7f   :  { %v1539_v31 = vpop.f32.mrf.mxu2 }
 0xd80   :  { %v1540_v32 = vadd.f32 %v1539_v31, %v3975_v11 }
 0xd81   :  { %v1657_v38 = vpop.f32.mrf.mxu0 }
 0xd82   :  { %v1658_v43 = vadd.f32 %v1657_v38, %v3959_v58  ;;  %v1546_v53 = vsel %vm533_vm1, %v1540_v32, -inf }
 0xd83   :  { %1547 = vmax.xlane.f32.xlu2 %v1546_v53 }
 0xd84   :  { %v1687_v37 = vsel %vm533_vm1, %v1658_v43, -inf }
 0xd85   :  { %1688 = vmax.xlane.f32.xlu1 %v1687_v37 }
 0xd87   :  { %v1541_v36 = vpop.f32.mrf.mxu2 }
 0xd89   :  { %v1659_v39 = vpop.f32.mrf.mxu0 }
 0xd8f   :  { %v1683_v40 = vpop.f32.mrf.mxu2 }
 0xd90   :  { %v4198_v44 = vadd.f32 %v1683_v40, %v3975_v11 }
 0xd91   :  { %v1798_v45 = vpop.f32.mrf.mxu0 }
 0xd92   :  { %v4201_v46 = vadd.f32 %v1798_v45, %v3959_v58  ;;  %v1690_v29 = vsel %vm533_vm1, %v4198_v44, -inf }
 0xd93   :  { %1691 = vmax.xlane.f32.xlu0 %v1690_v29 }
 0xd94   :  { %v1825_v25 = vsel %vm533_vm1, %v4201_v46, -inf }
 0xd95   :  { %1826 = vmax.xlane.f32.xlu2 %v1825_v25 }
 0xd97   :  { %v1685_v48 = vpop.f32.mrf.mxu2 }
 0xd99   :  { %v1800_v49 = vpop.f32.mrf.mxu0 }
 0xd9f   :  { %v1821_v50 = vpop.f32.mrf.mxu2 }
 0xda0   :  { %v1822_v26 = vadd.f32 %v1821_v50, %v3975_v11 }
 0xda1   :  { %v1936_v33 = vpop.f32.mrf.mxu0 }
 0xda2   :  { %v1937_v51 = vadd.f32 %v1936_v33, %v3959_v58  ;;  %v1828_v2 = vsel %vm533_vm1, %v1822_v26, -inf }
 0xda3   :  { %1829 = vmax.xlane.f32.xlu1 %v1828_v2 }
 0xda4   :  { %v1963_v52 = vsel %vm533_vm1, %v1937_v51, -inf }
 0xda5   :  { %1964 = vmax.xlane.f32.xlu0 %v1963_v52 }
 0xda7   :  { %v1823_v54 = vpop.f32.mrf.mxu2 }
 0xda9   :  { %v1938_v34 = vpop.f32.mrf.mxu0 }
 0xdad   :  { %1614 = vrot.lane.b32.xlu2 %v4155_v28, %s3624_s24 }
 0xdaf   :  { %v1959_v55 = vpop.f32.mrf.mxu2 }
 0xdb0   :  { %v4214_v56 = vadd.f32 %v1959_v55, %v3975_v11 }
 0xdb2   :  { %v1966_v57 = vsel %vm533_vm1, %v4214_v56, -inf }
 0xdb3   :  { %1967 = vmax.xlane.f32.xlu1 %v1966_v57 }
 0xdb7   :  { %v1961_v58 = vpop.f32.mrf.mxu2 }
 0xdb9   :  { %1737 = vrot.lane.b32.xlu0 %v4149_v24, %s3636_s30 }
 0xdcc   :  { %1593 = vrot.lane.b32.xlu1 %v4149_v24, %s3624_s24 }
 0xde8   :  { %v1545_v60 = vpop.xlane.xlu0 %1544 }
 0xde9   :  { %v1549_v61 = vsub.f32 %v1516_v22, %v1545_v60 }
 0xdeb   :  { %v1551_v18 = vmul.f32 1.442695, %v1549_v61 }
 0xded   :  { %3188 = vpow2.f32 %v1551_v18 }
 0xdf3   :  { %v4222_v63 = vpop.eup %3188 }
 0xdf4   :  { %v1555_v11 = vsel %vm533_vm1, %v4222_v63, 0.0 }
 0xdf5   :  { %1556 = vadd.xlane.f32.xlu2 %v1555_v11 }
 0xdf6   :  { %v1548_v0 = vpop.xlane.xlu2 %1547 }
 0xdf7   :  { %v1550_v1 = vsub.f32 %v1540_v32, %v1548_v0 }
 0xdf8   :  { %v1689_v13 = vpop.xlane.xlu1 %1688 }
 0xdf9   :  { %v1553_v19 = vmul.f32 1.442695, %v1550_v1  ;;  %v1693_v3 = vsub.f32 %v1658_v43, %v1689_v13 }
 0xdfb   :  { %3190 = vpow2.f32 %v1553_v19  ;;  %v1695_v62 = vmul.f32 1.442695, %v1693_v3 }
 0xdfd   :  { %3192 = vpow2.f32 %v1695_v62 }
 0xe01   :  { %v4226_v4 = vpop.eup %3190 }
 0xe02   :  { %v1558_v5 = vsel %vm533_vm1, %v4226_v4, 0.0 }
 0xe03   :  { %v4230_v6 = vpop.eup %3192  ;;  %1559 = vadd.xlane.f32.xlu0 %v1558_v5 }
 0xe04   :  { %v1699_v35 = vsel %vm533_vm1, %v4230_v6, 0.0 }
 0xe05   :  { %1700 = vadd.xlane.f32.xlu2 %v1699_v35 }
 0xe06   :  { %v1692_v21 = vpop.xlane.xlu0 %1691 }
 0xe07   :  { %v1694_v22 = vsub.f32 %v4198_v44, %v1692_v21 }
 0xe08   :  { %v1827_v7 = vpop.xlane.xlu2 %1826 }
 0xe09   :  { %v1697_v30 = vmul.f32 1.442695, %v1694_v22  ;;  %v1831_v38 = vsub.f32 %v4201_v46, %v1827_v7 }
 0xe0b   :  { %v1833_v53 = vmul.f32 1.442695, %v1831_v38 }
 0xe10   :  { %v1615_v8 = vpop.permute.xlu2 %1614 }
 0xe11   :  { %v1620_v9 = vsel %vm632_vm2, %v1615_v8, 0 }
 0xe12   :  { %1629 = vmatpush.bf16.msrb.mxu1 %v1620_v9 }
 0xe16   :  { %v1830_v10 = vpop.xlane.xlu1 %1829 }
 0xe17   :  { %v1832_v12 = vsub.f32 %v1822_v26, %v1830_v10  ;;  %1875 = vrot.lane.b32.xlu0 %v4149_v24, %s3637_s6 }
 0xe18   :  { %v1965_v27 = vpop.xlane.xlu0 %1964 }
 0xe19   :  { %v1835_v14 = vmul.f32 1.442695, %v1832_v12  ;;  %v1969_v31 = vsub.f32 %v1937_v51, %v1965_v27 }
 0xe1b   :  { %3194 = vpow2.f32 %v1835_v14  ;;  %v1971_v43 = vmul.f32 1.442695, %v1969_v31 }
 0xe1c   :  { %3196 = vpow2.f32 %v1697_v30 }
 0xe1d   :  { %1758 = vrot.lane.b32.xlu2 %v4155_v28, %s3636_s30  ;;  %3198 = vpow2.f32 %v1971_v43 }
 0xe1e   :  { %3200 = vpow2.f32 %v1833_v53 }
 0xe21   :  { %v4239_v15 = vpop.eup %3194 }
 0xe22   :  { %v1840_v16 = vsel %vm533_vm1, %v4239_v15, 0.0  ;;  %v4247_v37 = vpop.eup %3196 }
 0xe23   :  { %1841 = vadd.xlane.f32.xlu1 %v1840_v16  ;;  %v1702_v46 = vsel %vm533_vm1, %v4247_v37, 0.0  ;;  %v4254_v29 = vpop.eup %3198 }
 0xe24   :  { %v4256_v48 = vpop.eup %3200  ;;  %v1975_v49 = vsel %vm533_vm1, %v4254_v29, 0.0 }
 0xe25   :  { %v1837_v50 = vsel %vm533_vm1, %v4256_v48, 0.0 }
 0xe26   :  { %v1968_v32 = vpop.xlane.xlu1 %1967 }
 0xe27   :  { %v1970_v40 = vsub.f32 %v4214_v56, %v1968_v32 }
 0xe29   :  { %v1973_v25 = vmul.f32 1.442695, %v1970_v40 }
 0xe2b   :  { %v1738_v36 = vpop.permute.xlu0 %1737  ;;  %3202 = vpow2.f32 %v1973_v25 }
 0xe2c   :  { %v1743_v45 = vsel %vm632_vm2, %v1738_v36, 0 }
 0xe31   :  { %v4262_v26 = vpop.eup %3202 }
 0xe32   :  { %v1978_v33 = vsel %vm533_vm1, %v4262_v26, 0.0 }
 0xe3c   :  { %1896 = vrot.lane.b32.xlu1 %v4155_v28, %s3637_s6 }
 0xe3e   :  { %v1594_v39 = vpop.permute.xlu1 %1593 }
 0xe3f   :  { %v1599_v44 = vsel %vm632_vm2, %v1594_v39, 0 }
 0xe40   :  { %1608 = vmatpush.bf16.msra.mxu3 %v1599_v44 }
 0xe41   :  { %1703 = vadd.xlane.f32.xlu0 %v1702_v46 }
 0xe44   :  { %1752 = vmatpush.bf16.msrb.mxu3 %v1743_v45 }
 0xe46   :  { %1976 = vadd.xlane.f32.xlu2 %v1975_v49 }
 0xe49   :  { %1838 = vadd.xlane.f32.xlu0 %v1837_v50 }
 0xe51   :  { %1979 = vadd.xlane.f32.xlu0 %v1978_v33 }
 0xe5e   :  { %2013 = vrot.lane.b32.xlu2 %v4149_v24, %s3638_s16 }
 0xe65   :  { %2034 = vrot.lane.b32.xlu0 %v4155_v28, %s3638_s16 }
 0xe68   :  { %v1557_v51 = vpop.xlane.xlu2 %1556 }
 0xe69   :  { %3204 = vrcp.f32 %v1557_v51  ;;  %v1572_v34 = vand.u32 2147483648, %v1557_v51  ;;  %v1570_v56 = vand.u32 2147483647, %v1557_v51  ;;  %vm1566_vm5 = vweird.f32 %v1557_v51 }
 0xe6b   :  { %v1573_v60 = vor.u32 1.1754944e-38, %v1572_v34  ;;  %vm1571_vm9 = vcmp.eq.f32.partialorder %v1570_v56, 8.507059e+37 }
 0xe6f   :  { %v3205_v2 = vpop.eup %3204 }
 0xe70   :  { %v1562_v52 = vmul.f32 %v3205_v2, %v1557_v51  ;;  %vm1567_vm4 = vweird.f32 %v3205_v2 }
 0xe71   :  { %vm1568_vm6 = vmor %vm1566_vm5, %vm1567_vm4 }
 0xe72   :  { %v1563_v54 = vsub.f32 1.0, %v1562_v52 }
 0xe74   :  { %v1564_v55 = vmul.f32 %v3205_v2, %v1563_v54 }
 0xe76   :  { %v1565_v57 = vadd.f32 %v3205_v2, %v1564_v55  ;;  %v1560_v58 = vpop.xlane.xlu0 %1559 }
 0xe77   :  { %3206 = vrcp.f32 %v1560_v58  ;;  %v1587_v5 = vand.u32 2147483648, %v1560_v58  ;;  %v1585_v8 = vand.u32 2147483647, %v1560_v58  ;;  %vm1581_vm11 = vweird.f32 %v1560_v58 }
 0xe78   :  { %v1569_v61 = vsel %vm1568_vm6, %v3205_v2, %v1565_v57  ;;  %v1701_v24 = vpop.xlane.xlu2 %1700 }
 0xe79   :  { %v1574_v18 = vsel %vm1571_vm9, %v1573_v60, %v1569_v61  ;;  %3208 = vrcp.f32 %v1701_v24  ;;  %v1716_v10 = vand.u32 2147483648, %v1701_v24  ;;  %v1714_v14 = vand.u32 2147483647, %v1701_v24 }
 0xe7a   :  { %v1575_v28 = vmul.f32 %v4222_v63, %v1574_v18  ;;  %v1588_v16 = vor.u32 1.1754944e-38, %v1587_v5  ;;  %vm1586_vm3 = vcmp.eq.f32.partialorder %v1585_v8, 8.507059e+37  ;;  %vm1710_vm4 = vweird.f32 %v1701_v24 }
 0xe7b   :  { %v1717_v30 = vor.u32 1.1754944e-38, %v1716_v10  ;;  %vm1715_vm6 = vcmp.eq.f32.partialorder %v1714_v14, 8.507059e+37 }
 0xe7c   :  { %v1591_v11 = vpack.c.bf16 %v1575_v28, %v1575_v28 }
 0xe7d   :  { %v3207_v0 = vpop.eup %3206 }
 0xe7e   :  { %v1577_v1 = vmul.f32 %v3207_v0, %v1560_v58  ;;  %2877 = vmatmul.msk.bf16.vlgmr.msra.gmra.mxu3 %vm533_vm1, %v1591_v11  ;;  %vm1582_vm10 = vweird.f32 %v3207_v0 }
 0xe7f   :  { %v3209_v13 = vpop.eup %3208  ;;  %vm1583_vm15 = vmor %vm1581_vm11, %vm1582_vm10 }
 0xe80   :  { %v1578_v19 = vsub.f32 1.0, %v1577_v1  ;;  %v1706_v3 = vmul.f32 %v3209_v13, %v1701_v24  ;;  %v1759_v62 = vpop.permute.xlu2 %1758  ;;  %vm1711_vm14 = vweird.f32 %v3209_v13 }
 0xe81   :  { %v1764_v35 = vsel %vm632_vm2, %v1759_v62, 0  ;;  %vm1712_vm5 = vmor %vm1710_vm4, %vm1711_vm14 }
 0xe82   :  { %v1579_v7 = vmul.f32 %v3207_v0, %v1578_v19  ;;  %v1707_v9 = vsub.f32 1.0, %v1706_v3  ;;  %1773 = vmatpush.bf16.msra.mxu1 %v1764_v35 }
 0xe84   :  { %v1580_v63 = vadd.f32 %v3207_v0, %v1579_v7  ;;  %v1708_v12 = vmul.f32 %v3209_v13, %v1707_v9 }
 0xe86   :  { %v1584_v21 = vsel %vm1583_vm15, %v3207_v0, %v1580_v63  ;;  %v1709_v22 = vadd.f32 %v3209_v13, %v1708_v12 }
 0xe87   :  { %v1589_v27 = vsel %vm1586_vm3, %v1588_v16, %v1584_v21 }
 0xe88   :  { %v1590_v31 = vmul.f32 %v4226_v4, %v1589_v27  ;;  %v1713_v32 = vsel %vm1712_vm5, %v3209_v13, %v1709_v22 }
 0xe89   :  { %v1718_v38 = vsel %vm1715_vm6, %v1717_v30, %v1713_v32  ;;  %v1876_v43 = vpop.permute.xlu0 %1875 }
 0xe8a   :  { %v1719_v53 = vmul.f32 %v4230_v6, %v1718_v38  ;;  %v1881_v36 = vsel %vm632_vm2, %v1876_v43, 0  ;;  %v1592_v39 = vpack.c.bf16 %v1590_v31, %v1590_v31 }
 0xe8b   :  { %1890 = vmatpush.bf16.msra.mxu3 %v1881_v36 }
 0xe8c   :  { %2878 = vmatmul.msk.bf16.vlgmr.msrb.gmra.mxu1 %vm533_vm1, %v1592_v39  ;;  %v1735_v40 = vpack.c.bf16 %v1719_v53, %v1719_v53 }
 0xe8e   :  { %2881 = vmatmul.msk.bf16.vlgmr.msrb.gmra.mxu3 %vm533_vm1, %v1735_v40 }
 0xe96   :  { %v4278_v44 = vpop.xlane.xlu1 %1841 }
 0xe97   :  { %3210 = vrcp.f32 %v4278_v44  ;;  %v1869_v12 = vand.u32 2147483648, %v4278_v44  ;;  %vm1863_vm6 = vweird.f32 %v4278_v44  ;;  %v1867_v14 = vand.u32 2147483647, %v4278_v44 }
 0xe99   :  { %v1870_v32 = vor.u32 1.1754944e-38, %v1869_v12 }
 0xe9d   :  { %v3211_v25 = vpop.eup %3210 }
 0xe9e   :  { %v1859_v51 = vmul.f32 %v3211_v25, %v4278_v44  ;;  %vm1864_vm3 = vweird.f32 %v3211_v25 }
 0xea0   :  { %v1860_v57 = vsub.f32 1.0, %v1859_v51 }
 0xea2   :  { %v1861_v1 = vmul.f32 %v3211_v25, %v1860_v57 }
 0xea4   :  { %v1862_v8 = vadd.f32 %v3211_v25, %v1861_v1 }
 0xeae   :  { %v1897_v45 = vpop.permute.xlu1 %1896 }
 0xeaf   :  { %v1902_v4 = vsel %vm632_vm2, %v1897_v45, 0 }
 0xeb0   :  { %1911 = vmatpush.bf16.msrb.mxu1 %v1902_v4 }
 0xeb4   :  { %v1704_v46 = vpop.xlane.xlu0 %1703 }
 0xeb5   :  { %3212 = vrcp.f32 %v1704_v46  ;;  %v1731_v52 = vand.u32 2147483648, %v1704_v46  ;;  %v1729_v34 = vand.u32 2147483647, %v1704_v46  ;;  %vm1725_vm10 = vweird.f32 %v1704_v46 }
 0xeb7   :  { %v1732_v24 = vor.u32 1.1754944e-38, %v1731_v52  ;;  %vm1730_vm14 = vcmp.eq.f32.partialorder %v1729_v34, 8.507059e+37 }
 0xeb9   :  { %v4282_v6 = vpop.xlane.xlu2 %1976 }
 0xeba   :  { %3214 = vrcp.f32 %v4282_v6  ;;  %v1992_v39 = vand.u32 2147483648, %v4282_v6 }
 0xebb   :  { %v3213_v49 = vpop.eup %3212 }
 0xebc   :  { %v1721_v50 = vmul.f32 %v3213_v49, %v1704_v46  ;;  %v1839_v33 = vpop.xlane.xlu0 %1838  ;;  %vm1726_vm9 = vweird.f32 %v3213_v49  ;;  %v1993_v4 = vor.u32 1.1754944e-38, %v1992_v39  ;;  %v3124_v39 = vld [vmem:[#allocation8 + $0x1] ss:$0 sm:$0xff] }
 0xebd   :  { %3216 = vrcp.f32 %v1839_v33  ;;  %vm1727_vm11 = vmor %vm1725_vm10, %vm1726_vm9  ;;  %v1854_v62 = vand.u32 2147483648, %v1839_v33  ;;  %v1852_v35 = vand.u32 2147483647, %v1839_v33  ;;  %vm1848_vm4 = vweird.f32 %v1839_v33 }
 0xebe   :  { %v1722_v2 = vsub.f32 1.0, %v1721_v50  ;;  %vm1865_vm10 = vmor %vm1863_vm6, %vm1864_vm3 }
 0xebf   :  { %vm1853_vm9 = vcmp.eq.f32.partialorder %v1852_v35, 8.507059e+37  ;;  %v1866_v22 = vsel %vm1865_vm10, %v3211_v25, %v1862_v8  ;;  %v2990_v8 = vld [vmem:[%s4474_s0 + $0x18] sm:$0xff] }
 0xec0   :  { %v1723_v54 = vmul.f32 %v3213_v49, %v1722_v2  ;;  %v4286_v56 = vpop.eup %3214  ;;  %2117 = vmatpush.bf16.msra.mxu0 %v2990_v8 }
 0xec1   :  { %v2014_v55 = vpop.permute.xlu2 %2013  ;;  %v1982_v19 = vmul.f32 %v4286_v56, %v4282_v6 }
 0xec2   :  { %v1724_v58 = vadd.f32 %v3213_v49, %v1723_v54  ;;  %v2019_v60 = vsel %vm632_vm2, %v2014_v55, 0 }
 0xec3   :  { %v3217_v61 = vpop.eup %3216  ;;  %2028 = vmatpush.bf16.msrb.mxu3 %v2019_v60  ;;  %v1983_v9 = vsub.f32 1.0, %v1982_v19 }
 0xec4   :  { %v1728_v18 = vsel %vm1727_vm11, %v3213_v49, %v1724_v58  ;;  %v1844_v28 = vmul.f32 %v3217_v61, %v1839_v33  ;;  %v4289_v11 = vpop.xlane.xlu0 %1979  ;;  %vm1849_vm15 = vweird.f32 %v3217_v61  ;;  %vm1868_vm11 = vcmp.eq.f32.partialorder %v1867_v14, 8.507059e+37 }
 0xec5   :  { %v1733_v0 = vsel %vm1730_vm14, %v1732_v24, %v1728_v18  ;;  %3218 = vrcp.f32 %v4289_v11  ;;  %vm1850_vm5 = vmor %vm1848_vm4, %vm1849_vm15  ;;  %v1984_v27 = vmul.f32 %v4286_v56, %v1983_v9  ;;  %v1871_v43 = vsel %vm1868_vm11, %v1870_v32, %v1866_v22  ;;  %v2989_v9 = vld [vmem:[%s4474_s0 + $0x10] sm:$0xff] }
 0xec6   :  { %v1734_v13 = vmul.f32 %v4247_v37, %v1733_v0  ;;  %v1845_v3 = vsub.f32 1.0, %v1844_v28  ;;  %v1855_v37 = vor.u32 1.1754944e-38, %v1854_v62  ;;  %vm1987_vm14 = vweird.f32 %v4286_v56  ;;  %2118 = vmatpush.bf16.msra.mxu0 %v2989_v9 }
 0xec7   :  { %v1985_v53 = vadd.f32 %v4286_v56, %v1984_v27  ;;  %v1872_v40 = vmul.f32 %v4239_v15, %v1871_v43  ;;  %vm1986_vm15 = vweird.f32 %v4282_v6  ;;  %v2007_v15 = vand.u32 2147483648, %v4289_v11 }
 0xec8   :  { %v1846_v5 = vmul.f32 %v3217_v61, %v1845_v3  ;;  %v1736_v7 = vpack.c.bf16 %v1734_v13, %v1734_v13  ;;  %vm1988_vm3 = vmor %vm1986_vm15, %vm1987_vm14  ;;  %vm2001_vm6 = vweird.f32 %v4289_v11  ;;  %v2005_v51 = vand.u32 2147483647, %v4289_v11 }
 0xec9   :  { %v1989_v44 = vsel %vm1988_vm3, %v4286_v56, %v1985_v53  ;;  %v1874_v49 = vpack.c.bf16 %v1872_v40, %v1872_v40  ;;  %v2008_v52 = vor.u32 1.1754944e-38, %v2007_v15 }
 0xeca   :  { %v1847_v10 = vadd.f32 %v3217_v61, %v1846_v5  ;;  %2882 = vmatmul.msk.bf16.vlgmr.msra.gmra.mxu1 %vm533_vm1, %v1736_v7  ;;  %vm2006_vm10 = vcmp.eq.f32.partialorder %v2005_v51, 8.507059e+37 }
 0xecb   :  { %v3219_v63 = vpop.eup %3218 }
 0xecc   :  { %v1851_v16 = vsel %vm1850_vm5, %v3217_v61, %v1847_v10  ;;  %v1997_v31 = vmul.f32 %v3219_v63, %v4289_v11  ;;  %vm2002_vm5 = vweird.f32 %v3219_v63 }
 0xecd   :  { %v1856_v21 = vsel %vm1853_vm9, %v1855_v37, %v1851_v16  ;;  %vm2003_vm9 = vmor %vm2001_vm6, %vm2002_vm5 }
 0xece   :  { %v1857_v30 = vmul.f32 %v4256_v48, %v1856_v21  ;;  %v1998_v36 = vsub.f32 1.0, %v1997_v31  ;;  %v1990_v48 = vand.u32 2147483647, %v4282_v6 }
 0xed0   :  { %v1873_v38 = vpack.c.bf16 %v1857_v30, %v1857_v30  ;;  %v1999_v45 = vmul.f32 %v3219_v63, %v1998_v36  ;;  %vm1991_vm4 = vcmp.eq.f32.partialorder %v1990_v48, 8.507059e+37 }
 0xed1   :  { %v1994_v50 = vsel %vm1991_vm4, %v1993_v4, %v1989_v44 }
 0xed2   :  { %2885 = vmatmul.msk.bf16.vlgmr.msra.gmra.mxu3 %vm533_vm1, %v1873_v38  ;;  %v2000_v33 = vadd.f32 %v3219_v63, %v1999_v45  ;;  %v1995_v6 = vmul.f32 %v4254_v29, %v1994_v50 }
 0xed4   :  { %v2004_v2 = vsel %vm2003_vm9, %v3219_v63, %v2000_v33  ;;  %v2011_v54 = vpack.c.bf16 %v1995_v6, %v1995_v6 }
 0xed5   :  { %v2009_v34 = vsel %vm2006_vm10, %v2008_v52, %v2004_v2 }
 0xed6   :  { %v2010_v55 = vmul.f32 %v4262_v26, %v2009_v34 }
 0xed7   :  { %v2035_v46 = vpop.permute.xlu0 %2034 }
 0xed8   :  { %v2040_v25 = vsel %vm632_vm2, %v2035_v46, 0  ;;  %v2012_v56 = vpack.c.bf16 %v2010_v55, %v2010_v55 }
 0xed9   :  { %2049 = vmatpush.bf16.msra.mxu1 %v2040_v25 }
 0xeda   :  { %2886 = vmatmul.msk.bf16.vlgmr.msrb.gmra.mxu1 %vm533_vm1, %v1874_v49 }
 0xee2   :  { %2889 = vmatmul.msk.bf16.vlgmr.msrb.gmra.mxu3 %vm533_vm1, %v2011_v54 }
 0xeea   :  { %2890 = vmatmul.msk.bf16.vlgmr.msra.gmra.mxu1 %vm533_vm1, %v2012_v56 }
 0xf01   :  { %v1610_v57 = vpop.f32.mrf.mxu3 }
 0xf09   :  { %v1612_v58 = vpop.f32.mrf.mxu3  ;;  %v1631_v29 = vpop.f32.mrf.mxu1 }
 0xf0a   :  { %v2991_v58 = vld [vmem:[%s4475_s26 + $0x10] sm:$0xff] }
 0xf11   :  { %v1633_v60 = vpop.f32.mrf.mxu1  ;;  %v1754_v61 = vpop.f32.mrf.mxu3 }
 0xf19   :  { %v1756_v24 = vpop.f32.mrf.mxu3 }
 0xf47   :  { %v1775_v18 = vpop.f32.mrf.mxu1 }
 0xf48   :  { %v3096_v28 = vpack.i.bf16 %v1775_v18, %v1754_v61 }
 0xf4a   :  { %3097 = vrot.lane.b32.xlu1 %v3096_v28, %s3639_s23 }
 0xf4f   :  { %v1777_v11 = vpop.f32.mrf.mxu1 }
 0xf55   :  { %v1892_v0 = vpop.f32.mrf.mxu3 }
 0xf57   :  { %v1913_v1 = vpop.f32.mrf.mxu1 }
 0xf58   :  { %v3101_v13 = vpack.i.bf16 %v1913_v1, %v1892_v0 }
 0xf5a   :  { %3102 = vrot.lane.b32.xlu2 %v3101_v13, %s3614_s11  ;;  %s4478_s11 = sld [smem:[#allocation40_spill]] }
 0xf5d   :  { %v1894_v26 = vpop.f32.mrf.mxu3 }
 0xf5f   :  { %v1915_v19 = vpop.f32.mrf.mxu1 }
 0xf65   :  { %v2030_v3 = vpop.f32.mrf.mxu3 }
 0xf67   :  { %v2051_v62 = vpop.f32.mrf.mxu1 }
 0xf68   :  { %v3106_v5 = vpack.i.bf16 %v2051_v62, %v2030_v3 }
 0xf6a   :  { %3107 = vrot.lane.b32.xlu1 %v3106_v5, %s3640_s4 }
 0xf6d   :  { %v2032_v35 = vpop.f32.mrf.mxu3 }
 0xf6e   :  { %v3125_v35 = vld [vmem:[#allocation10 + $0x1] ss:$0 sm:$0xff] }
 0xf6f   :  { %v2053_v7 = vpop.f32.mrf.mxu1 }
 0xfb4   :  { %v3103_v37 = vpop.permute.xlu2 %3102 }
 0xfb5   :  { %v3105_v21 = vunpack.i.h.bf16 %v3103_v37  ;;  %v3104_v22 = vunpack.i.l.bf16 %v3103_v37 }
 0xfbc   :  { %v3098_v10 = vpop.permute.xlu1 %3097 }
 0xfbd   :  { %v3100_v63 = vunpack.i.h.bf16 %v3098_v10  ;;  %v3099_v12 = vunpack.i.l.bf16 %v3098_v10  ;;  %v3126_v10 = vld [vmem:[#allocation11 + $0x1] ss:$0 sm:$0xff] }
 0xfbf   :  { %v2080_v14 = vsel %vm533_vm1, %v1631_v29, %v3100_v63  ;;  %v2079_v16 = vsel %vm533_vm1, %v1610_v57, %v3099_v12 }
 0xfc0   :  { %v2081_v32 = vsel %vm1116_vm12, %v2079_v16, %v3104_v22  ;;  %v2082_v38 = vsel %vm1116_vm12, %v2080_v14, %v3105_v21  ;;  %v3127_v22 = vld [vmem:[#allocation13 + $0x1] ss:$0 sm:$0xff] }
 0xfdc   :  { %v3108_v27 = vpop.permute.xlu1 %3107 }
 0xfdd   :  { %v3110_v30 = vunpack.i.h.bf16 %v3108_v27  ;;  %v3109_v31 = vunpack.i.l.bf16 %v3108_v27 }
 0xfdf   :  { %v2084_v43 = vsel %vm1119_vm13, %v2082_v38, %v3110_v30  ;;  %v2083_v53 = vsel %vm1119_vm13, %v2081_v32, %v3109_v31 }
 0xfe0   :  { %v2085_v36 = vpack.c.bf16 %v2084_v43, %v2083_v53 }
 0xfe2   :  { %2903 = vmatmul.msk.bf16.vlgmr.msra.gmra.mxu0 %vm412_vm8, %v2085_v36 }
0x105f   :  { %v2120_v40 = vpop.f32.mrf.mxu0 }
0x1060   :  { %v2121_v48 = vadd.f32 %v3124_v39, %v2120_v40 }
0x1062   :  { %v2125_v44 = vadd.f32 %v2121_v48, %v4142_v41 }
0x1064   :  { %v2131_v45 = vsel %vm412_vm8, %v2125_v44, 0.0 }
0x1065   :  { %2132 = vadd.xlane.f32.xlu2 %v2131_v45 }
0x1067   :  { %v2122_v4 = vpop.f32.mrf.mxu0 }
0x1068   :  { %v2123_v46 = vadd.f32 %v3124_v39, %v2122_v4 }
0x106a   :  { %v2126_v25 = vadd.f32 %v2123_v46, %v4144_v42  ;;  %v2992_v42 = vld [vmem:[%s4475_s26 + $0x18] sm:$0xff] }
0x106b   :  { %2217 = vmatpush.bf16.msra.mxu2 %v2992_v42  ;;  %v2996_v46 = vld [vmem:[%s4476_s28 + $0x38] sm:$0xff] }
0x106c   :  { %v2134_v49 = vsel %vm412_vm8, %v2126_v25, 0.0  ;;  %2351 = vmatpush.bf16.msra.mxu3 %v2996_v46 }
0x106d   :  { %2135 = vadd.xlane.f32.xlu0 %v2134_v49 }
0x106f   :  { %2218 = vmatpush.bf16.msra.mxu2 %v2991_v58 }
0x10d8   :  { %v2133_v50 = vpop.xlane.xlu2 %2132 }
0x10d9   :  { %v2137_v33 = vmul.f32 %v2133_v50, %v3916_v47 }
0x10db   :  { %v2139_v15 = vsub.f32 %v2125_v44, %v2137_v33 }
0x10dd   :  { %v2141_v6 = vmul.f32 %v2139_v15, %v2139_v15 }
0x10df   :  { %v2143_v51 = vsel %vm412_vm8, %v2141_v6, 0.0 }
0x10e0   :  { %v2136_v41 = vpop.xlane.xlu0 %2135  ;;  %2144 = vadd.xlane.f32.xlu1 %v2143_v51 }
0x10e1   :  { %v2138_v2 = vmul.f32 %v2136_v41, %v3916_v47 }
0x10e3   :  { %v2140_v52 = vsub.f32 %v2126_v25, %v2138_v2 }
0x10e5   :  { %v2142_v54 = vmul.f32 %v2140_v52, %v2140_v52 }
0x10e7   :  { %v2146_v34 = vsel %vm412_vm8, %v2142_v54, 0.0 }
0x10e8   :  { %2147 = vadd.xlane.f32.xlu2 %v2146_v34  ;;  %v2994_v34 = vld [vmem:[%s4476_s28 + $0x28] sm:$0xff] }
0x1153   :  { %v2145_v55 = vpop.xlane.xlu1 %2144 }
0x1154   :  { %v2149_v56 = vmul.f32 %v2145_v55, %v3916_v47 }
0x1156   :  { %v2151_v57 = vadd.f32 1e-12, %v2149_v56 }
0x1158   :  { %3220 = vrsqrt.f32 %v2151_v57  ;;  %vm2159_vm2 = vweird.f32 %v2151_v57 }
0x115b   :  { %v2148_v29 = vpop.xlane.xlu2 %2147 }
0x115c   :  { %v2150_v60 = vmul.f32 %v2148_v29, %v3916_v47 }
0x115e   :  { %v3221_v61 = vpop.eup %3220  ;;  %v2152_v24 = vadd.f32 1e-12, %v2150_v60 }
0x115f   :  { %v2154_v18 = vmul.f32 %v3221_v61, %v2151_v57  ;;  %vm2160_vm1 = vweird.f32 %v3221_v61 }
0x1160   :  { %3222 = vrsqrt.f32 %v2152_v24  ;;  %vm2161_vm12 = vmor %vm2159_vm2, %vm2160_vm1  ;;  %vm2169_vm11 = vweird.f32 %v2152_v24 }
0x1161   :  { %v2155_v28 = vmul.f32 %v3221_v61, %v2154_v18 }
0x1163   :  { %v2156_v11 = vmul.f32 0.5, %v2155_v28 }
0x1165   :  { %v2157_v0 = vsub.f32 1.5, %v2156_v11 }
0x1166   :  { %v3223_v1 = vpop.eup %3222 }
0x1167   :  { %v2158_v13 = vmul.f32 %v3221_v61, %v2157_v0  ;;  %v2164_v26 = vmul.f32 %v3223_v1, %v2152_v24  ;;  %vm2170_vm13 = vweird.f32 %v3223_v1 }
0x1168   :  { %vm2171_vm14 = vmor %vm2169_vm11, %vm2170_vm13 }
0x1169   :  { %v2165_v19 = vmul.f32 %v3223_v1, %v2164_v26  ;;  %v2162_v3 = vsel %vm2161_vm12, %v3221_v61, %v2158_v13  ;;  %v2993_v61 = vld [vmem:[%s4476_s28 + $0x20] sm:$0xff] }
0x116a   :  { %v2173_v7 = vmul.f32 %v2162_v3, %v2139_v15  ;;  %v2995_v15 = vld [vmem:[%s4476_s28 + $0x30] sm:$0xff] }
0x116b   :  { %v2166_v62 = vmul.f32 0.5, %v2165_v19  ;;  %2352 = vmatpush.bf16.msra.mxu3 %v2995_v15 }
0x116c   :  { %v2178_v63 = vmul.f32 %v3125_v35, %v2173_v7 }
0x116d   :  { %v2167_v5 = vsub.f32 1.5, %v2166_v62 }
0x116e   :  { %v4343_v14 = vadd.f32 %v3126_v10, %v2178_v63 }
0x116f   :  { %v2168_v8 = vmul.f32 %v3223_v1, %v2167_v5  ;;  %2353 = vmatpush.bf16.msra.mxu3 %v2994_v34 }
0x1171   :  { %v2172_v9 = vsel %vm2171_vm14, %v3223_v1, %v2168_v8 }
0x1172   :  { %v2174_v12 = vmul.f32 %v2172_v9, %v2140_v52 }
0x1173   :  { %2354 = vmatpush.bf16.msra.mxu3 %v2993_v61 }
0x1174   :  { %v2179_v37 = vmul.f32 %v3125_v35, %v2174_v12 }
0x1176   :  { %v4345_v16 = vadd.f32 %v3126_v10, %v2179_v37 }
0x1178   :  { %v2185_v21 = vpack.c.bf16 %v4345_v16, %v4343_v14 }
0x117a   :  { %2916 = vmatmul.msk.bf16.vlgmr.msra.gmra.mxu2 %vm412_vm8, %v2185_v21 }
0x11fd   :  { %v2220_v27 = vpop.f32.mrf.mxu2 }
0x11fe   :  { %v4350_v30 = vadd.f32 %v3127_v22, %v2220_v27 }
0x1200   :  { %v4353_v31 = vmul.f32 0.70710677, %v4350_v30 }
0x1202   :  { %v2233_v32 = vand.u32 2147483647, %v4353_v31  ;;  %vm2229_vm2 = vcmp.ge.f32.partialorder %v4353_v31, 0.0 }
0x1204   :  { %v2235_v38 = vmul.f32 0.3275911, %v2233_v32  ;;  %v2287_v55 = vsub.f32 0.0, %v2233_v32 }
0x1205   :  { %v2222_v43 = vpop.f32.mrf.mxu2 }
0x1206   :  { %v2237_v53 = vadd.f32 1.0, %v2235_v38  ;;  %v4356_v36 = vadd.f32 %v3127_v22, %v2222_v43  ;;  %v2289_v18 = vmul.f32 %v2287_v55, %v2233_v32 }
0x1208   :  { %3224 = vrcp.f32 %v2237_v53  ;;  %v4359_v39 = vmul.f32 0.70710677, %v4356_v36  ;;  %v2250_v49 = vand.u32 2147483648, %v2237_v53  ;;  %v2248_v33 = vand.u32 2147483647, %v2237_v53 }
0x1209   :  { %vm2244_vm3 = vweird.f32 %v2237_v53  ;;  %v2291_v26 = vmul.f32 1.442695, %v2289_v18  ;;  %v2226_v15 = vmul.f32 0.5, %v4356_v36  ;;  %v3002_v18 = vld [vmem:[#allocation17 + $0x8] sm:$0xff] }
0x120a   :  { %v2234_v40 = vand.u32 2147483647, %v4359_v39  ;;  %v2251_v51 = vor.u32 1.1754944e-38, %v2250_v49  ;;  %vm2249_vm5 = vcmp.eq.f32.partialorder %v2248_v33, 8.507059e+37  ;;  %vm2230_vm12 = vcmp.ge.f32.partialorder %v4359_v39, 0.0  ;;  %2535 = vmatpush.bf16.msrb.mxu2 %v3002_v18 }
0x120b   :  { %v2225_v33 = vmul.f32 0.5, %v4350_v30 }
0x120c   :  { %v2236_v48 = vmul.f32 0.3275911, %v2234_v40  ;;  %v2288_v3 = vsub.f32 0.0, %v2234_v40 }
0x120e   :  { %v3225_v44 = vpop.eup %3224  ;;  %v2238_v4 = vadd.f32 1.0, %v2236_v48  ;;  %v2290_v8 = vmul.f32 %v2288_v3, %v2234_v40 }
0x120f   :  { %v2240_v45 = vmul.f32 %v3225_v44, %v2237_v53  ;;  %vm2245_vm15 = vweird.f32 %v3225_v44 }
0x1210   :  { %3226 = vrcp.f32 %v2238_v4  ;;  %vm2246_vm4 = vmor %vm2244_vm3, %vm2245_vm15  ;;  %v2265_v58 = vand.u32 2147483648, %v2238_v4  ;;  %v2263_v60 = vand.u32 2147483647, %v2238_v4  ;;  %vm2259_vm9 = vweird.f32 %v2238_v4 }
0x1211   :  { %v2241_v25 = vsub.f32 1.0, %v2240_v45  ;;  %3228 = vpow2.f32 %v2291_v26  ;;  %v2293_v37 = vmul.f32 1.442695, %v2290_v8  ;;  %v2231_v45 = vsel %vm2229_vm2, 1.0, %v3641_v59 }
0x1212   :  { %v2266_v0 = vor.u32 1.1754944e-38, %v2265_v58  ;;  %vm2264_vm1 = vcmp.eq.f32.partialorder %v2263_v60, 8.507059e+37  ;;  %v2610_v8 = vshrl.u32 %v282_v17, 7 }
0x1213   :  { %v2242_v50 = vmul.f32 %v3225_v44, %v2241_v25  ;;  %3230 = vpow2.f32 %v2293_v37  ;;  %v2232_v25 = vsel %vm2230_vm12, 1.0, %v3641_v59 }
0x1214   :  { %3111 = vset.pattern.permute.xlu0 %v2610_v8  ;;  %3112 = vset.pattern.permute.xlu1 %v2610_v8 }
0x1215   :  { %v2243_v6 = vadd.f32 %v3225_v44, %v2242_v50 }
0x1216   :  { %v3227_v41 = vpop.eup %3226 }
0x1217   :  { %v2247_v2 = vsel %vm2246_vm4, %v3225_v44, %v2243_v6  ;;  %v2255_v54 = vmul.f32 %v3227_v41, %v2238_v4  ;;  %vm2260_vm6 = vweird.f32 %v3227_v41  ;;  %v3229_v22 = vpop.eup %3228 }
0x1218   :  { %v2252_v52 = vsel %vm2249_vm5, %v2251_v51, %v2247_v2  ;;  %vm2261_vm10 = vmor %vm2259_vm9, %vm2260_vm6  ;;  %v3128_v2 = vld [vmem:[#allocation14 + $0x1] ss:$0 sm:$0xff]  ;;  %vm2436_vm9 = vcmask 1041409  }
0x1219   :  { %v2269_v42 = vmul.f32 1.0614054, %v2252_v52  ;;  %v2256_v56 = vsub.f32 1.0, %v2255_v54  ;;  %v3231_v44 = vpop.eup %3230 }
0x121b   :  { %v2271_v57 = vadd.f32 -1.4531521, %v2269_v42  ;;  %v2257_v29 = vmul.f32 %v3227_v41, %v2256_v56 }
0x121d   :  { %v2273_v24 = vmul.f32 %v2271_v57, %v2252_v52  ;;  %v2258_v28 = vadd.f32 %v3227_v41, %v2257_v29 }
0x121f   :  { %v2275_v11 = vadd.f32 1.4214138, %v2273_v24  ;;  %v2262_v1 = vsel %vm2261_vm10, %v3227_v41, %v2258_v28  ;;  %vm2579_vm10 = vcmp.lt.s32.totalorder %v3903_v20, 5 }
0x1220   :  { %v2267_v19 = vsel %vm2264_vm1, %v2266_v0, %v2262_v1  ;;  %v3001_v1 = vld [vmem:[#allocation17] sm:$0xff]  ;;  %vm2634_vm1 = vcmask 58368  }
0x1221   :  { %v2277_v13 = vmul.f32 %v2275_v11, %v2252_v52  ;;  %v2270_v62 = vmul.f32 1.0614054, %v2267_v19  ;;  %2536 = vmatpush.bf16.msrb.mxu2 %v3001_v1 }
0x1223   :  { %v2279_v5 = vadd.f32 -0.28449672, %v2277_v13  ;;  %v2272_v35 = vadd.f32 -1.4531521, %v2270_v62  ;;  %v2998_v13 = vld [vmem:[%s4478_s11 + $0x8] sm:$0xff] }
0x1224   :  { %2460 = vmatpush.bf16.msrb.mxu1 %v2998_v13  ;;  %v3133_v13 = vld [vmem:[%s4483_s20] ss:$0 sm:$0xff] }
0x1225   :  { %v2281_v7 = vmul.f32 %v2279_v5, %v2252_v52  ;;  %v2274_v9 = vmul.f32 %v2272_v35, %v2267_v19 }
0x1227   :  { %v2283_v10 = vadd.f32 0.2548296, %v2281_v7  ;;  %v2276_v63 = vadd.f32 1.4214138, %v2274_v9  ;;  %v2602_v9 = vld [vmem:[#allocation2] sm:$0x3] }
0x1228   :  { %vm2605_vm13 = vcmp.ne.s32.totalorder %v2602_v9, 4294967196 }
0x1229   :  { %v2285_v12 = vmul.f32 %v2283_v10, %v2252_v52  ;;  %v2278_v21 = vmul.f32 %v2276_v63, %v2267_v19  ;;  %v2603_v10 = vld [vmem:[%s4473_s22] sm:$0x3] }
0x122b   :  { %v2295_v27 = vmul.f32 %v3229_v22, %v2285_v12  ;;  %v2280_v32 = vadd.f32 -0.28449672, %v2278_v21 }
0x122d   :  { %v2282_v38 = vmul.f32 %v2280_v32, %v2267_v19  ;;  %v2297_v43 = vsub.f32 1.0, %v2295_v27 }
0x122f   :  { %v2284_v53 = vadd.f32 0.2548296, %v2282_v38  ;;  %v2299_v40 = vmul.f32 %v2297_v43, %v2231_v45 }
0x1231   :  { %v2286_v48 = vmul.f32 %v2284_v53, %v2267_v19  ;;  %v2301_v49 = vadd.f32 1.0, %v2299_v40  ;;  %v2997_v19 = vld [vmem:[%s4478_s11] sm:$0xff]  ;;  %v3129_v53 = vld [vmem:[#allocation16 + $0x1] ss:$0 sm:$0xff] }
0x1232   :  { %2461 = vmatpush.bf16.msrb.mxu1 %v2997_v19  ;;  %v3130_v40 = vld [vmem:[%s4477_s21 + $0x1] ss:$0 sm:$0xff] }
0x1233   :  { %v2296_v4 = vmul.f32 %v3231_v44, %v2286_v48  ;;  %v2303_v6 = vmul.f32 %v2301_v49, %v2225_v33 }
0x1235   :  { %v2298_v46 = vsub.f32 1.0, %v2296_v4 }
0x1237   :  { %v2300_v50 = vmul.f32 %v2298_v46, %v2232_v25 }
0x1239   :  { %v2302_v31 = vadd.f32 1.0, %v2300_v50 }
0x123b   :  { %v2304_v51 = vmul.f32 %v2302_v31, %v2226_v15 }
0x123d   :  { %v2305_v41 = vpack.c.bf16 %v2304_v51, %v2303_v6 }
0x123f   :  { %2941 = vmatmul.msk.bf16.vlgmr.msra.gmra.mxu3 %vm1373_vm7, %v2305_v41  ;;  %vm2604_vm7 = vcmp.eq.s32.totalorder %v2603_v10, 1 }
0x1240   :  { %vm4387_vm11 = vmand %vm2604_vm7, %vm2605_vm13 }
0x1241   :  { %v2970_v18 = vsel %vm4387_vm11, 1.0, %v3627_v23 }
0x12c2   :  { %v2356_v52 = vpop.f32.mrf.mxu3 }
0x12c3   :  { %v2357_v54 = vadd.f32 %v3128_v2, %v2356_v52 }
0x12c5   :  { %v2361_v39 = vadd.f32 %v2357_v54, %v4343_v14 }
0x12c7   :  { %v2367_v34 = vsel %vm412_vm8, %v2361_v39, 0.0 }
0x12c8   :  { %2368 = vadd.xlane.f32.xlu1 %v2367_v34  ;;  %v2999_v34 = vld [vmem:[%s4481_s1] sm:$0xff] }
0x12ca   :  { %v2358_v59 = vpop.f32.mrf.mxu3 }
0x12cb   :  { %v2359_v42 = vadd.f32 %v3128_v2, %v2358_v59  ;;  %v3131_v59 = vld [vmem:[%s3791_s8] ss:$0 sm:$0xff]  ;;  %s4484_s8 = sld [smem:[#allocation32_spill]] }
0x12cd   :  { %v2362_v30 = vadd.f32 %v2359_v42, %v4345_v16  ;;  %v3132_v42 = vld [vmem:[%s4482_s7] ss:$0 sm:$0xff] }
0x12cf   :  { %v2370_v36 = vsel %vm412_vm8, %v2362_v30, 0.0 }
0x12d0   :  { %2371 = vadd.xlane.f32.xlu0 %v2370_v36 }
0x133b   :  { %v2369_v55 = vpop.xlane.xlu1 %2368 }
0x133c   :  { %v2373_v56 = vmul.f32 %v2369_v55, %v3916_v47 }
0x133e   :  { %v2375_v57 = vsub.f32 %v2361_v39, %v2373_v56  ;;  %v3000_v39 = vld [vmem:[%s4481_s1 + $0x8] sm:$0xff] }
0x133f   :  { %2498 = vmatpush.bf16.msrb.mxu0 %v3000_v39 }
0x1340   :  { %v2377_v58 = vmul.f32 %v2375_v57, %v2375_v57 }
0x1342   :  { %v2379_v29 = vsel %vm412_vm8, %v2377_v58, 0.0 }
0x1343   :  { %v2372_v60 = vpop.xlane.xlu0 %2371  ;;  %2380 = vadd.xlane.f32.xlu0 %v2379_v29  ;;  %2499 = vmatpush.bf16.msrb.mxu0 %v2999_v34 }
0x1344   :  { %v2374_v14 = vmul.f32 %v2372_v60, %v3916_v47 }
0x1346   :  { %v2376_v61 = vsub.f32 %v2362_v30, %v2374_v14 }
0x1348   :  { %v2378_v24 = vmul.f32 %v2376_v61, %v2376_v61 }
0x134a   :  { %v2382_v16 = vsel %vm412_vm8, %v2378_v24, 0.0 }
0x134b   :  { %2383 = vadd.xlane.f32.xlu2 %v2382_v16 }
0x13b6   :  { %v2381_v28 = vpop.xlane.xlu0 %2380 }
0x13b7   :  { %v2385_v11 = vmul.f32 %v2381_v28, %v3916_v47  ;;  %v2635_v28 = vsel %vm2634_vm1, %v2970_v18, 0.0 }
0x13b9   :  { %v2387_v0 = vadd.f32 1e-12, %v2385_v11 }
0x13bb   :  { %3232 = vrsqrt.f32 %v2387_v0  ;;  %vm2395_vm15 = vweird.f32 %v2387_v0 }
0x13be   :  { %v2384_v26 = vpop.xlane.xlu2 %2383 }
0x13bf   :  { %v2386_v3 = vmul.f32 %v2384_v26, %v3916_v47  ;;  %v4393_v47 = vsel %vm4387_vm11, %v2602_v9, 0  ;;  %v2546_v9 = vld [vmem:[%s4484_s8] sm:$0x3] }
0x13c0   :  { %v2608_v27 = vperm.slane %v4393_v47, 0  ;;  %v2615_v16 = vperm.slane %v4393_v47, 1 }
0x13c1   :  { %v3233_v62 = vpop.eup %3232  ;;  %v2388_v5 = vadd.f32 1e-12, %v2386_v3 }
0x13c2   :  { %v2390_v35 = vmul.f32 %v3233_v62, %v2387_v0  ;;  %vm2396_vm14 = vweird.f32 %v3233_v62  ;;  %2613 = vperm.xlu0 %3111, %v2608_v27  }
0x13c3   :  { %3234 = vrsqrt.f32 %v2388_v5  ;;  %vm2397_vm3 = vmor %vm2395_vm15, %vm2396_vm14  ;;  %vm2405_vm5 = vweird.f32 %v2388_v5 }
0x13c4   :  { %v2391_v7 = vmul.f32 %v3233_v62, %v2390_v35 }
0x13c6   :  { %v2392_v63 = vmul.f32 0.5, %v2391_v7 }
0x13c8   :  { %v2393_v37 = vsub.f32 1.5, %v2392_v63 }
0x13c9   :  { %v3235_v21 = vpop.eup %3234 }
0x13ca   :  { %v2394_v17 = vmul.f32 %v3233_v62, %v2393_v37  ;;  %v2400_v22 = vmul.f32 %v3235_v21, %v2388_v5  ;;  %vm2406_vm4 = vweird.f32 %v3235_v21 }
0x13cb   :  { %vm2407_vm6 = vmor %vm2405_vm5, %vm2406_vm4 }
0x13cc   :  { %v2398_v32 = vsel %vm2397_vm3, %v3233_v62, %v2394_v17  ;;  %v2401_v38 = vmul.f32 %v3235_v21, %v2400_v22 }
0x13cd   :  { %v2409_v48 = vmul.f32 %v2398_v32, %v2375_v57 }
0x13ce   :  { %v2402_v43 = vmul.f32 0.5, %v2401_v38 }
0x13cf   :  { %v2414_v4 = vmul.f32 %v3129_v53, %v2409_v48 }
0x13d0   :  { %v2403_v44 = vsub.f32 1.5, %v2402_v43 }
0x13d1   :  { %v2419_v49 = vadd.f32 %v3130_v40, %v2414_v4  ;;  %v3642_v4 = vmov 6.0  }
0x13d2   :  { %v2404_v45 = vmul.f32 %v3235_v21, %v2403_v44 }
0x13d3   :  { %v2421_v15 = vpack.c.bf16 %v2419_v49, %v2419_v49 }
0x13d4   :  { %v2408_v46 = vsel %vm2407_vm6, %v3235_v21, %v2404_v45 }
0x13d5   :  { %v2410_v25 = vmul.f32 %v2408_v46, %v2376_v61  ;;  %v2433_v41 = vunpack.c.l.b16 %v2421_v15 }
0x13d7   :  { %v2415_v50 = vmul.f32 %v3129_v53, %v2410_v25 }
0x13d9   :  { %v2420_v33 = vadd.f32 %v3130_v40, %v2415_v50 }
0x13db   :  { %v2422_v31 = vpack.c.bf16 %v2420_v33, %v2420_v33  ;;  %v2505_v6 = vpack.c.bf16 %v2420_v33, %v2419_v49 }
0x13dd   :  { %v2434_v51 = vunpack.c.l.b16 %v2422_v31  ;;  %2969 = vmatmul.msk.bf16.vlgmr.msrb.gmra.mxu2 %vm412_vm8, %v2505_v6 }
0x13df   :  { %v2435_v2 = vrot.slane %v2434_v51, 7 }
0x13e1   :  { %v2437_v52 = vsel %vm2436_vm9, %v2435_v2, %v2433_v41 }
0x13e2   :  { %v2438_v54 = vpack.c.b16 %v2437_v52, %v2437_v52 }
0x13e4   :  { %2951 = vmatmul.msk.bf16.vlgmr.msrb.gmra.mxu1 %vm412_vm8, %v2438_v54 }
0x1434   :  { %v2614_v48 = vpop.permute.xlu0 %2613 }
0x1435   :  { %vm2622_vm2 = vcmp.eq.s32.totalorder %v3903_v20, %v2614_v48 }
0x1460   :  { %v2538_v30 = vpop.f32.mrf.mxu2 }
0x1461   :  { %v2539_v36 = vadd.f32 %v3131_v59, %v2538_v30  ;;  %v2463_v55 = vpop.f32.mrf.mxu1 }
0x1462   :  { %v2464_v56 = vadd.f32 %v3132_v42, %v2463_v55 }
0x1463   :  { %2544 = vst [vmem:[#allocation20] sm:$0xff] %v2539_v36  ;;  %v2580_v57 = vsel %vm2579_vm10, %v2539_v36, -1e+30  ;;  %v2624_v44 = vsel %vm2622_vm2, %v2539_v36, 0.0 }
0x1464   :  { %3236 = vtanh.f32 %v2464_v56  ;;  %2582 = vmax.xlane.f32.xlu1 %v2580_v57 }
0x1468   :  { %v2540_v58 = vpop.f32.mrf.mxu2 }
0x1469   :  { %v2541_v29 = vadd.f32 %v3131_v59, %v2540_v58  ;;  %v2465_v60 = vpop.f32.mrf.mxu1 }
0x146a   :  { %v3237_v14 = vpop.eup %3236 }
0x146b   :  { %v2468_v61 = vpack.c.bf16 %v3237_v14, %v3237_v14  ;;  %2545 = vst [vmem:[#allocation20 + $0x8] sm:$0xff] %v2541_v29  ;;  %v2581_v24 = vsel %vm2579_vm10, %v2541_v29, -1e+30 }
0x146c   :  { %2584 = vmax.xlane.f32.xlu2 %v2581_v24 }
0x146d   :  { %2960 = vmatmul.msk.bf16.vlgmr.msrb.gmra.mxu0 %vm412_vm8, %v2468_v61  ;;  %vm2558_vm8 = vcmp.lt.s32.totalorder %v3903_v20, 3 }
0x1474   :  { %2636 = vadd.xlane.f32.xlu2 %v2635_v28 }
0x147d   :  { %2620 = vperm.xlu1 %3112, %v2615_v16  }
0x14d7   :  { %v2583_v10 = vpop.xlane.xlu1 %2582 }
0x14d8   :  { %v2586_v21 = vsub.f32 %v2580_v57, %v2583_v10 }
0x14da   :  { %v2588_v32 = vmul.f32 1.442695, %v2586_v21 }
0x14df   :  { %v4411_v11 = vpop.xlane.xlu2 %2584 }
0x14e0   :  { %v2587_v0 = vsub.f32 %v2581_v24, %v4411_v11 }
0x14e2   :  { %v2590_v1 = vmul.f32 1.442695, %v2587_v0 }
0x14e4   :  { %3238 = vpow2.f32 %v2590_v1 }
0x14e7   :  { %v2637_v46 = vpop.xlane.xlu2 %2636 }
0x14e8   :  { %v2638_v49 = vrot.slane %v2637_v46, 4 }
0x14ea   :  { %v3239_v26 = vpop.eup %3238  ;;  %v2501_v19 = vpop.f32.mrf.mxu0  ;;  %v2639_v33 = vadd.f32 %v2638_v49, %v2637_v46 }
0x14eb   :  { %v2502_v3 = vadd.f32 %v3133_v13, %v2501_v19  ;;  %2594 = vadd.xlane.f32.xlu1 %v3239_v26 }
0x14ec   :  { %v2640_v6 = vrot.slane %v2639_v33, 2 }
0x14ed   :  { %v2550_v62 = vand.u32 2147483647, %v2502_v3  ;;  %2543 = vst [vmem:[#allocation19] sm:$0x3] %v2502_v3  ;;  %v2547_v63 = vmax.f32 %v2502_v3, 0.0  ;;  %v2548_v47 = vmul.f32 %v2546_v9, %v2502_v3 }
0x14ee   :  { %v2641_v54 = vadd.f32 %v2640_v6, %v2639_v33 }
0x14ef   :  { %v2551_v5 = vsub.f32 0.0, %v2550_v62  ;;  %v2549_v17 = vsub.f32 %v2547_v63, %v2548_v47  ;;  %v2621_v45 = vpop.permute.xlu1 %2620 }
0x14f0   :  { %vm2623_vm12 = vcmp.eq.s32.totalorder %v3903_v20, %v2621_v45  ;;  %v2642_v36 = vrot.slane %v2641_v54, 1 }
0x14f1   :  { %v2552_v23 = vmul.f32 1.442695, %v2551_v5  ;;  %v2625_v40 = vsel %vm2623_vm12, %v2541_v29, 0.0 }
0x14f2   :  { %v2503_v35 = vpop.f32.mrf.mxu0  ;;  %v2643_v57 = vadd.f32 %v2642_v36, %v2641_v54 }
0x14f3   :  { %3240 = vpow2.f32 %v2552_v23 }
0x14f9   :  { %v3241_v7 = vpop.eup %3240 }
0x14fa   :  { %v2554_v8 = vadd.f32 1.0, %v3241_v7 }
0x14fc   :  { %3242 = vlog2.f32 %v2554_v8 }
0x14fd   :  { %3244 = vpow2.f32 %v2588_v32 }
0x14fe   :  { %3246 = vrcp.f32 %v3642_v4 }
0x1502   :  { %v3243_v37 = vpop.eup %3242 }
0x1503   :  { %v2556_v22 = vmul.f32 0.6931472, %v3243_v37  ;;  %v3245_v53 = vpop.eup %3244 }
0x1504   :  { %v3247_v25 = vpop.eup %3246 }
0x1505   :  { %v2557_v27 = vadd.f32 %v2556_v22, %v2549_v17  ;;  %v2571_v50 = vmul.f32 6.0, %v3247_v25 }
0x1507   :  { %v2559_v38 = vsel %vm2558_vm8, %v2557_v27, 0.0  ;;  %v2572_v15 = vsub.f32 1.0, %v2571_v50 }
0x1508   :  { %v2560_v43 = vsel %vm390_vm0, %v2559_v38, 0.0  ;;  %vm2575_vm0 = vweird.f32 %v3247_v25 }
0x1509   :  { %2561 = vadd.xlane.f32.xlu2 %v2560_v43  ;;  %v2573_v2 = vmul.f32 %v3247_v25, %v2572_v15 }
0x150b   :  { %v2574_v59 = vadd.f32 %v3247_v25, %v2573_v2 }
0x150d   :  { %v2576_v56 = vsel %vm2575_vm0, %v3247_v25, %v2574_v59 }
0x1511   :  { %2592 = vadd.xlane.f32.xlu2 %v3245_v53 }
0x1519   :  { %2626 = vadd.xlane.f32.xlu2 %v2624_v44 }
0x1521   :  { %2628 = vadd.xlane.f32.xlu2 %v2625_v40 }
0x155e   :  { %v2595_v39 = vpop.xlane.xlu1 %2594 }
0x157c   :  { %v2562_v31 = vpop.xlane.xlu2 %2561 }
0x157d   :  { %v2563_v51 = vrot.slane %v2562_v31, 4 }
0x157f   :  { %v2564_v41 = vadd.f32 %v2563_v51, %v2562_v31 }
0x1581   :  { %v2565_v52 = vrot.slane %v2564_v41, 2 }
0x1583   :  { %v2566_v34 = vadd.f32 %v2565_v52, %v2564_v41 }
0x1584   :  { %v2593_v42 = vpop.xlane.xlu2 %2592 }
0x1585   :  { %3248 = vlog2.f32 %v2593_v42  ;;  %v2567_v30 = vrot.slane %v2566_v34, 1 }
0x1586   :  { %3250 = vlog2.f32 %v2595_v39 }
0x1587   :  { %v2568_v55 = vadd.f32 %v2567_v30, %v2566_v34 }
0x1589   :  { %3003 = vpush %v2568_v55 }
0x158a   :  { %3005 = vpush %v2576_v56 }
0x158b   :  { %v3249_v58 = vpop.eup %3248  ;;  %3007 = vpush %v2643_v57 }
0x158c   :  { %v3251_v29 = vpop.eup %3250  ;;  %v2597_v60 = vmul.f32 0.6931472, %v3249_v58  ;;  %v2627_v14 = vpop.xlane.xlu2 %2626 }
0x158d   :  { %v2599_v61 = vmul.f32 0.6931472, %v3251_v29 }
0x158e   :  { %v2600_v24 = vadd.f32 %v2597_v60, %v2583_v10 }
0x158f   :  { %v2601_v18 = vadd.f32 %v2599_v61, %v4411_v11 }
0x1590   :  { %v2630_v16 = vsub.f32 %v2600_v24, %v2627_v14 }
0x1592   :  { %v2647_v1 = vperm.slane %v2630_v16, %v3903_v20 }
0x1594   :  { %v2629_v28 = vpop.xlane.xlu2 %2628 }
0x1595   :  { %v2631_v0 = vsub.f32 %v2601_v18, %v2629_v28 }
0x1597   :  { %v2648_v13 = vperm.slane %v2631_v0, %v3903_v20 }
0x1599   :  { %v2649_v26 = vsel %vm2436_vm9, %v2648_v13, %v2647_v1 }
0x159a   :  { %v2651_v19 = vsel %vm4387_vm11, %v2649_v26, 0.0 }
0x159b   :  { %v2652_v3 = vsel %vm2634_vm1, %v2651_v19, 0.0 }
0x159c   :  { %2653 = vadd.xlane.f32.xlu0 %v2652_v3 }
0x15ba   :  { %s4427_s27 = spop %3003 }
0x15bb   :  { %s4429_s24 = spop %3005 }
0x15bc   :  { %s2578_s14 = smul.f32 %s4429_s24, %s4427_s27 }
0x15bd   :  { %3517 = shalt.err (!%p3514_p12)
}
0x15be   :  { %s3644_s10 = smov 128   ;;  %s3645_s2 = smov [#allocation19]  }
0x15bf   :  { %2710 = dma.vmem_to_hbm [thread:$0]  %s2703_s9, 256, %s2705_s17, [#allocation21], %s3644_s10, %s3644_s10, %s3639_s23  }
0x15c0   :  { %s2692_s18 = sshll.u32 %s3645_s2, 4  ;;  %s2694_s22 = sshll.u32 %s3796_s19, 4  ;;  %s2693_s18 = int_to_ptr.vmem [resolvable:$true] %s2692_s18  ;;  %s2695_s22 = int_to_ptr.hbm [resolvable:$true] %s2694_s22 }
0x15c1   :  { %s3530_s12 = sshra.s32 %s2695_s22, 4  ;;  %s3534_s13 = scalar_lea.hbm %s3796_s19, 2  ;;  %s3531_s12 = int_to_ptr.hbm [resolvable:$true] %s3530_s12 }
0x15c2   :  { %s3532_s30 = scalar_lea.hbm %s3531_s12, 2  ;;  %p3535_p0 = scmp.lt.s32.totalorder %s3531_s12, %s3796_s19 }
0x15c3   :  { %p3533_p13 = scmp.ne.s32.totalorder %s3531_s12, %s3532_s30  ;;  %p3536_p1 = scmp.lt.s32.totalorder %s3534_s13, %s3532_s30 }
0x15c5   :  { %p3537_p2 = por %p3536_p1, %p3535_p0 }
0x15c7   :  { %p3538_p3 = pnand %p3537_p2, %p3533_p13 }
0x15c9   :  { %3541 = shalt.err (!%p3538_p3)
}
0x15ca   :  { %2697 = dma.vmem_to_hbm [thread:$0]  %s2693_s18, 32, %s2695_s22, [#allocation4]   ;;  %vm2681_vm15 = vcmp.eq.s32.totalorder %v3903_v20, 1  ;;  %vm2680_vm3 = vcmp.eq.s32.totalorder %v3903_v20, 0  ;;  %v2684_v43 = vstv %s2578_s14 }
0x15cb   :  { %s3008_s6 = spop %3007  ;;  %s3646_s16 = smov 1.0  }
0x15cc   :  { %s2662_s0 = smax.f32 %s3646_s16, %s3008_s6  ;;  %s2718_s4 = sshll.u32 %s3806_s29, 4  ;;  %s2719_s4 = int_to_ptr.hbm [resolvable:$true] %s2718_s4 }
0x15cd   :  { %v2663_v12 = vstv %s2662_s0  ;;  %s3647_s28 = smov [#allocation22]   ;;  %s3554_s11 = sshra.s32 %s2719_s4, 4  ;;  %s3555_s11 = int_to_ptr.hbm [resolvable:$true] %s3554_s11 }
0x15ce   :  { %3252 = vrcp.f32 %v2663_v12  ;;  %v2675_v47 = vand.u32 2147483648, %v2663_v12  ;;  %vm2669_vm13 = vweird.f32 %v2663_v12  ;;  %v2673_v37 = vand.u32 2147483647, %v2663_v12  ;;  %s2716_s21 = sshll.u32 %s3647_s28, 4  ;;  %s3556_s1 = scalar_lea.hbm %s3555_s11, 1  ;;  %s2717_s21 = int_to_ptr.vmem [resolvable:$true] %s2716_s21 }
0x15cf   :  { %p3557_p4 = scmp.ne.s32.totalorder %s3555_s11, %s3556_s1  ;;  %s3558_s7 = scalar_lea.hbm %s3806_s29, 1 }
0x15d0   :  { %v2676_v27 = vor.u32 1.1754944e-38, %v2675_v47  ;;  %vm2674_vm14 = vcmp.eq.f32.partialorder %v2673_v37, 8.507059e+37  ;;  %p3559_p5 = scmp.lt.s32.totalorder %s3555_s11, %s3806_s29  ;;  %p3560_p6 = scmp.lt.s32.totalorder %s3558_s7, %s3556_s1 }
0x15d2   :  { %p3561_p7 = por %p3560_p6, %p3559_p5 }
0x15d4   :  { %v3253_v11 = vpop.eup %3252  ;;  %p3562_p8 = pnand %p3561_p7, %p3557_p4 }
0x15d5   :  { %v2665_v62 = vmul.f32 %v3253_v11, %v2663_v12  ;;  %vm2670_vm7 = vweird.f32 %v3253_v11 }
0x15d6   :  { %vm2671_vm11 = vmor %vm2669_vm13, %vm2670_vm7 }
0x15d7   :  { %v2666_v5 = vsub.f32 1.0, %v2665_v62 }
0x15d9   :  { %v2667_v7 = vmul.f32 %v3253_v11, %v2666_v5 }
0x15db   :  { %v2668_v10 = vadd.f32 %v3253_v11, %v2667_v7 }
0x15dd   :  { %v2672_v17 = vsel %vm2671_vm11, %v3253_v11, %v2668_v10 }
0x15de   :  { %v2677_v32 = vsel %vm2674_vm14, %v2676_v27, %v2672_v17 }
0x160f   :  { %v2654_v23 = vpop.xlane.xlu0 %2653 }
0x1610   :  { %v2655_v35 = vrot.slane %v2654_v23, 4 }
0x1612   :  { %v2656_v8 = vadd.f32 %v2655_v35, %v2654_v23 }
0x1614   :  { %v2657_v9 = vrot.slane %v2656_v8, 2 }
0x1616   :  { %v2658_v63 = vadd.f32 %v2657_v9, %v2656_v8 }
0x1618   :  { %v2659_v21 = vrot.slane %v2658_v63, 1 }
0x161a   :  { %v2660_v22 = vadd.f32 %v2659_v21, %v2658_v63 }
0x161c   :  { %3009 = vpush %v2660_v22 }
0x161d   :  { %3011 = vpush %v2677_v32 }
0x164d   :  { %s3010_s19 = spop %3009 }
0x164e   :  { %s3012_s23 = spop %3011 }
0x164f   :  { %s2679_s26 = smul.f32 %s3012_s23, %s3010_s19 }
0x1651   :  { %v2682_v38 = vstv %s2679_s26 }
0x1652   :  { %v2683_v53 = vsel %vm2681_vm15, %v2682_v38, 0.0 }
0x1653   :  { %v2685_v48 = vsel %vm2680_vm3, %v2684_v43, %v2683_v53 }
0x1654   :  { %2686 = vst [vmem:[#allocation22] sm:$0x1] %v2685_v48 }
0x1655   :  { %3565 = shalt.err (!%p3562_p8)
}
0x1656   :  { %2721 = dma.vmem_to_hbm [thread:$0]  %s2717_s21, 16, %s2719_s4, [#allocation21]  }
0x1657   :  { %3578 = dma.done.wait [#allocation4], 32  }
0x1658   :  { %3579 = vsyncadd [#allocation4], 4294967264 }
0x1659   :  { %3580 = dma.done.wait [#allocation21], 272  }
0x165a   :  { %3581 = vsyncadd [#allocation21], 4294967024 }
0x165b   :  { %2734 = vsyncpa [#allocation3], 1 }
0x165c   :  { %2735 = vsyncpa [#allocation6], 1 }
0x165d   :  { %2736 = vsyncpa [#allocation9], 1 }
0x165e   :  { %2737 = vsyncpa [#allocation12], 1 }
0x165f   :  { %2738 = vsyncpa [#allocation15], 1 }
0x1660   :  { %2739 = vsyncpa [#allocation18], 1 }
0x1661   :  { %2740 = vsyncpa [#allocation4], 1 }
0x1662   :  { %2741 = vsyncpa [#allocation21], 1 }

</bundles_post_ra>
